<compile_context>
chip_gen: v7x
topology: tpu7x:2x2x1
jax: 0.10.0
libtpu: 0.0.40
codegen_flags: <defaults>
</compile_context>

<pallas_src>
import functools

import jax
import jax.numpy as jnp
from jax import lax
from jax.experimental import pallas as pl
from jax.experimental.pallas import tpu as pltpu


# ----------------------------------------------------------------------------
# helpers
# ----------------------------------------------------------------------------

def _sigmoid(x):
    return 1.0 / (1.0 + jnp.exp(-x))


def _ln(x, g, b, eps):
    mean = jnp.mean(x, axis=-1, keepdims=True)
    xc = x - mean
    var = jnp.mean(xc * xc, axis=-1, keepdims=True)
    return xc * lax.rsqrt(var + eps) * g + b


def _softmax(s):
    s = s - jnp.max(s, axis=-1, keepdims=True)
    e = jnp.exp(s)
    return e / jnp.sum(e, axis=-1, keepdims=True)


def _spec(shape):
    nd = len(shape)
    return pl.BlockSpec(shape, lambda *_: (0,) * nd)


# ----------------------------------------------------------------------------
# K1: LSTM (single invocation, hoisted input projection, unrolled recurrence)
# ----------------------------------------------------------------------------

def _lstm_kernel(x_ref, wih_ref, whh_ref, b_ref, y_ref, *, T, H):
    # x_ref: (B, T, DIN_P) batch-first; wih: (DIN_P, 4H); whh: (H, 4H); b: (1, 4H)
    # y_ref: (B, T, H) batch-first
    B = x_ref.shape[0]
    din_p = x_ref.shape[2]
    xf = x_ref[...].reshape(B * T, din_p)
    # hoisted input projection for all timesteps (one matmul)
    gx = jnp.dot(xf, wih_ref[...], preferred_element_type=jnp.float32) + b_ref[...]
    gx = gx.reshape(B, T, 4 * H)

    whh = whh_ref[...]
    h = jnp.zeros((B, H), jnp.float32)
    c = jnp.zeros((B, H), jnp.float32)
    for t in range(T):   # fully unrolled, only h@W_hh on the serial critical path
        gates = gx[:, t, :] + jnp.dot(h, whh, preferred_element_type=jnp.float32)
        i_g = _sigmoid(gates[:, 0:H])
        f_g = _sigmoid(gates[:, H:2 * H])
        g_g = jnp.tanh(gates[:, 2 * H:3 * H])
        o_g = _sigmoid(gates[:, 3 * H:4 * H])
        c = f_g * c + i_g * g_g
        h = o_g * jnp.tanh(c)
        y_ref[:, t:t + 1, :] = h.reshape(B, 1, H)


def lstm(x_bf, lp, hidden_size):
    # x_bf: (B, T, DIN) batch-first
    B, T, DIN = x_bf.shape
    H = hidden_size
    DIN_P = lp["w_ih"].shape[0]
    x_p = jnp.pad(x_bf, ((0, 0), (0, 0), (0, DIN_P - DIN)))
    return pl.pallas_call(
        functools.partial(_lstm_kernel, T=T, H=H),
        out_shape=jax.ShapeDtypeStruct((B, T, H), jnp.float32),
        grid=(1,),
        in_specs=[_spec((B, T, DIN_P)), _spec((DIN_P, 4 * H)),
                  _spec((H, 4 * H)), _spec((1, 4 * H))],
        out_specs=_spec((B, T, H)),
        compiler_params=pltpu.CompilerParams(dimension_semantics=("arbitrary",)),
    )(x_p, lp["w_ih"], lp["w_hh"], lp["b"])


# ----------------------------------------------------------------------------
# K2: fused TransformerEncoderLayer (QKV + attention + out-proj + LN1 + FFN + LN2)
# ----------------------------------------------------------------------------

def _xformer_kernel(x_ref, win_ref, bin_ref, wo_ref, bo_ref, g1_ref, be1_ref,
                    w1_ref, bf1_ref, w2_ref, bf2_ref, g2_ref, be2_ref, o_ref,
                    *, num_heads, eps):
    B, L, E = x_ref.shape
    dh = E // num_heads
    scale = 1.0 / (dh ** 0.5)

    x = x_ref[...]
    xf = x.reshape(B * L, E)
    qkv = jnp.dot(xf, win_ref[...], preferred_element_type=jnp.float32) + bin_ref[...]
    qkv = qkv.reshape(B, L, 3 * E)
    q = qkv[:, :, 0:E]
    k = qkv[:, :, E:2 * E]
    v = qkv[:, :, 2 * E:3 * E]

    heads = []
    for h in range(num_heads):
        lo, hi = h * dh, (h + 1) * dh
        s = jnp.einsum('bld,bsd->bls', q[:, :, lo:hi], k[:, :, lo:hi],
                       preferred_element_type=jnp.float32) * scale
        p = _softmax(s)
        heads.append(jnp.einsum('bls,bsd->bld', p, v[:, :, lo:hi],
                                preferred_element_type=jnp.float32))
    a = jnp.concatenate(heads, axis=-1).reshape(B * L, E)
    a = jnp.dot(a, wo_ref[...], preferred_element_type=jnp.float32) + bo_ref[...]

    x1 = _ln(xf + a, g1_ref[...], be1_ref[...], eps)
    ff = jnp.maximum(
        jnp.dot(x1, w1_ref[...], preferred_element_type=jnp.float32) + bf1_ref[...], 0.0)
    ff = jnp.dot(ff, w2_ref[...], preferred_element_type=jnp.float32) + bf2_ref[...]
    o_ref[...] = _ln(x1 + ff, g2_ref[...], be2_ref[...], eps).reshape(B, L, E)


def transformer_layer(x, p, num_heads, eps=1e-5):
    # x: (B, L, E) batch-first
    B, L, E = x.shape
    FF = p["w1"].shape[1]
    nchunks = 2 if (B % 2 == 0) else 1          # lets v7x's 2 TensorCores split the batch
    Bc = B // nchunks
    xmap = lambda i: (i, 0, 0)
    return pl.pallas_call(
        functools.partial(_xformer_kernel, num_heads=num_heads, eps=eps),
        out_shape=jax.ShapeDtypeStruct((B, L, E), jnp.float32),
        grid=(nchunks,),
        in_specs=[pl.BlockSpec((Bc, L, E), xmap),
                  _spec((E, 3 * E)), _spec((1, 3 * E)),
                  _spec((E, E)), _spec((1, E)),
                  _spec((1, E)), _spec((1, E)),
                  _spec((E, FF)), _spec((1, FF)),
                  _spec((FF, E)), _spec((1, E)),
                  _spec((1, E)), _spec((1, E))],
        out_specs=pl.BlockSpec((Bc, L, E), xmap),
        compiler_params=pltpu.CompilerParams(dimension_semantics=("parallel",)),
    )(x, p["w_in"], p["b_in"], p["w_out"], p["b_out"], p["g1"], p["be1"],
      p["w1"], p["b1"], p["w2"], p["b2"], p["g2"], p["be2"])


# ----------------------------------------------------------------------------
# K3: fused SAMLayer + q + mu*kv + adaptive_avg_pool1d + F.normalize
# ----------------------------------------------------------------------------

def _sam_kernel(x_ref, win_ref, bin_ref, wo_ref, bo_ref, o_ref, *, num_heads, n, mu):
    B2, L, E = x_ref.shape            # B2 = 2*n ; first n rows = q stream, last n = kv stream
    dh = E // num_heads
    scale = 1.0 / (dh ** 0.5)

    x = x_ref[...]
    qkv = (jnp.dot(x.reshape(B2 * L, E), win_ref[...], preferred_element_type=jnp.float32)
           + bin_ref[...]).reshape(B2, L, 3 * E)
    Q = qkv[:, :, 0:E]
    K = qkv[:, :, E:2 * E]
    V = qkv[:, :, 2 * E:3 * E]
    Qq, Kq, Vq = Q[0:n], K[0:n], V[0:n]          # q stream
    Qk, Kk, Vk = Q[n:B2], K[n:B2], V[n:B2]       # kv stream

    def hsl(z, h):
        return z[:, :, h * dh:(h + 1) * dh]

    def avg_probs(Qs, Ks):
        # torch average_attn_weights=True: mean over heads of per-head softmax probs
        acc = jnp.zeros((n, L, L), jnp.float32)
        for h in range(num_heads):
            s = jnp.einsum('bld,bsd->bls', hsl(Qs, h), hsl(Ks, h),
                           preferred_element_type=jnp.float32) * scale
            acc = acc + _softmax(s)
        return acc * (1.0 / num_heads)

    kv_score = avg_probs(Qk, Kk)                 # (n, L, L)
    q_score = avg_probs(Qq, Kq)                  # (n, L, L)

    def masked_attn(Qs, Ks, Vs, score):
        # torch: attn_mask = score.repeat(num_heads,1,1); internal batch-head index
        # i = b*num_heads + h  ->  mask for (b, h) is score[(b*num_heads + h) % n]
        outs = []
        for h in range(num_heads):
            mask = jnp.stack([score[(b * num_heads + h) % n] for b in range(n)], axis=0)
            s = jnp.einsum('bld,bsd->bls', hsl(Qs, h), hsl(Ks, h),
                           preferred_element_type=jnp.float32) * scale + mask
            p = _softmax(s)
            outs.append(jnp.einsum('bls,bsd->bld', p, hsl(Vs, h),
                                   preferred_element_type=jnp.float32))
        return jnp.concatenate(outs, axis=-1)    # (n, L, E), pre out-proj

    Aq = masked_attn(Qq, Kk, Vk, kv_score)       # q  = attn(q, kv, kv, mask=kv_score)
    Ak = masked_attn(Qk, Kq, Vq, q_score)        # kv = attn(kv, q,  q,  mask=q_score)

    # out = (Aq@Wo+bo) + mu*(Ak@Wo+bo); mean over L commutes with the affine out-proj.
    pooled = jnp.mean(Aq, axis=1) + mu * jnp.mean(Ak, axis=1)            # (n, E)
    pooled = (jnp.dot(pooled, wo_ref[...], preferred_element_type=jnp.float32)
              + (1.0 + mu) * bo_ref[...])
    nrm2 = jnp.sum(pooled * pooled, axis=-1, keepdims=True)
    o_ref[...] = pooled * lax.rsqrt(jnp.maximum(nrm2, 1e-24))            # F.normalize eps=1e-12


def sam_pool_norm(x, sp, num_heads, n_batch, mu):
    # x: (2N, L, E) batch-first -> (N, E)
    B2, L, E = x.shape
    return pl.pallas_call(
        functools.partial(_sam_kernel, num_heads=num_heads, n=n_batch, mu=float(mu)),
        out_shape=jax.ShapeDtypeStruct((n_batch, E), jnp.float32),
        grid=(1,),
        in_specs=[_spec((B2, L, E)), _spec((E, 3 * E)), _spec((1, 3 * E)),
                  _spec((E, E)), _spec((1, E))],
        out_specs=_spec((n_batch, E)),
        compiler_params=pltpu.CompilerParams(dimension_semantics=("arbitrary",)),
    )(x, sp["w_in"], sp["b_in"], sp["w_out"], sp["b_out"])


# ----------------------------------------------------------------------------
# Full forward (plain JAX glue is just concat + one tiny input transpose)
# ----------------------------------------------------------------------------

def fp_sam_encoder(q, kv, p, *, num_heads, mu):
    # q, kv: (T, N, init_dim), seq-first (PyTorch batch_first=False)
    T, N, _ = q.shape
    E = p["T"]["w_out"].shape[0]
    x = jnp.concatenate([q, kv], axis=1)         # (T, 2N, DIN): shared LSTM / transformer
    x = jnp.transpose(x, (1, 0, 2))              # (2N, T, DIN) batch-first, once, tiny
    x = lstm(x, p["lstm"], hidden_size=E)        # (2N, T, E)
    x = transformer_layer(x, p["T"], num_heads)  # (2N, T, E)
    return sam_pool_norm(x, p["sam"], num_heads, N, mu)   # (N, E), L2-normalized rows


# ----------------------------------------------------------------------------
# One-time parameter preparation (pre-transpose, minimal padding)
# ----------------------------------------------------------------------------

def prepare_params(raw):
    lr = raw["lstm"]
    H = lr["w_hh"].shape[1]
    DIN = lr["w_ih"].shape[1]
    DIN_P = max(DIN, 8)

    # torch gate order i, f, g, o kept along the 4H columns; NO per-gate lane padding.
    w_ih = jnp.zeros((DIN_P, 4 * H), jnp.float32).at[:DIN, :].set(lr["w_ih"].T)
    w_hh = lr["w_hh"].T                                   # (H, 4H)
    b = (lr["b_ih"] + lr["b_hh"]).reshape(1, 4 * H)

    def attn_prep(a):
        return {"w_in": a["in_proj_w"].T,                 # (E, 3E) fused QKV
                "b_in": a["in_proj_b"].reshape(1, -1),
                "w_out": a["out_proj_w"].T,               # (E, E)
                "b_out": a["out_proj_b"].reshape(1, -1)}

    t = raw["T"]
    return {
        "lstm": {"w_ih": w_ih, "w_hh": w_hh, "b": b},
        "T": {**attn_prep(t["attn"]),
              "w1": t["linear1_w"].T, "b1": t["linear1_b"].reshape(1, -1),
              "w2": t["linear2_w"].T, "b2": t["linear2_b"].reshape(1, -1),
              "g1": t["norm1_g"].reshape(1, -1), "be1": t["norm1_b"].reshape(1, -1),
              "g2": t["norm2_g"].reshape(1, -1), "be2": t["norm2_b"].reshape(1, -1)},
        "sam": attn_prep(raw["sam_attn"]),
    }


# ----------------------------------------------------------------------------
# Deterministic parameter init (shapes from the module __init__)
# ----------------------------------------------------------------------------

def init_params(key, E, DIN, FF):
    def nrm(k, shape, scale=0.2):
        return scale * jax.random.normal(k, shape, jnp.float32)

    ks = jax.random.split(key, 16)
    return {
        "lstm": {
            "w_ih": nrm(ks[0], (4 * E, DIN)),
            "w_hh": nrm(ks[1], (4 * E, E)),
            "b_ih": nrm(ks[2], (4 * E,)),
            "b_hh": nrm(ks[3], (4 * E,)),
        },
        "T": {
            "attn": {
                "in_proj_w": nrm(ks[4], (3 * E, E)),
                "in_proj_b": nrm(ks[5], (3 * E,)),
                "out_proj_w": nrm(ks[6], (E, E)),
                "out_proj_b": nrm(ks[7], (E,)),
            },
            "linear1_w": nrm(ks[8], (FF, E)),
            "linear1_b": nrm(ks[9], (FF,)),
            "linear2_w": nrm(ks[10], (E, FF)),
            "linear2_b": nrm(ks[11], (E,)),
            "norm1_g": jnp.ones((E,), jnp.float32),
            "norm1_b": jnp.zeros((E,), jnp.float32),
            "norm2_g": jnp.ones((E,), jnp.float32),
            "norm2_b": jnp.zeros((E,), jnp.float32),
        },
        "sam_attn": {
            "in_proj_w": nrm(ks[12], (3 * E, E)),
            "in_proj_b": nrm(ks[13], (3 * E,)),
            "out_proj_w": nrm(ks[14], (E, E)),
            "out_proj_b": nrm(ks[15], (E,)),
        },
    }


if __name__ == "__main__":
    # small shapes: seq=8, batch=2, init_dim=2, embed=32, heads=4, ff_hidden=64, mu=0.5
    T_, N_, DIN_, E_, H_, FF_ = 8, 2, 2, 32, 4, 64
    MU = 0.5

    key = jax.random.PRNGKey(0)
    kq, kkv, kp = jax.random.split(key, 3)
    raw_params = init_params(kp, E_, DIN_, FF_)
    params = prepare_params(raw_params)
    q_in = jax.random.normal(kq, (T_, N_, DIN_), jnp.float32)
    kv_in = jax.random.normal(kkv, (T_, N_, DIN_), jnp.float32)

    forward = jax.jit(functools.partial(fp_sam_encoder, num_heads=H_, mu=MU))
    out = jax.block_until_ready(forward(q_in, kv_in, params))

    assert out.shape == (N_, E_), out.shape
    assert bool(jnp.all(jnp.isfinite(out)))
    norms = jnp.linalg.norm(out, axis=1)
    assert bool(jnp.all(jnp.abs(norms - 1.0) < 1e-3)), norms
    print("KERNEL_OK")
</pallas_src>

<mosaic_0001>
module attributes {stable_mosaic.version = 11 : i64} {
  func.func @_xformer_kernel(%arg0: i32, %arg1: memref<2x8x32xf32, #tpu.memory_space<vmem>>, %arg2: memref<32x96xf32, #tpu.memory_space<vmem>>, %arg3: memref<1x96xf32, #tpu.memory_space<vmem>>, %arg4: memref<32x32xf32, #tpu.memory_space<vmem>>, %arg5: memref<1x32xf32, #tpu.memory_space<vmem>>, %arg6: memref<1x32xf32, #tpu.memory_space<vmem>>, %arg7: memref<1x32xf32, #tpu.memory_space<vmem>>, %arg8: memref<32x64xf32, #tpu.memory_space<vmem>>, %arg9: memref<1x64xf32, #tpu.memory_space<vmem>>, %arg10: memref<64x32xf32, #tpu.memory_space<vmem>>, %arg11: memref<1x32xf32, #tpu.memory_space<vmem>>, %arg12: memref<1x32xf32, #tpu.memory_space<vmem>>, %arg13: memref<1x32xf32, #tpu.memory_space<vmem>>, %arg14: memref<2x8x32xf32, #tpu.memory_space<vmem>>) attributes {dimension_semantics = [#tpu.dimension_semantics<parallel>], iteration_bounds = array<i64: 2>, scalar_prefetch = 0 : i64, scratch_operands = 0 : i64, tpu.core_type = #tpu.core_type<tc>, window_params = [{transform_indices = @transform_0, window_bounds = array<i64: 2, 8, 32>}, {pipeline_mode = #tpu.pipeline_mode<synchronous>, transform_indices = @transform_1, window_bounds = array<i64: 32, 96>}, {pipeline_mode = #tpu.pipeline_mode<synchronous>, transform_indices = @transform_2, window_bounds = array<i64: 1, 96>}, {pipeline_mode = #tpu.pipeline_mode<synchronous>, transform_indices = @transform_3, window_bounds = array<i64: 32, 32>}, {pipeline_mode = #tpu.pipeline_mode<synchronous>, transform_indices = @transform_4, window_bounds = array<i64: 1, 32>}, {pipeline_mode = #tpu.pipeline_mode<synchronous>, transform_indices = @transform_5, window_bounds = array<i64: 1, 32>}, {pipeline_mode = #tpu.pipeline_mode<synchronous>, transform_indices = @transform_6, window_bounds = array<i64: 1, 32>}, {pipeline_mode = #tpu.pipeline_mode<synchronous>, transform_indices = @transform_7, window_bounds = array<i64: 32, 64>}, {pipeline_mode = #tpu.pipeline_mode<synchronous>, transform_indices = @transform_8, window_bounds = array<i64: 1, 64>}, {pipeline_mode = #tpu.pipeline_mode<synchronous>, transform_indices = @transform_9, window_bounds = array<i64: 64, 32>}, {pipeline_mode = #tpu.pipeline_mode<synchronous>, transform_indices = @transform_10, window_bounds = array<i64: 1, 32>}, {pipeline_mode = #tpu.pipeline_mode<synchronous>, transform_indices = @transform_11, window_bounds = array<i64: 1, 32>}, {pipeline_mode = #tpu.pipeline_mode<synchronous>, transform_indices = @transform_12, window_bounds = array<i64: 1, 32>}, {transform_indices = @transform_13, window_bounds = array<i64: 2, 8, 32>}]} {
    %c0 = arith.constant 0 : index
    %c0_0 = arith.constant 0 : index
    %c0_1 = arith.constant 0 : index
    %0 = vector.load %arg1[%c0, %c0_0, %c0_1] : memref<2x8x32xf32, #tpu.memory_space<vmem>>, vector<2x8x32xf32>
    %1 = vector.shape_cast %0 : vector<2x8x32xf32> to vector<16x32xf32>
    %c0_2 = arith.constant 0 : index
    %c0_3 = arith.constant 0 : index
    %2 = vector.load %arg2[%c0_2, %c0_3] : memref<32x96xf32, #tpu.memory_space<vmem>>, vector<32x96xf32>
    %cst = arith.constant dense<0.000000e+00> : vector<16x96xf32>
    %3 = tpu.matmul %1, %2, %cst {dimension_numbers = #tpu.dot_dimension_numbers<[1], [0], [0], [1], [0, 0, 1, 1], [], []>} : vector<16x32xf32>, vector<32x96xf32>, vector<16x96xf32> -> vector<16x96xf32>
    %c0_4 = arith.constant 0 : index
    %c0_5 = arith.constant 0 : index
    %4 = vector.load %arg3[%c0_4, %c0_5] : memref<1x96xf32, #tpu.memory_space<vmem>>, vector<1x96xf32>
    %5 = vector.broadcast %4 : vector<1x96xf32> to vector<16x96xf32>
    %6 = arith.addf %3, %5 : vector<16x96xf32>
    %7 = vector.shape_cast %6 : vector<16x96xf32> to vector<2x8x96xf32>
    %8 = vector.extract_strided_slice %7 {offsets = [0, 0, 0], sizes = [2, 8, 32], strides = [1, 1, 1]} : vector<2x8x96xf32> to vector<2x8x32xf32>
    %9 = vector.extract_strided_slice %7 {offsets = [0, 0, 32], sizes = [2, 8, 32], strides = [1, 1, 1]} : vector<2x8x96xf32> to vector<2x8x32xf32>
    %10 = vector.extract_strided_slice %7 {offsets = [0, 0, 64], sizes = [2, 8, 32], strides = [1, 1, 1]} : vector<2x8x96xf32> to vector<2x8x32xf32>
    %11 = vector.extract_strided_slice %8 {offsets = [0, 0, 0], sizes = [2, 8, 8], strides = [1, 1, 1]} : vector<2x8x32xf32> to vector<2x8x8xf32>
    %12 = vector.extract_strided_slice %9 {offsets = [0, 0, 0], sizes = [2, 8, 8], strides = [1, 1, 1]} : vector<2x8x32xf32> to vector<2x8x8xf32>
    "tpu.trace_start"() <{level = 10 : i32, message = "bld,bsd->bls"}> : () -> ()
    %cst_6 = arith.constant dense<0.000000e+00> : vector<2x8x8xf32>
    %13 = tpu.matmul %11, %12, %cst_6 {dimension_numbers = #tpu.dot_dimension_numbers<[2], [2], [1], [1], [0, 0, 0, 1, 1, 1], [0], [0]>} : vector<2x8x8xf32>, vector<2x8x8xf32>, vector<2x8x8xf32> -> vector<2x8x8xf32>
    "tpu.trace_stop"() : () -> ()
    %cst_7 = arith.constant 0.353553385 : f32
    %14 = vector.broadcast %cst_7 : f32 to vector<2x8x8xf32>
    %15 = arith.mulf %13, %14 : vector<2x8x8xf32>
    %cst_8 = arith.constant dense<0xFF800000> : vector<2x8xf32>
    %16 = vector.multi_reduction <maximumf>, %15, %cst_8 [2] : vector<2x8x8xf32> to vector<2x8xf32>
    %17 = vector.shape_cast %16 : vector<2x8xf32> to vector<2x8x1xf32>
    %18 = vector.broadcast %17 : vector<2x8x1xf32> to vector<2x8x8xf32>
    %19 = arith.subf %15, %18 : vector<2x8x8xf32>
    %20 = math.exp %19 : vector<2x8x8xf32>
    %cst_9 = arith.constant dense<0.000000e+00> : vector<2x8xf32>
    %21 = vector.multi_reduction <add>, %20, %cst_9 [2] : vector<2x8x8xf32> to vector<2x8xf32>
    %22 = vector.shape_cast %21 : vector<2x8xf32> to vector<2x8x1xf32>
    %23 = vector.broadcast %22 : vector<2x8x1xf32> to vector<2x8x8xf32>
    %24 = arith.divf %20, %23 : vector<2x8x8xf32>
    %25 = vector.extract_strided_slice %10 {offsets = [0, 0, 0], sizes = [2, 8, 8], strides = [1, 1, 1]} : vector<2x8x32xf32> to vector<2x8x8xf32>
    "tpu.trace_start"() <{level = 10 : i32, message = "bls,bsd->bld"}> : () -> ()
    %cst_10 = arith.constant dense<0.000000e+00> : vector<2x8x8xf32>
    %26 = tpu.matmul %24, %25, %cst_10 {dimension_numbers = #tpu.dot_dimension_numbers<[2], [1], [1], [2], [0, 0, 0, 1, 1, 2], [0], [0]>} : vector<2x8x8xf32>, vector<2x8x8xf32>, vector<2x8x8xf32> -> vector<2x8x8xf32>
    "tpu.trace_stop"() : () -> ()
    %27 = vector.extract_strided_slice %8 {offsets = [0, 0, 8], sizes = [2, 8, 8], strides = [1, 1, 1]} : vector<2x8x32xf32> to vector<2x8x8xf32>
    %28 = vector.extract_strided_slice %9 {offsets = [0, 0, 8], sizes = [2, 8, 8], strides = [1, 1, 1]} : vector<2x8x32xf32> to vector<2x8x8xf32>
    "tpu.trace_start"() <{level = 10 : i32, message = "bld,bsd->bls"}> : () -> ()
    %cst_11 = arith.constant dense<0.000000e+00> : vector<2x8x8xf32>
    %29 = tpu.matmul %27, %28, %cst_11 {dimension_numbers = #tpu.dot_dimension_numbers<[2], [2], [1], [1], [0, 0, 0, 1, 1, 1], [0], [0]>} : vector<2x8x8xf32>, vector<2x8x8xf32>, vector<2x8x8xf32> -> vector<2x8x8xf32>
    "tpu.trace_stop"() : () -> ()
    %cst_12 = arith.constant 0.353553385 : f32
    %30 = vector.broadcast %cst_12 : f32 to vector<2x8x8xf32>
    %31 = arith.mulf %29, %30 : vector<2x8x8xf32>
    %cst_13 = arith.constant dense<0xFF800000> : vector<2x8xf32>
    %32 = vector.multi_reduction <maximumf>, %31, %cst_13 [2] : vector<2x8x8xf32> to vector<2x8xf32>
    %33 = vector.shape_cast %32 : vector<2x8xf32> to vector<2x8x1xf32>
    %34 = vector.broadcast %33 : vector<2x8x1xf32> to vector<2x8x8xf32>
    %35 = arith.subf %31, %34 : vector<2x8x8xf32>
    %36 = math.exp %35 : vector<2x8x8xf32>
    %cst_14 = arith.constant dense<0.000000e+00> : vector<2x8xf32>
    %37 = vector.multi_reduction <add>, %36, %cst_14 [2] : vector<2x8x8xf32> to vector<2x8xf32>
    %38 = vector.shape_cast %37 : vector<2x8xf32> to vector<2x8x1xf32>
    %39 = vector.broadcast %38 : vector<2x8x1xf32> to vector<2x8x8xf32>
    %40 = arith.divf %36, %39 : vector<2x8x8xf32>
    %41 = vector.extract_strided_slice %10 {offsets = [0, 0, 8], sizes = [2, 8, 8], strides = [1, 1, 1]} : vector<2x8x32xf32> to vector<2x8x8xf32>
    "tpu.trace_start"() <{level = 10 : i32, message = "bls,bsd->bld"}> : () -> ()
    %cst_15 = arith.constant dense<0.000000e+00> : vector<2x8x8xf32>
    %42 = tpu.matmul %40, %41, %cst_15 {dimension_numbers = #tpu.dot_dimension_numbers<[2], [1], [1], [2], [0, 0, 0, 1, 1, 2], [0], [0]>} : vector<2x8x8xf32>, vector<2x8x8xf32>, vector<2x8x8xf32> -> vector<2x8x8xf32>
    "tpu.trace_stop"() : () -> ()
    %43 = vector.extract_strided_slice %8 {offsets = [0, 0, 16], sizes = [2, 8, 8], strides = [1, 1, 1]} : vector<2x8x32xf32> to vector<2x8x8xf32>
    %44 = vector.extract_strided_slice %9 {offsets = [0, 0, 16], sizes = [2, 8, 8], strides = [1, 1, 1]} : vector<2x8x32xf32> to vector<2x8x8xf32>
    "tpu.trace_start"() <{level = 10 : i32, message = "bld,bsd->bls"}> : () -> ()
    %cst_16 = arith.constant dense<0.000000e+00> : vector<2x8x8xf32>
    %45 = tpu.matmul %43, %44, %cst_16 {dimension_numbers = #tpu.dot_dimension_numbers<[2], [2], [1], [1], [0, 0, 0, 1, 1, 1], [0], [0]>} : vector<2x8x8xf32>, vector<2x8x8xf32>, vector<2x8x8xf32> -> vector<2x8x8xf32>
    "tpu.trace_stop"() : () -> ()
    %cst_17 = arith.constant 0.353553385 : f32
    %46 = vector.broadcast %cst_17 : f32 to vector<2x8x8xf32>
    %47 = arith.mulf %45, %46 : vector<2x8x8xf32>
    %cst_18 = arith.constant dense<0xFF800000> : vector<2x8xf32>
    %48 = vector.multi_reduction <maximumf>, %47, %cst_18 [2] : vector<2x8x8xf32> to vector<2x8xf32>
    %49 = vector.shape_cast %48 : vector<2x8xf32> to vector<2x8x1xf32>
    %50 = vector.broadcast %49 : vector<2x8x1xf32> to vector<2x8x8xf32>
    %51 = arith.subf %47, %50 : vector<2x8x8xf32>
    %52 = math.exp %51 : vector<2x8x8xf32>
    %cst_19 = arith.constant dense<0.000000e+00> : vector<2x8xf32>
    %53 = vector.multi_reduction <add>, %52, %cst_19 [2] : vector<2x8x8xf32> to vector<2x8xf32>
    %54 = vector.shape_cast %53 : vector<2x8xf32> to vector<2x8x1xf32>
    %55 = vector.broadcast %54 : vector<2x8x1xf32> to vector<2x8x8xf32>
    %56 = arith.divf %52, %55 : vector<2x8x8xf32>
    %57 = vector.extract_strided_slice %10 {offsets = [0, 0, 16], sizes = [2, 8, 8], strides = [1, 1, 1]} : vector<2x8x32xf32> to vector<2x8x8xf32>
    "tpu.trace_start"() <{level = 10 : i32, message = "bls,bsd->bld"}> : () -> ()
    %cst_20 = arith.constant dense<0.000000e+00> : vector<2x8x8xf32>
    %58 = tpu.matmul %56, %57, %cst_20 {dimension_numbers = #tpu.dot_dimension_numbers<[2], [1], [1], [2], [0, 0, 0, 1, 1, 2], [0], [0]>} : vector<2x8x8xf32>, vector<2x8x8xf32>, vector<2x8x8xf32> -> vector<2x8x8xf32>
    "tpu.trace_stop"() : () -> ()
    %59 = vector.extract_strided_slice %8 {offsets = [0, 0, 24], sizes = [2, 8, 8], strides = [1, 1, 1]} : vector<2x8x32xf32> to vector<2x8x8xf32>
    %60 = vector.extract_strided_slice %9 {offsets = [0, 0, 24], sizes = [2, 8, 8], strides = [1, 1, 1]} : vector<2x8x32xf32> to vector<2x8x8xf32>
    "tpu.trace_start"() <{level = 10 : i32, message = "bld,bsd->bls"}> : () -> ()
    %cst_21 = arith.constant dense<0.000000e+00> : vector<2x8x8xf32>
    %61 = tpu.matmul %59, %60, %cst_21 {dimension_numbers = #tpu.dot_dimension_numbers<[2], [2], [1], [1], [0, 0, 0, 1, 1, 1], [0], [0]>} : vector<2x8x8xf32>, vector<2x8x8xf32>, vector<2x8x8xf32> -> vector<2x8x8xf32>
    "tpu.trace_stop"() : () -> ()
    %cst_22 = arith.constant 0.353553385 : f32
    %62 = vector.broadcast %cst_22 : f32 to vector<2x8x8xf32>
    %63 = arith.mulf %61, %62 : vector<2x8x8xf32>
    %cst_23 = arith.constant dense<0xFF800000> : vector<2x8xf32>
    %64 = vector.multi_reduction <maximumf>, %63, %cst_23 [2] : vector<2x8x8xf32> to vector<2x8xf32>
    %65 = vector.shape_cast %64 : vector<2x8xf32> to vector<2x8x1xf32>
    %66 = vector.broadcast %65 : vector<2x8x1xf32> to vector<2x8x8xf32>
    %67 = arith.subf %63, %66 : vector<2x8x8xf32>
    %68 = math.exp %67 : vector<2x8x8xf32>
    %cst_24 = arith.constant dense<0.000000e+00> : vector<2x8xf32>
    %69 = vector.multi_reduction <add>, %68, %cst_24 [2] : vector<2x8x8xf32> to vector<2x8xf32>
    %70 = vector.shape_cast %69 : vector<2x8xf32> to vector<2x8x1xf32>
    %71 = vector.broadcast %70 : vector<2x8x1xf32> to vector<2x8x8xf32>
    %72 = arith.divf %68, %71 : vector<2x8x8xf32>
    %73 = vector.extract_strided_slice %10 {offsets = [0, 0, 24], sizes = [2, 8, 8], strides = [1, 1, 1]} : vector<2x8x32xf32> to vector<2x8x8xf32>
    "tpu.trace_start"() <{level = 10 : i32, message = "bls,bsd->bld"}> : () -> ()
    %cst_25 = arith.constant dense<0.000000e+00> : vector<2x8x8xf32>
    %74 = tpu.matmul %72, %73, %cst_25 {dimension_numbers = #tpu.dot_dimension_numbers<[2], [1], [1], [2], [0, 0, 0, 1, 1, 2], [0], [0]>} : vector<2x8x8xf32>, vector<2x8x8xf32>, vector<2x8x8xf32> -> vector<2x8x8xf32>
    "tpu.trace_stop"() : () -> ()
    %75 = tpu.concatenate %26, %42, %58, %74 in 2 : vector<2x8x8xf32>, vector<2x8x8xf32>, vector<2x8x8xf32>, vector<2x8x8xf32> -> vector<2x8x32xf32>
    %76 = vector.shape_cast %75 : vector<2x8x32xf32> to vector<16x32xf32>
    %c0_26 = arith.constant 0 : index
    %c0_27 = arith.constant 0 : index
    %77 = vector.load %arg4[%c0_26, %c0_27] : memref<32x32xf32, #tpu.memory_space<vmem>>, vector<32x32xf32>
    %cst_28 = arith.constant dense<0.000000e+00> : vector<16x32xf32>
    %78 = tpu.matmul %76, %77, %cst_28 {dimension_numbers = #tpu.dot_dimension_numbers<[1], [0], [0], [1], [0, 0, 1, 1], [], []>} : vector<16x32xf32>, vector<32x32xf32>, vector<16x32xf32> -> vector<16x32xf32>
    %c0_29 = arith.constant 0 : index
    %c0_30 = arith.constant 0 : index
    %79 = vector.load %arg5[%c0_29, %c0_30] : memref<1x32xf32, #tpu.memory_space<vmem>>, vector<1x32xf32>
    %80 = vector.broadcast %79 : vector<1x32xf32> to vector<16x32xf32>
    %81 = arith.addf %78, %80 : vector<16x32xf32>
    %82 = arith.addf %1, %81 : vector<16x32xf32>
    %c0_31 = arith.constant 0 : index
    %c0_32 = arith.constant 0 : index
    %83 = vector.load %arg6[%c0_31, %c0_32] : memref<1x32xf32, #tpu.memory_space<vmem>>, vector<1x32xf32>
    %c0_33 = arith.constant 0 : index
    %c0_34 = arith.constant 0 : index
    %84 = vector.load %arg7[%c0_33, %c0_34] : memref<1x32xf32, #tpu.memory_space<vmem>>, vector<1x32xf32>
    %cst_35 = arith.constant dense<0.000000e+00> : vector<16xf32>
    %85 = vector.multi_reduction <add>, %82, %cst_35 [1] : vector<16x32xf32> to vector<16xf32>
    %86 = vector.shape_cast %85 : vector<16xf32> to vector<16x1xf32>
    %cst_36 = arith.constant 3.200000e+01 : f32
    %87 = vector.broadcast %cst_36 : f32 to vector<16x1xf32>
    %88 = arith.divf %86, %87 : vector<16x1xf32>
    %89 = vector.broadcast %88 : vector<16x1xf32> to vector<16x32xf32>
    %90 = arith.subf %82, %89 : vector<16x32xf32>
    %91 = arith.mulf %90, %90 : vector<16x32xf32>
    %cst_37 = arith.constant dense<0.000000e+00> : vector<16xf32>
    %92 = vector.multi_reduction <add>, %91, %cst_37 [1] : vector<16x32xf32> to vector<16xf32>
    %93 = vector.shape_cast %92 : vector<16xf32> to vector<16x1xf32>
    %cst_38 = arith.constant 3.200000e+01 : f32
    %94 = vector.broadcast %cst_38 : f32 to vector<16x1xf32>
    %95 = arith.divf %93, %94 : vector<16x1xf32>
    %cst_39 = arith.constant 9.99999974E-6 : f32
    %96 = vector.broadcast %cst_39 : f32 to vector<16x1xf32>
    %97 = arith.addf %95, %96 : vector<16x1xf32>
    %98 = math.rsqrt %97 : vector<16x1xf32>
    %99 = vector.broadcast %98 : vector<16x1xf32> to vector<16x32xf32>
    %100 = arith.mulf %90, %99 : vector<16x32xf32>
    %101 = vector.broadcast %83 : vector<1x32xf32> to vector<16x32xf32>
    %102 = arith.mulf %100, %101 : vector<16x32xf32>
    %103 = vector.broadcast %84 : vector<1x32xf32> to vector<16x32xf32>
    %104 = arith.addf %102, %103 : vector<16x32xf32>
    %c0_40 = arith.constant 0 : index
    %c0_41 = arith.constant 0 : index
    %105 = vector.load %arg8[%c0_40, %c0_41] : memref<32x64xf32, #tpu.memory_space<vmem>>, vector<32x64xf32>
    %cst_42 = arith.constant dense<0.000000e+00> : vector<16x64xf32>
    %106 = tpu.matmul %104, %105, %cst_42 {dimension_numbers = #tpu.dot_dimension_numbers<[1], [0], [0], [1], [0, 0, 1, 1], [], []>} : vector<16x32xf32>, vector<32x64xf32>, vector<16x64xf32> -> vector<16x64xf32>
    %c0_43 = arith.constant 0 : index
    %c0_44 = arith.constant 0 : index
    %107 = vector.load %arg9[%c0_43, %c0_44] : memref<1x64xf32, #tpu.memory_space<vmem>>, vector<1x64xf32>
    %108 = vector.broadcast %107 : vector<1x64xf32> to vector<16x64xf32>
    %109 = arith.addf %106, %108 : vector<16x64xf32>
    %cst_45 = arith.constant 0.000000e+00 : f32
    %110 = vector.broadcast %cst_45 : f32 to vector<16x64xf32>
    %111 = arith.maximumf %109, %110 : vector<16x64xf32>
    %c0_46 = arith.constant 0 : index
    %c0_47 = arith.constant 0 : index
    %112 = vector.load %arg10[%c0_46, %c0_47] : memref<64x32xf32, #tpu.memory_space<vmem>>, vector<64x32xf32>
    %cst_48 = arith.constant dense<0.000000e+00> : vector<16x32xf32>
    %113 = tpu.matmul %111, %112, %cst_48 {dimension_numbers = #tpu.dot_dimension_numbers<[1], [0], [0], [1], [0, 0, 1, 1], [], []>} : vector<16x64xf32>, vector<64x32xf32>, vector<16x32xf32> -> vector<16x32xf32>
    %c0_49 = arith.constant 0 : index
    %c0_50 = arith.constant 0 : index
    %114 = vector.load %arg11[%c0_49, %c0_50] : memref<1x32xf32, #tpu.memory_space<vmem>>, vector<1x32xf32>
    %115 = vector.broadcast %114 : vector<1x32xf32> to vector<16x32xf32>
    %116 = arith.addf %113, %115 : vector<16x32xf32>
    %117 = arith.addf %104, %116 : vector<16x32xf32>
    %c0_51 = arith.constant 0 : index
    %c0_52 = arith.constant 0 : index
    %118 = vector.load %arg12[%c0_51, %c0_52] : memref<1x32xf32, #tpu.memory_space<vmem>>, vector<1x32xf32>
    %c0_53 = arith.constant 0 : index
    %c0_54 = arith.constant 0 : index
    %119 = vector.load %arg13[%c0_53, %c0_54] : memref<1x32xf32, #tpu.memory_space<vmem>>, vector<1x32xf32>
    %cst_55 = arith.constant dense<0.000000e+00> : vector<16xf32>
    %120 = vector.multi_reduction <add>, %117, %cst_55 [1] : vector<16x32xf32> to vector<16xf32>
    %121 = vector.shape_cast %120 : vector<16xf32> to vector<16x1xf32>
    %cst_56 = arith.constant 3.200000e+01 : f32
    %122 = vector.broadcast %cst_56 : f32 to vector<16x1xf32>
    %123 = arith.divf %121, %122 : vector<16x1xf32>
    %124 = vector.broadcast %123 : vector<16x1xf32> to vector<16x32xf32>
    %125 = arith.subf %117, %124 : vector<16x32xf32>
    %126 = arith.mulf %125, %125 : vector<16x32xf32>
    %cst_57 = arith.constant dense<0.000000e+00> : vector<16xf32>
    %127 = vector.multi_reduction <add>, %126, %cst_57 [1] : vector<16x32xf32> to vector<16xf32>
    %128 = vector.shape_cast %127 : vector<16xf32> to vector<16x1xf32>
    %cst_58 = arith.constant 3.200000e+01 : f32
    %129 = vector.broadcast %cst_58 : f32 to vector<16x1xf32>
    %130 = arith.divf %128, %129 : vector<16x1xf32>
    %cst_59 = arith.constant 9.99999974E-6 : f32
    %131 = vector.broadcast %cst_59 : f32 to vector<16x1xf32>
    %132 = arith.addf %130, %131 : vector<16x1xf32>
    %133 = math.rsqrt %132 : vector<16x1xf32>
    %134 = vector.broadcast %133 : vector<16x1xf32> to vector<16x32xf32>
    %135 = arith.mulf %125, %134 : vector<16x32xf32>
    %136 = vector.broadcast %118 : vector<1x32xf32> to vector<16x32xf32>
    %137 = arith.mulf %135, %136 : vector<16x32xf32>
    %138 = vector.broadcast %119 : vector<1x32xf32> to vector<16x32xf32>
    %139 = arith.addf %137, %138 : vector<16x32xf32>
    %140 = vector.shape_cast %139 : vector<16x32xf32> to vector<2x8x32xf32>
    %c0_60 = arith.constant 0 : index
    %c0_61 = arith.constant 0 : index
    %c0_62 = arith.constant 0 : index
    %141 = vector.load %arg14[%c0_60, %c0_61, %c0_62] : memref<2x8x32xf32, #tpu.memory_space<vmem>>, vector<2x8x32xf32>
    tpu.vector_store %arg14[%c0_60, %c0_61, %c0_62], %140 {strides = array<i32>} : memref<2x8x32xf32, #tpu.memory_space<vmem>>, vector<2x8x32xf32>,
    return
  }
  func.func @transform_0(%arg0: i32) -> (i32, i32, i32) {
    %c0_i32 = arith.constant 0 : i32
    %c0_i32_0 = arith.constant 0 : i32
    %c0_i32_1 = arith.constant 0 : i32
    return %arg0, %c0_i32, %c0_i32_0 : i32, i32, i32
  }
  func.func @transform_1(%arg0: i32) -> (i32, i32) {
    %c0_i32 = arith.constant 0 : i32
    %c0_i32_0 = arith.constant 0 : i32
    %c0_i32_1 = arith.constant 0 : i32
    return %c0_i32, %c0_i32_0 : i32, i32
  }
  func.func @transform_2(%arg0: i32) -> (i32, i32) {
    %c0_i32 = arith.constant 0 : i32
    %c0_i32_0 = arith.constant 0 : i32
    %c0_i32_1 = arith.constant 0 : i32
    return %c0_i32, %c0_i32_0 : i32, i32
  }
  func.func @transform_3(%arg0: i32) -> (i32, i32) {
    %c0_i32 = arith.constant 0 : i32
    %c0_i32_0 = arith.constant 0 : i32
    %c0_i32_1 = arith.constant 0 : i32
    return %c0_i32, %c0_i32_0 : i32, i32
  }
  func.func @transform_4(%arg0: i32) -> (i32, i32) {
    %c0_i32 = arith.constant 0 : i32
    %c0_i32_0 = arith.constant 0 : i32
    %c0_i32_1 = arith.constant 0 : i32
    return %c0_i32, %c0_i32_0 : i32, i32
  }
  func.func @transform_5(%arg0: i32) -> (i32, i32) {
    %c0_i32 = arith.constant 0 : i32
    %c0_i32_0 = arith.constant 0 : i32
    %c0_i32_1 = arith.constant 0 : i32
    return %c0_i32, %c0_i32_0 : i32, i32
  }
  func.func @transform_6(%arg0: i32) -> (i32, i32) {
    %c0_i32 = arith.constant 0 : i32
    %c0_i32_0 = arith.constant 0 : i32
    %c0_i32_1 = arith.constant 0 : i32
    return %c0_i32, %c0_i32_0 : i32, i32
  }
  func.func @transform_7(%arg0: i32) -> (i32, i32) {
    %c0_i32 = arith.constant 0 : i32
    %c0_i32_0 = arith.constant 0 : i32
    %c0_i32_1 = arith.constant 0 : i32
    return %c0_i32, %c0_i32_0 : i32, i32
  }
  func.func @transform_8(%arg0: i32) -> (i32, i32) {
    %c0_i32 = arith.constant 0 : i32
    %c0_i32_0 = arith.constant 0 : i32
    %c0_i32_1 = arith.constant 0 : i32
    return %c0_i32, %c0_i32_0 : i32, i32
  }
  func.func @transform_9(%arg0: i32) -> (i32, i32) {
    %c0_i32 = arith.constant 0 : i32
    %c0_i32_0 = arith.constant 0 : i32
    %c0_i32_1 = arith.constant 0 : i32
    return %c0_i32, %c0_i32_0 : i32, i32
  }
  func.func @transform_10(%arg0: i32) -> (i32, i32) {
    %c0_i32 = arith.constant 0 : i32
    %c0_i32_0 = arith.constant 0 : i32
    %c0_i32_1 = arith.constant 0 : i32
    return %c0_i32, %c0_i32_0 : i32, i32
  }
  func.func @transform_11(%arg0: i32) -> (i32, i32) {
    %c0_i32 = arith.constant 0 : i32
    %c0_i32_0 = arith.constant 0 : i32
    %c0_i32_1 = arith.constant 0 : i32
    return %c0_i32, %c0_i32_0 : i32, i32
  }
  func.func @transform_12(%arg0: i32) -> (i32, i32) {
    %c0_i32 = arith.constant 0 : i32
    %c0_i32_0 = arith.constant 0 : i32
    %c0_i32_1 = arith.constant 0 : i32
    return %c0_i32, %c0_i32_0 : i32, i32
  }
  func.func @transform_13(%arg0: i32) -> (i32, i32, i32) {
    %c0_i32 = arith.constant 0 : i32
    %c0_i32_0 = arith.constant 0 : i32
    %c0_i32_1 = arith.constant 0 : i32
    return %arg0, %c0_i32, %c0_i32_0 : i32, i32, i32
  }
}

module attributes {stable_mosaic.version = 11 : i64} {
  func.func @_sam_kernel(%arg0: i32, %arg1: memref<4x8x32xf32, #tpu.memory_space<vmem>>, %arg2: memref<32x96xf32, #tpu.memory_space<vmem>>, %arg3: memref<1x96xf32, #tpu.memory_space<vmem>>, %arg4: memref<32x32xf32, #tpu.memory_space<vmem>>, %arg5: memref<1x32xf32, #tpu.memory_space<vmem>>, %arg6: memref<2x32xf32, #tpu.memory_space<vmem>>) attributes {dimension_semantics = [#tpu.dimension_semantics<arbitrary>], iteration_bounds = array<i64: 1>, scalar_prefetch = 0 : i64, scratch_operands = 0 : i64, tpu.core_type = #tpu.core_type<tc>, window_params = [{pipeline_mode = #tpu.pipeline_mode<synchronous>, transform_indices = @transform_0, window_bounds = array<i64: 4, 8, 32>}, {pipeline_mode = #tpu.pipeline_mode<synchronous>, transform_indices = @transform_1, window_bounds = array<i64: 32, 96>}, {pipeline_mode = #tpu.pipeline_mode<synchronous>, transform_indices = @transform_2, window_bounds = array<i64: 1, 96>}, {pipeline_mode = #tpu.pipeline_mode<synchronous>, transform_indices = @transform_3, window_bounds = array<i64: 32, 32>}, {pipeline_mode = #tpu.pipeline_mode<synchronous>, transform_indices = @transform_4, window_bounds = array<i64: 1, 32>}, {pipeline_mode = #tpu.pipeline_mode<synchronous>, transform_indices = @transform_5, window_bounds = array<i64: 2, 32>}]} {
    %c0 = arith.constant 0 : index
    %c0_0 = arith.constant 0 : index
    %c0_1 = arith.constant 0 : index
    %0 = vector.load %arg1[%c0, %c0_0, %c0_1] : memref<4x8x32xf32, #tpu.memory_space<vmem>>, vector<4x8x32xf32>
    %1 = vector.shape_cast %0 : vector<4x8x32xf32> to vector<32x32xf32>
    %c0_2 = arith.constant 0 : index
    %c0_3 = arith.constant 0 : index
    %2 = vector.load %arg2[%c0_2, %c0_3] : memref<32x96xf32, #tpu.memory_space<vmem>>, vector<32x96xf32>
    %cst = arith.constant dense<0.000000e+00> : vector<32x96xf32>
    %3 = tpu.matmul %1, %2, %cst {dimension_numbers = #tpu.dot_dimension_numbers<[1], [0], [0], [1], [0, 0, 1, 1], [], []>} : vector<32x32xf32>, vector<32x96xf32>, vector<32x96xf32> -> vector<32x96xf32>
    %c0_4 = arith.constant 0 : index
    %c0_5 = arith.constant 0 : index
    %4 = vector.load %arg3[%c0_4, %c0_5] : memref<1x96xf32, #tpu.memory_space<vmem>>, vector<1x96xf32>
    %5 = vector.broadcast %4 : vector<1x96xf32> to vector<32x96xf32>
    %6 = arith.addf %3, %5 : vector<32x96xf32>
    %7 = vector.shape_cast %6 : vector<32x96xf32> to vector<4x8x96xf32>
    %8 = vector.extract_strided_slice %7 {offsets = [0, 0, 0], sizes = [4, 8, 32], strides = [1, 1, 1]} : vector<4x8x96xf32> to vector<4x8x32xf32>
    %9 = vector.extract_strided_slice %7 {offsets = [0, 0, 32], sizes = [4, 8, 32], strides = [1, 1, 1]} : vector<4x8x96xf32> to vector<4x8x32xf32>
    %10 = vector.extract_strided_slice %7 {offsets = [0, 0, 64], sizes = [4, 8, 32], strides = [1, 1, 1]} : vector<4x8x96xf32> to vector<4x8x32xf32>
    %11 = vector.extract_strided_slice %8 {offsets = [0, 0, 0], sizes = [2, 8, 32], strides = [1, 1, 1]} : vector<4x8x32xf32> to vector<2x8x32xf32>
    %12 = vector.extract_strided_slice %9 {offsets = [0, 0, 0], sizes = [2, 8, 32], strides = [1, 1, 1]} : vector<4x8x32xf32> to vector<2x8x32xf32>
    %13 = vector.extract_strided_slice %10 {offsets = [0, 0, 0], sizes = [2, 8, 32], strides = [1, 1, 1]} : vector<4x8x32xf32> to vector<2x8x32xf32>
    %14 = vector.extract_strided_slice %8 {offsets = [2, 0, 0], sizes = [2, 8, 32], strides = [1, 1, 1]} : vector<4x8x32xf32> to vector<2x8x32xf32>
    %15 = vector.extract_strided_slice %9 {offsets = [2, 0, 0], sizes = [2, 8, 32], strides = [1, 1, 1]} : vector<4x8x32xf32> to vector<2x8x32xf32>
    %16 = vector.extract_strided_slice %10 {offsets = [2, 0, 0], sizes = [2, 8, 32], strides = [1, 1, 1]} : vector<4x8x32xf32> to vector<2x8x32xf32>
    %cst_6 = arith.constant 0.000000e+00 : f32
    %17 = vector.broadcast %cst_6 : f32 to vector<2x8x8xf32>
    %18 = vector.extract_strided_slice %14 {offsets = [0, 0, 0], sizes = [2, 8, 8], strides = [1, 1, 1]} : vector<2x8x32xf32> to vector<2x8x8xf32>
    %19 = vector.extract_strided_slice %15 {offsets = [0, 0, 0], sizes = [2, 8, 8], strides = [1, 1, 1]} : vector<2x8x32xf32> to vector<2x8x8xf32>
    "tpu.trace_start"() <{level = 10 : i32, message = "bld,bsd->bls"}> : () -> ()
    %cst_7 = arith.constant dense<0.000000e+00> : vector<2x8x8xf32>
    %20 = tpu.matmul %18, %19, %cst_7 {dimension_numbers = #tpu.dot_dimension_numbers<[2], [2], [1], [1], [0, 0, 0, 1, 1, 1], [0], [0]>} : vector<2x8x8xf32>, vector<2x8x8xf32>, vector<2x8x8xf32> -> vector<2x8x8xf32>
    "tpu.trace_stop"() : () -> ()
    %cst_8 = arith.constant 0.353553385 : f32
    %21 = vector.broadcast %cst_8 : f32 to vector<2x8x8xf32>
    %22 = arith.mulf %20, %21 : vector<2x8x8xf32>
    %cst_9 = arith.constant dense<0xFF800000> : vector<2x8xf32>
    %23 = vector.multi_reduction <maximumf>, %22, %cst_9 [2] : vector<2x8x8xf32> to vector<2x8xf32>
    %24 = vector.shape_cast %23 : vector<2x8xf32> to vector<2x8x1xf32>
    %25 = vector.broadcast %24 : vector<2x8x1xf32> to vector<2x8x8xf32>
    %26 = arith.subf %22, %25 : vector<2x8x8xf32>
    %27 = math.exp %26 : vector<2x8x8xf32>
    %cst_10 = arith.constant dense<0.000000e+00> : vector<2x8xf32>
    %28 = vector.multi_reduction <add>, %27, %cst_10 [2] : vector<2x8x8xf32> to vector<2x8xf32>
    %29 = vector.shape_cast %28 : vector<2x8xf32> to vector<2x8x1xf32>
    %30 = vector.broadcast %29 : vector<2x8x1xf32> to vector<2x8x8xf32>
    %31 = arith.divf %27, %30 : vector<2x8x8xf32>
    %32 = arith.addf %17, %31 : vector<2x8x8xf32>
    %33 = vector.extract_strided_slice %14 {offsets = [0, 0, 8], sizes = [2, 8, 8], strides = [1, 1, 1]} : vector<2x8x32xf32> to vector<2x8x8xf32>
    %34 = vector.extract_strided_slice %15 {offsets = [0, 0, 8], sizes = [2, 8, 8], strides = [1, 1, 1]} : vector<2x8x32xf32> to vector<2x8x8xf32>
    "tpu.trace_start"() <{level = 10 : i32, message = "bld,bsd->bls"}> : () -> ()
    %cst_11 = arith.constant dense<0.000000e+00> : vector<2x8x8xf32>
    %35 = tpu.matmul %33, %34, %cst_11 {dimension_numbers = #tpu.dot_dimension_numbers<[2], [2], [1], [1], [0, 0, 0, 1, 1, 1], [0], [0]>} : vector<2x8x8xf32>, vector<2x8x8xf32>, vector<2x8x8xf32> -> vector<2x8x8xf32>
    "tpu.trace_stop"() : () -> ()
    %cst_12 = arith.constant 0.353553385 : f32
    %36 = vector.broadcast %cst_12 : f32 to vector<2x8x8xf32>
    %37 = arith.mulf %35, %36 : vector<2x8x8xf32>
    %cst_13 = arith.constant dense<0xFF800000> : vector<2x8xf32>
    %38 = vector.multi_reduction <maximumf>, %37, %cst_13 [2] : vector<2x8x8xf32> to vector<2x8xf32>
    %39 = vector.shape_cast %38 : vector<2x8xf32> to vector<2x8x1xf32>
    %40 = vector.broadcast %39 : vector<2x8x1xf32> to vector<2x8x8xf32>
    %41 = arith.subf %37, %40 : vector<2x8x8xf32>
    %42 = math.exp %41 : vector<2x8x8xf32>
    %cst_14 = arith.constant dense<0.000000e+00> : vector<2x8xf32>
    %43 = vector.multi_reduction <add>, %42, %cst_14 [2] : vector<2x8x8xf32> to vector<2x8xf32>
    %44 = vector.shape_cast %43 : vector<2x8xf32> to vector<2x8x1xf32>
    %45 = vector.broadcast %44 : vector<2x8x1xf32> to vector<2x8x8xf32>
    %46 = arith.divf %42, %45 : vector<2x8x8xf32>
    %47 = arith.addf %32, %46 : vector<2x8x8xf32>
    %48 = vector.extract_strided_slice %14 {offsets = [0, 0, 16], sizes = [2, 8, 8], strides = [1, 1, 1]} : vector<2x8x32xf32> to vector<2x8x8xf32>
    %49 = vector.extract_strided_slice %15 {offsets = [0, 0, 16], sizes = [2, 8, 8], strides = [1, 1, 1]} : vector<2x8x32xf32> to vector<2x8x8xf32>
    "tpu.trace_start"() <{level = 10 : i32, message = "bld,bsd->bls"}> : () -> ()
    %cst_15 = arith.constant dense<0.000000e+00> : vector<2x8x8xf32>
    %50 = tpu.matmul %48, %49, %cst_15 {dimension_numbers = #tpu.dot_dimension_numbers<[2], [2], [1], [1], [0, 0, 0, 1, 1, 1], [0], [0]>} : vector<2x8x8xf32>, vector<2x8x8xf32>, vector<2x8x8xf32> -> vector<2x8x8xf32>
    "tpu.trace_stop"() : () -> ()
    %cst_16 = arith.constant 0.353553385 : f32
    %51 = vector.broadcast %cst_16 : f32 to vector<2x8x8xf32>
    %52 = arith.mulf %50, %51 : vector<2x8x8xf32>
    %cst_17 = arith.constant dense<0xFF800000> : vector<2x8xf32>
    %53 = vector.multi_reduction <maximumf>, %52, %cst_17 [2] : vector<2x8x8xf32> to vector<2x8xf32>
    %54 = vector.shape_cast %53 : vector<2x8xf32> to vector<2x8x1xf32>
    %55 = vector.broadcast %54 : vector<2x8x1xf32> to vector<2x8x8xf32>
    %56 = arith.subf %52, %55 : vector<2x8x8xf32>
    %57 = math.exp %56 : vector<2x8x8xf32>
    %cst_18 = arith.constant dense<0.000000e+00> : vector<2x8xf32>
    %58 = vector.multi_reduction <add>, %57, %cst_18 [2] : vector<2x8x8xf32> to vector<2x8xf32>
    %59 = vector.shape_cast %58 : vector<2x8xf32> to vector<2x8x1xf32>
    %60 = vector.broadcast %59 : vector<2x8x1xf32> to vector<2x8x8xf32>
    %61 = arith.divf %57, %60 : vector<2x8x8xf32>
    %62 = arith.addf %47, %61 : vector<2x8x8xf32>
    %63 = vector.extract_strided_slice %14 {offsets = [0, 0, 24], sizes = [2, 8, 8], strides = [1, 1, 1]} : vector<2x8x32xf32> to vector<2x8x8xf32>
    %64 = vector.extract_strided_slice %15 {offsets = [0, 0, 24], sizes = [2, 8, 8], strides = [1, 1, 1]} : vector<2x8x32xf32> to vector<2x8x8xf32>
    "tpu.trace_start"() <{level = 10 : i32, message = "bld,bsd->bls"}> : () -> ()
    %cst_19 = arith.constant dense<0.000000e+00> : vector<2x8x8xf32>
    %65 = tpu.matmul %63, %64, %cst_19 {dimension_numbers = #tpu.dot_dimension_numbers<[2], [2], [1], [1], [0, 0, 0, 1, 1, 1], [0], [0]>} : vector<2x8x8xf32>, vector<2x8x8xf32>, vector<2x8x8xf32> -> vector<2x8x8xf32>
    "tpu.trace_stop"() : () -> ()
    %cst_20 = arith.constant 0.353553385 : f32
    %66 = vector.broadcast %cst_20 : f32 to vector<2x8x8xf32>
    %67 = arith.mulf %65, %66 : vector<2x8x8xf32>
    %cst_21 = arith.constant dense<0xFF800000> : vector<2x8xf32>
    %68 = vector.multi_reduction <maximumf>, %67, %cst_21 [2] : vector<2x8x8xf32> to vector<2x8xf32>
    %69 = vector.shape_cast %68 : vector<2x8xf32> to vector<2x8x1xf32>
    %70 = vector.broadcast %69 : vector<2x8x1xf32> to vector<2x8x8xf32>
    %71 = arith.subf %67, %70 : vector<2x8x8xf32>
    %72 = math.exp %71 : vector<2x8x8xf32>
    %cst_22 = arith.constant dense<0.000000e+00> : vector<2x8xf32>
    %73 = vector.multi_reduction <add>, %72, %cst_22 [2] : vector<2x8x8xf32> to vector<2x8xf32>
    %74 = vector.shape_cast %73 : vector<2x8xf32> to vector<2x8x1xf32>
    %75 = vector.broadcast %74 : vector<2x8x1xf32> to vector<2x8x8xf32>
    %76 = arith.divf %72, %75 : vector<2x8x8xf32>
    %77 = arith.addf %62, %76 : vector<2x8x8xf32>
    %cst_23 = arith.constant 2.500000e-01 : f32
    %78 = vector.broadcast %cst_23 : f32 to vector<2x8x8xf32>
    %79 = arith.mulf %77, %78 : vector<2x8x8xf32>
    %cst_24 = arith.constant 0.000000e+00 : f32
    %80 = vector.broadcast %cst_24 : f32 to vector<2x8x8xf32>
    %81 = vector.extract_strided_slice %11 {offsets = [0, 0, 0], sizes = [2, 8, 8], strides = [1, 1, 1]} : vector<2x8x32xf32> to vector<2x8x8xf32>
    %82 = vector.extract_strided_slice %12 {offsets = [0, 0, 0], sizes = [2, 8, 8], strides = [1, 1, 1]} : vector<2x8x32xf32> to vector<2x8x8xf32>
    "tpu.trace_start"() <{level = 10 : i32, message = "bld,bsd->bls"}> : () -> ()
    %cst_25 = arith.constant dense<0.000000e+00> : vector<2x8x8xf32>
    %83 = tpu.matmul %81, %82, %cst_25 {dimension_numbers = #tpu.dot_dimension_numbers<[2], [2], [1], [1], [0, 0, 0, 1, 1, 1], [0], [0]>} : vector<2x8x8xf32>, vector<2x8x8xf32>, vector<2x8x8xf32> -> vector<2x8x8xf32>
    "tpu.trace_stop"() : () -> ()
    %cst_26 = arith.constant 0.353553385 : f32
    %84 = vector.broadcast %cst_26 : f32 to vector<2x8x8xf32>
    %85 = arith.mulf %83, %84 : vector<2x8x8xf32>
    %cst_27 = arith.constant dense<0xFF800000> : vector<2x8xf32>
    %86 = vector.multi_reduction <maximumf>, %85, %cst_27 [2] : vector<2x8x8xf32> to vector<2x8xf32>
    %87 = vector.shape_cast %86 : vector<2x8xf32> to vector<2x8x1xf32>
    %88 = vector.broadcast %87 : vector<2x8x1xf32> to vector<2x8x8xf32>
    %89 = arith.subf %85, %88 : vector<2x8x8xf32>
    %90 = math.exp %89 : vector<2x8x8xf32>
    %cst_28 = arith.constant dense<0.000000e+00> : vector<2x8xf32>
    %91 = vector.multi_reduction <add>, %90, %cst_28 [2] : vector<2x8x8xf32> to vector<2x8xf32>
    %92 = vector.shape_cast %91 : vector<2x8xf32> to vector<2x8x1xf32>
    %93 = vector.broadcast %92 : vector<2x8x1xf32> to vector<2x8x8xf32>
    %94 = arith.divf %90, %93 : vector<2x8x8xf32>
    %95 = arith.addf %80, %94 : vector<2x8x8xf32>
    %96 = vector.extract_strided_slice %11 {offsets = [0, 0, 8], sizes = [2, 8, 8], strides = [1, 1, 1]} : vector<2x8x32xf32> to vector<2x8x8xf32>
    %97 = vector.extract_strided_slice %12 {offsets = [0, 0, 8], sizes = [2, 8, 8], strides = [1, 1, 1]} : vector<2x8x32xf32> to vector<2x8x8xf32>
    "tpu.trace_start"() <{level = 10 : i32, message = "bld,bsd->bls"}> : () -> ()
    %cst_29 = arith.constant dense<0.000000e+00> : vector<2x8x8xf32>
    %98 = tpu.matmul %96, %97, %cst_29 {dimension_numbers = #tpu.dot_dimension_numbers<[2], [2], [1], [1], [0, 0, 0, 1, 1, 1], [0], [0]>} : vector<2x8x8xf32>, vector<2x8x8xf32>, vector<2x8x8xf32> -> vector<2x8x8xf32>
    "tpu.trace_stop"() : () -> ()
    %cst_30 = arith.constant 0.353553385 : f32
    %99 = vector.broadcast %cst_30 : f32 to vector<2x8x8xf32>
    %100 = arith.mulf %98, %99 : vector<2x8x8xf32>
    %cst_31 = arith.constant dense<0xFF800000> : vector<2x8xf32>
    %101 = vector.multi_reduction <maximumf>, %100, %cst_31 [2] : vector<2x8x8xf32> to vector<2x8xf32>
    %102 = vector.shape_cast %101 : vector<2x8xf32> to vector<2x8x1xf32>
    %103 = vector.broadcast %102 : vector<2x8x1xf32> to vector<2x8x8xf32>
    %104 = arith.subf %100, %103 : vector<2x8x8xf32>
    %105 = math.exp %104 : vector<2x8x8xf32>
    %cst_32 = arith.constant dense<0.000000e+00> : vector<2x8xf32>
    %106 = vector.multi_reduction <add>, %105, %cst_32 [2] : vector<2x8x8xf32> to vector<2x8xf32>
    %107 = vector.shape_cast %106 : vector<2x8xf32> to vector<2x8x1xf32>
    %108 = vector.broadcast %107 : vector<2x8x1xf32> to vector<2x8x8xf32>
    %109 = arith.divf %105, %108 : vector<2x8x8xf32>
    %110 = arith.addf %95, %109 : vector<2x8x8xf32>
    %111 = vector.extract_strided_slice %11 {offsets = [0, 0, 16], sizes = [2, 8, 8], strides = [1, 1, 1]} : vector<2x8x32xf32> to vector<2x8x8xf32>
    %112 = vector.extract_strided_slice %12 {offsets = [0, 0, 16], sizes = [2, 8, 8], strides = [1, 1, 1]} : vector<2x8x32xf32> to vector<2x8x8xf32>
    "tpu.trace_start"() <{level = 10 : i32, message = "bld,bsd->bls"}> : () -> ()
    %cst_33 = arith.constant dense<0.000000e+00> : vector<2x8x8xf32>
    %113 = tpu.matmul %111, %112, %cst_33 {dimension_numbers = #tpu.dot_dimension_numbers<[2], [2], [1], [1], [0, 0, 0, 1, 1, 1], [0], [0]>} : vector<2x8x8xf32>, vector<2x8x8xf32>, vector<2x8x8xf32> -> vector<2x8x8xf32>
    "tpu.trace_stop"() : () -> ()
    %cst_34 = arith.constant 0.353553385 : f32
    %114 = vector.broadcast %cst_34 : f32 to vector<2x8x8xf32>
    %115 = arith.mulf %113, %114 : vector<2x8x8xf32>
    %cst_35 = arith.constant dense<0xFF800000> : vector<2x8xf32>
    %116 = vector.multi_reduction <maximumf>, %115, %cst_35 [2] : vector<2x8x8xf32> to vector<2x8xf32>
    %117 = vector.shape_cast %116 : vector<2x8xf32> to vector<2x8x1xf32>
    %118 = vector.broadcast %117 : vector<2x8x1xf32> to vector<2x8x8xf32>
    %119 = arith.subf %115, %118 : vector<2x8x8xf32>
    %120 = math.exp %119 : vector<2x8x8xf32>
    %cst_36 = arith.constant dense<0.000000e+00> : vector<2x8xf32>
    %121 = vector.multi_reduction <add>, %120, %cst_36 [2] : vector<2x8x8xf32> to vector<2x8xf32>
    %122 = vector.shape_cast %121 : vector<2x8xf32> to vector<2x8x1xf32>
    %123 = vector.broadcast %122 : vector<2x8x1xf32> to vector<2x8x8xf32>
    %124 = arith.divf %120, %123 : vector<2x8x8xf32>
    %125 = arith.addf %110, %124 : vector<2x8x8xf32>
    %126 = vector.extract_strided_slice %11 {offsets = [0, 0, 24], sizes = [2, 8, 8], strides = [1, 1, 1]} : vector<2x8x32xf32> to vector<2x8x8xf32>
    %127 = vector.extract_strided_slice %12 {offsets = [0, 0, 24], sizes = [2, 8, 8], strides = [1, 1, 1]} : vector<2x8x32xf32> to vector<2x8x8xf32>
    "tpu.trace_start"() <{level = 10 : i32, message = "bld,bsd->bls"}> : () -> ()
    %cst_37 = arith.constant dense<0.000000e+00> : vector<2x8x8xf32>
    %128 = tpu.matmul %126, %127, %cst_37 {dimension_numbers = #tpu.dot_dimension_numbers<[2], [2], [1], [1], [0, 0, 0, 1, 1, 1], [0], [0]>} : vector<2x8x8xf32>, vector<2x8x8xf32>, vector<2x8x8xf32> -> vector<2x8x8xf32>
    "tpu.trace_stop"() : () -> ()
    %cst_38 = arith.constant 0.353553385 : f32
    %129 = vector.broadcast %cst_38 : f32 to vector<2x8x8xf32>
    %130 = arith.mulf %128, %129 : vector<2x8x8xf32>
    %cst_39 = arith.constant dense<0xFF800000> : vector<2x8xf32>
    %131 = vector.multi_reduction <maximumf>, %130, %cst_39 [2] : vector<2x8x8xf32> to vector<2x8xf32>
    %132 = vector.shape_cast %131 : vector<2x8xf32> to vector<2x8x1xf32>
    %133 = vector.broadcast %132 : vector<2x8x1xf32> to vector<2x8x8xf32>
    %134 = arith.subf %130, %133 : vector<2x8x8xf32>
    %135 = math.exp %134 : vector<2x8x8xf32>
    %cst_40 = arith.constant dense<0.000000e+00> : vector<2x8xf32>
    %136 = vector.multi_reduction <add>, %135, %cst_40 [2] : vector<2x8x8xf32> to vector<2x8xf32>
    %137 = vector.shape_cast %136 : vector<2x8xf32> to vector<2x8x1xf32>
    %138 = vector.broadcast %137 : vector<2x8x1xf32> to vector<2x8x8xf32>
    %139 = arith.divf %135, %138 : vector<2x8x8xf32>
    %140 = arith.addf %125, %139 : vector<2x8x8xf32>
    %cst_41 = arith.constant 2.500000e-01 : f32
    %141 = vector.broadcast %cst_41 : f32 to vector<2x8x8xf32>
    %142 = arith.mulf %140, %141 : vector<2x8x8xf32>
    %143 = vector.extract_strided_slice %79 {offsets = [0, 0, 0], sizes = [1, 8, 8], strides = [1, 1, 1]} : vector<2x8x8xf32> to vector<1x8x8xf32>
    %144 = vector.shape_cast %143 : vector<1x8x8xf32> to vector<8x8xf32>
    %145 = vector.extract_strided_slice %79 {offsets = [0, 0, 0], sizes = [1, 8, 8], strides = [1, 1, 1]} : vector<2x8x8xf32> to vector<1x8x8xf32>
    %146 = vector.shape_cast %145 : vector<1x8x8xf32> to vector<8x8xf32>
    %147 = vector.shape_cast %144 : vector<8x8xf32> to vector<1x8x8xf32>
    %148 = vector.shape_cast %146 : vector<8x8xf32> to vector<1x8x8xf32>
    %149 = tpu.concatenate %147, %148 in 0 : vector<1x8x8xf32>, vector<1x8x8xf32> -> vector<2x8x8xf32>
    %150 = vector.extract_strided_slice %11 {offsets = [0, 0, 0], sizes = [2, 8, 8], strides = [1, 1, 1]} : vector<2x8x32xf32> to vector<2x8x8xf32>
    %151 = vector.extract_strided_slice %15 {offsets = [0, 0, 0], sizes = [2, 8, 8], strides = [1, 1, 1]} : vector<2x8x32xf32> to vector<2x8x8xf32>
    "tpu.trace_start"() <{level = 10 : i32, message = "bld,bsd->bls"}> : () -> ()
    %cst_42 = arith.constant dense<0.000000e+00> : vector<2x8x8xf32>
    %152 = tpu.matmul %150, %151, %cst_42 {dimension_numbers = #tpu.dot_dimension_numbers<[2], [2], [1], [1], [0, 0, 0, 1, 1, 1], [0], [0]>} : vector<2x8x8xf32>, vector<2x8x8xf32>, vector<2x8x8xf32> -> vector<2x8x8xf32>
    "tpu.trace_stop"() : () -> ()
    %cst_43 = arith.constant 0.353553385 : f32
    %153 = vector.broadcast %cst_43 : f32 to vector<2x8x8xf32>
    %154 = arith.mulf %152, %153 : vector<2x8x8xf32>
    %155 = arith.addf %154, %149 : vector<2x8x8xf32>
    %cst_44 = arith.constant dense<0xFF800000> : vector<2x8xf32>
    %156 = vector.multi_reduction <maximumf>, %155, %cst_44 [2] : vector<2x8x8xf32> to vector<2x8xf32>
    %157 = vector.shape_cast %156 : vector<2x8xf32> to vector<2x8x1xf32>
    %158 = vector.broadcast %157 : vector<2x8x1xf32> to vector<2x8x8xf32>
    %159 = arith.subf %155, %158 : vector<2x8x8xf32>
    %160 = math.exp %159 : vector<2x8x8xf32>
    %cst_45 = arith.constant dense<0.000000e+00> : vector<2x8xf32>
    %161 = vector.multi_reduction <add>, %160, %cst_45 [2] : vector<2x8x8xf32> to vector<2x8xf32>
    %162 = vector.shape_cast %161 : vector<2x8xf32> to vector<2x8x1xf32>
    %163 = vector.broadcast %162 : vector<2x8x1xf32> to vector<2x8x8xf32>
    %164 = arith.divf %160, %163 : vector<2x8x8xf32>
    %165 = vector.extract_strided_slice %16 {offsets = [0, 0, 0], sizes = [2, 8, 8], strides = [1, 1, 1]} : vector<2x8x32xf32> to vector<2x8x8xf32>
    "tpu.trace_start"() <{level = 10 : i32, message = "bls,bsd->bld"}> : () -> ()
    %cst_46 = arith.constant dense<0.000000e+00> : vector<2x8x8xf32>
    %166 = tpu.matmul %164, %165, %cst_46 {dimension_numbers = #tpu.dot_dimension_numbers<[2], [1], [1], [2], [0, 0, 0, 1, 1, 2], [0], [0]>} : vector<2x8x8xf32>, vector<2x8x8xf32>, vector<2x8x8xf32> -> vector<2x8x8xf32>
    "tpu.trace_stop"() : () -> ()
    %167 = vector.extract_strided_slice %79 {offsets = [1, 0, 0], sizes = [1, 8, 8], strides = [1, 1, 1]} : vector<2x8x8xf32> to vector<1x8x8xf32>
    %168 = vector.shape_cast %167 : vector<1x8x8xf32> to vector<8x8xf32>
    %169 = vector.extract_strided_slice %79 {offsets = [1, 0, 0], sizes = [1, 8, 8], strides = [1, 1, 1]} : vector<2x8x8xf32> to vector<1x8x8xf32>
    %170 = vector.shape_cast %169 : vector<1x8x8xf32> to vector<8x8xf32>
    %171 = vector.shape_cast %168 : vector<8x8xf32> to vector<1x8x8xf32>
    %172 = vector.shape_cast %170 : vector<8x8xf32> to vector<1x8x8xf32>
    %173 = tpu.concatenate %171, %172 in 0 : vector<1x8x8xf32>, vector<1x8x8xf32> -> vector<2x8x8xf32>
    %174 = vector.extract_strided_slice %11 {offsets = [0, 0, 8], sizes = [2, 8, 8], strides = [1, 1, 1]} : vector<2x8x32xf32> to vector<2x8x8xf32>
    %175 = vector.extract_strided_slice %15 {offsets = [0, 0, 8], sizes = [2, 8, 8], strides = [1, 1, 1]} : vector<2x8x32xf32> to vector<2x8x8xf32>
    "tpu.trace_start"() <{level = 10 : i32, message = "bld,bsd->bls"}> : () -> ()
    %cst_47 = arith.constant dense<0.000000e+00> : vector<2x8x8xf32>
    %176 = tpu.matmul %174, %175, %cst_47 {dimension_numbers = #tpu.dot_dimension_numbers<[2], [2], [1], [1], [0, 0, 0, 1, 1, 1], [0], [0]>} : vector<2x8x8xf32>, vector<2x8x8xf32>, vector<2x8x8xf32> -> vector<2x8x8xf32>
    "tpu.trace_stop"() : () -> ()
    %cst_48 = arith.constant 0.353553385 : f32
    %177 = vector.broadcast %cst_48 : f32 to vector<2x8x8xf32>
    %178 = arith.mulf %176, %177 : vector<2x8x8xf32>
    %179 = arith.addf %178, %173 : vector<2x8x8xf32>
    %cst_49 = arith.constant dense<0xFF800000> : vector<2x8xf32>
    %180 = vector.multi_reduction <maximumf>, %179, %cst_49 [2] : vector<2x8x8xf32> to vector<2x8xf32>
    %181 = vector.shape_cast %180 : vector<2x8xf32> to vector<2x8x1xf32>
    %182 = vector.broadcast %181 : vector<2x8x1xf32> to vector<2x8x8xf32>
    %183 = arith.subf %179, %182 : vector<2x8x8xf32>
    %184 = math.exp %183 : vector<2x8x8xf32>
    %cst_50 = arith.constant dense<0.000000e+00> : vector<2x8xf32>
    %185 = vector.multi_reduction <add>, %184, %cst_50 [2] : vector<2x8x8xf32> to vector<2x8xf32>
    %186 = vector.shape_cast %185 : vector<2x8xf32> to vector<2x8x1xf32>
    %187 = vector.broadcast %186 : vector<2x8x1xf32> to vector<2x8x8xf32>
    %188 = arith.divf %184, %187 : vector<2x8x8xf32>
    %189 = vector.extract_strided_slice %16 {offsets = [0, 0, 8], sizes = [2, 8, 8], strides = [1, 1, 1]} : vector<2x8x32xf32> to vector<2x8x8xf32>
    "tpu.trace_start"() <{level = 10 : i32, message = "bls,bsd->bld"}> : () -> ()
    %cst_51 = arith.constant dense<0.000000e+00> : vector<2x8x8xf32>
    %190 = tpu.matmul %188, %189, %cst_51 {dimension_numbers = #tpu.dot_dimension_numbers<[2], [1], [1], [2], [0, 0, 0, 1, 1, 2], [0], [0]>} : vector<2x8x8xf32>, vector<2x8x8xf32>, vector<2x8x8xf32> -> vector<2x8x8xf32>
    "tpu.trace_stop"() : () -> ()
    %191 = vector.extract_strided_slice %79 {offsets = [0, 0, 0], sizes = [1, 8, 8], strides = [1, 1, 1]} : vector<2x8x8xf32> to vector<1x8x8xf32>
    %192 = vector.shape_cast %191 : vector<1x8x8xf32> to vector<8x8xf32>
    %193 = vector.extract_strided_slice %79 {offsets = [0, 0, 0], sizes = [1, 8, 8], strides = [1, 1, 1]} : vector<2x8x8xf32> to vector<1x8x8xf32>
    %194 = vector.shape_cast %193 : vector<1x8x8xf32> to vector<8x8xf32>
    %195 = vector.shape_cast %192 : vector<8x8xf32> to vector<1x8x8xf32>
    %196 = vector.shape_cast %194 : vector<8x8xf32> to vector<1x8x8xf32>
    %197 = tpu.concatenate %195, %196 in 0 : vector<1x8x8xf32>, vector<1x8x8xf32> -> vector<2x8x8xf32>
    %198 = vector.extract_strided_slice %11 {offsets = [0, 0, 16], sizes = [2, 8, 8], strides = [1, 1, 1]} : vector<2x8x32xf32> to vector<2x8x8xf32>
    %199 = vector.extract_strided_slice %15 {offsets = [0, 0, 16], sizes = [2, 8, 8], strides = [1, 1, 1]} : vector<2x8x32xf32> to vector<2x8x8xf32>
    "tpu.trace_start"() <{level = 10 : i32, message = "bld,bsd->bls"}> : () -> ()
    %cst_52 = arith.constant dense<0.000000e+00> : vector<2x8x8xf32>
    %200 = tpu.matmul %198, %199, %cst_52 {dimension_numbers = #tpu.dot_dimension_numbers<[2], [2], [1], [1], [0, 0, 0, 1, 1, 1], [0], [0]>} : vector<2x8x8xf32>, vector<2x8x8xf32>, vector<2x8x8xf32> -> vector<2x8x8xf32>
    "tpu.trace_stop"() : () -> ()
    %cst_53 = arith.constant 0.353553385 : f32
    %201 = vector.broadcast %cst_53 : f32 to vector<2x8x8xf32>
    %202 = arith.mulf %200, %201 : vector<2x8x8xf32>
    %203 = arith.addf %202, %197 : vector<2x8x8xf32>
    %cst_54 = arith.constant dense<0xFF800000> : vector<2x8xf32>
    %204 = vector.multi_reduction <maximumf>, %203, %cst_54 [2] : vector<2x8x8xf32> to vector<2x8xf32>
    %205 = vector.shape_cast %204 : vector<2x8xf32> to vector<2x8x1xf32>
    %206 = vector.broadcast %205 : vector<2x8x1xf32> to vector<2x8x8xf32>
    %207 = arith.subf %203, %206 : vector<2x8x8xf32>
    %208 = math.exp %207 : vector<2x8x8xf32>
    %cst_55 = arith.constant dense<0.000000e+00> : vector<2x8xf32>
    %209 = vector.multi_reduction <add>, %208, %cst_55 [2] : vector<2x8x8xf32> to vector<2x8xf32>
    %210 = vector.shape_cast %209 : vector<2x8xf32> to vector<2x8x1xf32>
    %211 = vector.broadcast %210 : vector<2x8x1xf32> to vector<2x8x8xf32>
    %212 = arith.divf %208, %211 : vector<2x8x8xf32>
    %213 = vector.extract_strided_slice %16 {offsets = [0, 0, 16], sizes = [2, 8, 8], strides = [1, 1, 1]} : vector<2x8x32xf32> to vector<2x8x8xf32>
    "tpu.trace_start"() <{level = 10 : i32, message = "bls,bsd->bld"}> : () -> ()
    %cst_56 = arith.constant dense<0.000000e+00> : vector<2x8x8xf32>
    %214 = tpu.matmul %212, %213, %cst_56 {dimension_numbers = #tpu.dot_dimension_numbers<[2], [1], [1], [2], [0, 0, 0, 1, 1, 2], [0], [0]>} : vector<2x8x8xf32>, vector<2x8x8xf32>, vector<2x8x8xf32> -> vector<2x8x8xf32>
    "tpu.trace_stop"() : () -> ()
    %215 = vector.extract_strided_slice %79 {offsets = [1, 0, 0], sizes = [1, 8, 8], strides = [1, 1, 1]} : vector<2x8x8xf32> to vector<1x8x8xf32>
    %216 = vector.shape_cast %215 : vector<1x8x8xf32> to vector<8x8xf32>
    %217 = vector.extract_strided_slice %79 {offsets = [1, 0, 0], sizes = [1, 8, 8], strides = [1, 1, 1]} : vector<2x8x8xf32> to vector<1x8x8xf32>
    %218 = vector.shape_cast %217 : vector<1x8x8xf32> to vector<8x8xf32>
    %219 = vector.shape_cast %216 : vector<8x8xf32> to vector<1x8x8xf32>
    %220 = vector.shape_cast %218 : vector<8x8xf32> to vector<1x8x8xf32>
    %221 = tpu.concatenate %219, %220 in 0 : vector<1x8x8xf32>, vector<1x8x8xf32> -> vector<2x8x8xf32>
    %222 = vector.extract_strided_slice %11 {offsets = [0, 0, 24], sizes = [2, 8, 8], strides = [1, 1, 1]} : vector<2x8x32xf32> to vector<2x8x8xf32>
    %223 = vector.extract_strided_slice %15 {offsets = [0, 0, 24], sizes = [2, 8, 8], strides = [1, 1, 1]} : vector<2x8x32xf32> to vector<2x8x8xf32>
    "tpu.trace_start"() <{level = 10 : i32, message = "bld,bsd->bls"}> : () -> ()
    %cst_57 = arith.constant dense<0.000000e+00> : vector<2x8x8xf32>
    %224 = tpu.matmul %222, %223, %cst_57 {dimension_numbers = #tpu.dot_dimension_numbers<[2], [2], [1], [1], [0, 0, 0, 1, 1, 1], [0], [0]>} : vector<2x8x8xf32>, vector<2x8x8xf32>, vector<2x8x8xf32> -> vector<2x8x8xf32>
    "tpu.trace_stop"() : () -> ()
    %cst_58 = arith.constant 0.353553385 : f32
    %225 = vector.broadcast %cst_58 : f32 to vector<2x8x8xf32>
    %226 = arith.mulf %224, %225 : vector<2x8x8xf32>
    %227 = arith.addf %226, %221 : vector<2x8x8xf32>
    %cst_59 = arith.constant dense<0xFF800000> : vector<2x8xf32>
    %228 = vector.multi_reduction <maximumf>, %227, %cst_59 [2] : vector<2x8x8xf32> to vector<2x8xf32>
    %229 = vector.shape_cast %228 : vector<2x8xf32> to vector<2x8x1xf32>
    %230 = vector.broadcast %229 : vector<2x8x1xf32> to vector<2x8x8xf32>
    %231 = arith.subf %227, %230 : vector<2x8x8xf32>
    %232 = math.exp %231 : vector<2x8x8xf32>
    %cst_60 = arith.constant dense<0.000000e+00> : vector<2x8xf32>
    %233 = vector.multi_reduction <add>, %232, %cst_60 [2] : vector<2x8x8xf32> to vector<2x8xf32>
    %234 = vector.shape_cast %233 : vector<2x8xf32> to vector<2x8x1xf32>
    %235 = vector.broadcast %234 : vector<2x8x1xf32> to vector<2x8x8xf32>
    %236 = arith.divf %232, %235 : vector<2x8x8xf32>
    %237 = vector.extract_strided_slice %16 {offsets = [0, 0, 24], sizes = [2, 8, 8], strides = [1, 1, 1]} : vector<2x8x32xf32> to vector<2x8x8xf32>
    "tpu.trace_start"() <{level = 10 : i32, message = "bls,bsd->bld"}> : () -> ()
    %cst_61 = arith.constant dense<0.000000e+00> : vector<2x8x8xf32>
    %238 = tpu.matmul %236, %237, %cst_61 {dimension_numbers = #tpu.dot_dimension_numbers<[2], [1], [1], [2], [0, 0, 0, 1, 1, 2], [0], [0]>} : vector<2x8x8xf32>, vector<2x8x8xf32>, vector<2x8x8xf32> -> vector<2x8x8xf32>
    "tpu.trace_stop"() : () -> ()
    %239 = tpu.concatenate %166, %190, %214, %238 in 2 : vector<2x8x8xf32>, vector<2x8x8xf32>, vector<2x8x8xf32>, vector<2x8x8xf32> -> vector<2x8x32xf32>
    %240 = vector.extract_strided_slice %142 {offsets = [0, 0, 0], sizes = [1, 8, 8], strides = [1, 1, 1]} : vector<2x8x8xf32> to vector<1x8x8xf32>
    %241 = vector.shape_cast %240 : vector<1x8x8xf32> to vector<8x8xf32>
    %242 = vector.extract_strided_slice %142 {offsets = [0, 0, 0], sizes = [1, 8, 8], strides = [1, 1, 1]} : vector<2x8x8xf32> to vector<1x8x8xf32>
    %243 = vector.shape_cast %242 : vector<1x8x8xf32> to vector<8x8xf32>
    %244 = vector.shape_cast %241 : vector<8x8xf32> to vector<1x8x8xf32>
    %245 = vector.shape_cast %243 : vector<8x8xf32> to vector<1x8x8xf32>
    %246 = tpu.concatenate %244, %245 in 0 : vector<1x8x8xf32>, vector<1x8x8xf32> -> vector<2x8x8xf32>
    %247 = vector.extract_strided_slice %14 {offsets = [0, 0, 0], sizes = [2, 8, 8], strides = [1, 1, 1]} : vector<2x8x32xf32> to vector<2x8x8xf32>
    %248 = vector.extract_strided_slice %12 {offsets = [0, 0, 0], sizes = [2, 8, 8], strides = [1, 1, 1]} : vector<2x8x32xf32> to vector<2x8x8xf32>
    "tpu.trace_start"() <{level = 10 : i32, message = "bld,bsd->bls"}> : () -> ()
    %cst_62 = arith.constant dense<0.000000e+00> : vector<2x8x8xf32>
    %249 = tpu.matmul %247, %248, %cst_62 {dimension_numbers = #tpu.dot_dimension_numbers<[2], [2], [1], [1], [0, 0, 0, 1, 1, 1], [0], [0]>} : vector<2x8x8xf32>, vector<2x8x8xf32>, vector<2x8x8xf32> -> vector<2x8x8xf32>
    "tpu.trace_stop"() : () -> ()
    %cst_63 = arith.constant 0.353553385 : f32
    %250 = vector.broadcast %cst_63 : f32 to vector<2x8x8xf32>
    %251 = arith.mulf %249, %250 : vector<2x8x8xf32>
    %252 = arith.addf %251, %246 : vector<2x8x8xf32>
    %cst_64 = arith.constant dense<0xFF800000> : vector<2x8xf32>
    %253 = vector.multi_reduction <maximumf>, %252, %cst_64 [2] : vector<2x8x8xf32> to vector<2x8xf32>
    %254 = vector.shape_cast %253 : vector<2x8xf32> to vector<2x8x1xf32>
    %255 = vector.broadcast %254 : vector<2x8x1xf32> to vector<2x8x8xf32>
    %256 = arith.subf %252, %255 : vector<2x8x8xf32>
    %257 = math.exp %256 : vector<2x8x8xf32>
    %cst_65 = arith.constant dense<0.000000e+00> : vector<2x8xf32>
    %258 = vector.multi_reduction <add>, %257, %cst_65 [2] : vector<2x8x8xf32> to vector<2x8xf32>
    %259 = vector.shape_cast %258 : vector<2x8xf32> to vector<2x8x1xf32>
    %260 = vector.broadcast %259 : vector<2x8x1xf32> to vector<2x8x8xf32>
    %261 = arith.divf %257, %260 : vector<2x8x8xf32>
    %262 = vector.extract_strided_slice %13 {offsets = [0, 0, 0], sizes = [2, 8, 8], strides = [1, 1, 1]} : vector<2x8x32xf32> to vector<2x8x8xf32>
    "tpu.trace_start"() <{level = 10 : i32, message = "bls,bsd->bld"}> : () -> ()
    %cst_66 = arith.constant dense<0.000000e+00> : vector<2x8x8xf32>
    %263 = tpu.matmul %261, %262, %cst_66 {dimension_numbers = #tpu.dot_dimension_numbers<[2], [1], [1], [2], [0, 0, 0, 1, 1, 2], [0], [0]>} : vector<2x8x8xf32>, vector<2x8x8xf32>, vector<2x8x8xf32> -> vector<2x8x8xf32>
    "tpu.trace_stop"() : () -> ()
    %264 = vector.extract_strided_slice %142 {offsets = [1, 0, 0], sizes = [1, 8, 8], strides = [1, 1, 1]} : vector<2x8x8xf32> to vector<1x8x8xf32>
    %265 = vector.shape_cast %264 : vector<1x8x8xf32> to vector<8x8xf32>
    %266 = vector.extract_strided_slice %142 {offsets = [1, 0, 0], sizes = [1, 8, 8], strides = [1, 1, 1]} : vector<2x8x8xf32> to vector<1x8x8xf32>
    %267 = vector.shape_cast %266 : vector<1x8x8xf32> to vector<8x8xf32>
    %268 = vector.shape_cast %265 : vector<8x8xf32> to vector<1x8x8xf32>
    %269 = vector.shape_cast %267 : vector<8x8xf32> to vector<1x8x8xf32>
    %270 = tpu.concatenate %268, %269 in 0 : vector<1x8x8xf32>, vector<1x8x8xf32> -> vector<2x8x8xf32>
    %271 = vector.extract_strided_slice %14 {offsets = [0, 0, 8], sizes = [2, 8, 8], strides = [1, 1, 1]} : vector<2x8x32xf32> to vector<2x8x8xf32>
    %272 = vector.extract_strided_slice %12 {offsets = [0, 0, 8], sizes = [2, 8, 8], strides = [1, 1, 1]} : vector<2x8x32xf32> to vector<2x8x8xf32>
    "tpu.trace_start"() <{level = 10 : i32, message = "bld,bsd->bls"}> : () -> ()
    %cst_67 = arith.constant dense<0.000000e+00> : vector<2x8x8xf32>
    %273 = tpu.matmul %271, %272, %cst_67 {dimension_numbers = #tpu.dot_dimension_numbers<[2], [2], [1], [1], [0, 0, 0, 1, 1, 1], [0], [0]>} : vector<2x8x8xf32>, vector<2x8x8xf32>, vector<2x8x8xf32> -> vector<2x8x8xf32>
    "tpu.trace_stop"() : () -> ()
    %cst_68 = arith.constant 0.353553385 : f32
    %274 = vector.broadcast %cst_68 : f32 to vector<2x8x8xf32>
    %275 = arith.mulf %273, %274 : vector<2x8x8xf32>
    %276 = arith.addf %275, %270 : vector<2x8x8xf32>
    %cst_69 = arith.constant dense<0xFF800000> : vector<2x8xf32>
    %277 = vector.multi_reduction <maximumf>, %276, %cst_69 [2] : vector<2x8x8xf32> to vector<2x8xf32>
    %278 = vector.shape_cast %277 : vector<2x8xf32> to vector<2x8x1xf32>
    %279 = vector.broadcast %278 : vector<2x8x1xf32> to vector<2x8x8xf32>
    %280 = arith.subf %276, %279 : vector<2x8x8xf32>
    %281 = math.exp %280 : vector<2x8x8xf32>
    %cst_70 = arith.constant dense<0.000000e+00> : vector<2x8xf32>
    %282 = vector.multi_reduction <add>, %281, %cst_70 [2] : vector<2x8x8xf32> to vector<2x8xf32>
    %283 = vector.shape_cast %282 : vector<2x8xf32> to vector<2x8x1xf32>
    %284 = vector.broadcast %283 : vector<2x8x1xf32> to vector<2x8x8xf32>
    %285 = arith.divf %281, %284 : vector<2x8x8xf32>
    %286 = vector.extract_strided_slice %13 {offsets = [0, 0, 8], sizes = [2, 8, 8], strides = [1, 1, 1]} : vector<2x8x32xf32> to vector<2x8x8xf32>
    "tpu.trace_start"() <{level = 10 : i32, message = "bls,bsd->bld"}> : () -> ()
    %cst_71 = arith.constant dense<0.000000e+00> : vector<2x8x8xf32>
    %287 = tpu.matmul %285, %286, %cst_71 {dimension_numbers = #tpu.dot_dimension_numbers<[2], [1], [1], [2], [0, 0, 0, 1, 1, 2], [0], [0]>} : vector<2x8x8xf32>, vector<2x8x8xf32>, vector<2x8x8xf32> -> vector<2x8x8xf32>
    "tpu.trace_stop"() : () -> ()
    %288 = vector.extract_strided_slice %142 {offsets = [0, 0, 0], sizes = [1, 8, 8], strides = [1, 1, 1]} : vector<2x8x8xf32> to vector<1x8x8xf32>
    %289 = vector.shape_cast %288 : vector<1x8x8xf32> to vector<8x8xf32>
    %290 = vector.extract_strided_slice %142 {offsets = [0, 0, 0], sizes = [1, 8, 8], strides = [1, 1, 1]} : vector<2x8x8xf32> to vector<1x8x8xf32>
    %291 = vector.shape_cast %290 : vector<1x8x8xf32> to vector<8x8xf32>
    %292 = vector.shape_cast %289 : vector<8x8xf32> to vector<1x8x8xf32>
    %293 = vector.shape_cast %291 : vector<8x8xf32> to vector<1x8x8xf32>
    %294 = tpu.concatenate %292, %293 in 0 : vector<1x8x8xf32>, vector<1x8x8xf32> -> vector<2x8x8xf32>
    %295 = vector.extract_strided_slice %14 {offsets = [0, 0, 16], sizes = [2, 8, 8], strides = [1, 1, 1]} : vector<2x8x32xf32> to vector<2x8x8xf32>
    %296 = vector.extract_strided_slice %12 {offsets = [0, 0, 16], sizes = [2, 8, 8], strides = [1, 1, 1]} : vector<2x8x32xf32> to vector<2x8x8xf32>
    "tpu.trace_start"() <{level = 10 : i32, message = "bld,bsd->bls"}> : () -> ()
    %cst_72 = arith.constant dense<0.000000e+00> : vector<2x8x8xf32>
    %297 = tpu.matmul %295, %296, %cst_72 {dimension_numbers = #tpu.dot_dimension_numbers<[2], [2], [1], [1], [0, 0, 0, 1, 1, 1], [0], [0]>} : vector<2x8x8xf32>, vector<2x8x8xf32>, vector<2x8x8xf32> -> vector<2x8x8xf32>
    "tpu.trace_stop"() : () -> ()
    %cst_73 = arith.constant 0.353553385 : f32
    %298 = vector.broadcast %cst_73 : f32 to vector<2x8x8xf32>
    %299 = arith.mulf %297, %298 : vector<2x8x8xf32>
    %300 = arith.addf %299, %294 : vector<2x8x8xf32>
    %cst_74 = arith.constant dense<0xFF800000> : vector<2x8xf32>
    %301 = vector.multi_reduction <maximumf>, %300, %cst_74 [2] : vector<2x8x8xf32> to vector<2x8xf32>
    %302 = vector.shape_cast %301 : vector<2x8xf32> to vector<2x8x1xf32>
    %303 = vector.broadcast %302 : vector<2x8x1xf32> to vector<2x8x8xf32>
    %304 = arith.subf %300, %303 : vector<2x8x8xf32>
    %305 = math.exp %304 : vector<2x8x8xf32>
    %cst_75 = arith.constant dense<0.000000e+00> : vector<2x8xf32>
    %306 = vector.multi_reduction <add>, %305, %cst_75 [2] : vector<2x8x8xf32> to vector<2x8xf32>
    %307 = vector.shape_cast %306 : vector<2x8xf32> to vector<2x8x1xf32>
    %308 = vector.broadcast %307 : vector<2x8x1xf32> to vector<2x8x8xf32>
    %309 = arith.divf %305, %308 : vector<2x8x8xf32>
    %310 = vector.extract_strided_slice %13 {offsets = [0, 0, 16], sizes = [2, 8, 8], strides = [1, 1, 1]} : vector<2x8x32xf32> to vector<2x8x8xf32>
    "tpu.trace_start"() <{level = 10 : i32, message = "bls,bsd->bld"}> : () -> ()
    %cst_76 = arith.constant dense<0.000000e+00> : vector<2x8x8xf32>
    %311 = tpu.matmul %309, %310, %cst_76 {dimension_numbers = #tpu.dot_dimension_numbers<[2], [1], [1], [2], [0, 0, 0, 1, 1, 2], [0], [0]>} : vector<2x8x8xf32>, vector<2x8x8xf32>, vector<2x8x8xf32> -> vector<2x8x8xf32>
    "tpu.trace_stop"() : () -> ()
    %312 = vector.extract_strided_slice %142 {offsets = [1, 0, 0], sizes = [1, 8, 8], strides = [1, 1, 1]} : vector<2x8x8xf32> to vector<1x8x8xf32>
    %313 = vector.shape_cast %312 : vector<1x8x8xf32> to vector<8x8xf32>
    %314 = vector.extract_strided_slice %142 {offsets = [1, 0, 0], sizes = [1, 8, 8], strides = [1, 1, 1]} : vector<2x8x8xf32> to vector<1x8x8xf32>
    %315 = vector.shape_cast %314 : vector<1x8x8xf32> to vector<8x8xf32>
    %316 = vector.shape_cast %313 : vector<8x8xf32> to vector<1x8x8xf32>
    %317 = vector.shape_cast %315 : vector<8x8xf32> to vector<1x8x8xf32>
    %318 = tpu.concatenate %316, %317 in 0 : vector<1x8x8xf32>, vector<1x8x8xf32> -> vector<2x8x8xf32>
    %319 = vector.extract_strided_slice %14 {offsets = [0, 0, 24], sizes = [2, 8, 8], strides = [1, 1, 1]} : vector<2x8x32xf32> to vector<2x8x8xf32>
    %320 = vector.extract_strided_slice %12 {offsets = [0, 0, 24], sizes = [2, 8, 8], strides = [1, 1, 1]} : vector<2x8x32xf32> to vector<2x8x8xf32>
    "tpu.trace_start"() <{level = 10 : i32, message = "bld,bsd->bls"}> : () -> ()
    %cst_77 = arith.constant dense<0.000000e+00> : vector<2x8x8xf32>
    %321 = tpu.matmul %319, %320, %cst_77 {dimension_numbers = #tpu.dot_dimension_numbers<[2], [2], [1], [1], [0, 0, 0, 1, 1, 1], [0], [0]>} : vector<2x8x8xf32>, vector<2x8x8xf32>, vector<2x8x8xf32> -> vector<2x8x8xf32>
    "tpu.trace_stop"() : () -> ()
    %cst_78 = arith.constant 0.353553385 : f32
    %322 = vector.broadcast %cst_78 : f32 to vector<2x8x8xf32>
    %323 = arith.mulf %321, %322 : vector<2x8x8xf32>
    %324 = arith.addf %323, %318 : vector<2x8x8xf32>
    %cst_79 = arith.constant dense<0xFF800000> : vector<2x8xf32>
    %325 = vector.multi_reduction <maximumf>, %324, %cst_79 [2] : vector<2x8x8xf32> to vector<2x8xf32>
    %326 = vector.shape_cast %325 : vector<2x8xf32> to vector<2x8x1xf32>
    %327 = vector.broadcast %326 : vector<2x8x1xf32> to vector<2x8x8xf32>
    %328 = arith.subf %324, %327 : vector<2x8x8xf32>
    %329 = math.exp %328 : vector<2x8x8xf32>
    %cst_80 = arith.constant dense<0.000000e+00> : vector<2x8xf32>
    %330 = vector.multi_reduction <add>, %329, %cst_80 [2] : vector<2x8x8xf32> to vector<2x8xf32>
    %331 = vector.shape_cast %330 : vector<2x8xf32> to vector<2x8x1xf32>
    %332 = vector.broadcast %331 : vector<2x8x1xf32> to vector<2x8x8xf32>
    %333 = arith.divf %329, %332 : vector<2x8x8xf32>
    %334 = vector.extract_strided_slice %13 {offsets = [0, 0, 24], sizes = [2, 8, 8], strides = [1, 1, 1]} : vector<2x8x32xf32> to vector<2x8x8xf32>
    "tpu.trace_start"() <{level = 10 : i32, message = "bls,bsd->bld"}> : () -> ()
    %cst_81 = arith.constant dense<0.000000e+00> : vector<2x8x8xf32>
    %335 = tpu.matmul %333, %334, %cst_81 {dimension_numbers = #tpu.dot_dimension_numbers<[2], [1], [1], [2], [0, 0, 0, 1, 1, 2], [0], [0]>} : vector<2x8x8xf32>, vector<2x8x8xf32>, vector<2x8x8xf32> -> vector<2x8x8xf32>
    "tpu.trace_stop"() : () -> ()
    %336 = tpu.concatenate %263, %287, %311, %335 in 2 : vector<2x8x8xf32>, vector<2x8x8xf32>, vector<2x8x8xf32>, vector<2x8x8xf32> -> vector<2x8x32xf32>
    %cst_82 = arith.constant dense<0.000000e+00> : vector<2x32xf32>
    %337 = vector.multi_reduction <add>, %239, %cst_82 [1] : vector<2x8x32xf32> to vector<2x32xf32>
    %cst_83 = arith.constant 8.000000e+00 : f32
    %338 = vector.broadcast %cst_83 : f32 to vector<2x32xf32>
    %339 = arith.divf %337, %338 : vector<2x32xf32>
    %cst_84 = arith.constant dense<0.000000e+00> : vector<2x32xf32>
    %340 = vector.multi_reduction <add>, %336, %cst_84 [1] : vector<2x8x32xf32> to vector<2x32xf32>
    %cst_85 = arith.constant 8.000000e+00 : f32
    %341 = vector.broadcast %cst_85 : f32 to vector<2x32xf32>
    %342 = arith.divf %340, %341 : vector<2x32xf32>
    %cst_86 = arith.constant 5.000000e-01 : f32
    %343 = vector.broadcast %cst_86 : f32 to vector<2x32xf32>
    %344 = arith.mulf %343, %342 : vector<2x32xf32>
    %345 = arith.addf %339, %344 : vector<2x32xf32>
    %c0_87 = arith.constant 0 : index
    %c0_88 = arith.constant 0 : index
    %346 = vector.load %arg4[%c0_87, %c0_88] : memref<32x32xf32, #tpu.memory_space<vmem>>, vector<32x32xf32>
    %cst_89 = arith.constant dense<0.000000e+00> : vector<2x32xf32>
    %347 = tpu.matmul %345, %346, %cst_89 {dimension_numbers = #tpu.dot_dimension_numbers<[1], [0], [0], [1], [0, 0, 1, 1], [], []>} : vector<2x32xf32>, vector<32x32xf32>, vector<2x32xf32> -> vector<2x32xf32>
    %c0_90 = arith.constant 0 : index
    %c0_91 = arith.constant 0 : index
    %348 = vector.load %arg5[%c0_90, %c0_91] : memref<1x32xf32, #tpu.memory_space<vmem>>, vector<1x32xf32>
    %cst_92 = arith.constant 1.500000e+00 : f32
    %349 = vector.broadcast %cst_92 : f32 to vector<1x32xf32>
    %350 = arith.mulf %349, %348 : vector<1x32xf32>
    %351 = vector.broadcast %350 : vector<1x32xf32> to vector<2x32xf32>
    %352 = arith.addf %347, %351 : vector<2x32xf32>
    %353 = arith.mulf %352, %352 : vector<2x32xf32>
    %cst_93 = arith.constant dense<0.000000e+00> : vector<2xf32>
    %354 = vector.multi_reduction <add>, %353, %cst_93 [1] : vector<2x32xf32> to vector<2xf32>
    %355 = vector.shape_cast %354 : vector<2xf32> to vector<2x1xf32>
    %cst_94 = arith.constant 1.000000e-24 : f32
    %356 = vector.broadcast %cst_94 : f32 to vector<2x1xf32>
    %357 = arith.maximumf %355, %356 : vector<2x1xf32>
    %358 = math.rsqrt %357 : vector<2x1xf32>
    %359 = vector.broadcast %358 : vector<2x1xf32> to vector<2x32xf32>
    %360 = arith.mulf %352, %359 : vector<2x32xf32>
    %c0_95 = arith.constant 0 : index
    %c0_96 = arith.constant 0 : index
    %361 = vector.load %arg6[%c0_95, %c0_96] : memref<2x32xf32, #tpu.memory_space<vmem>>, vector<2x32xf32>
    tpu.vector_store %arg6[%c0_95, %c0_96], %360 {strides = array<i32>} : memref<2x32xf32, #tpu.memory_space<vmem>>, vector<2x32xf32>,
    return
  }
  func.func @transform_0(%arg0: i32) -> (i32, i32, i32) {
    %c0_i32 = arith.constant 0 : i32
    %c0_i32_0 = arith.constant 0 : i32
    %c0_i32_1 = arith.constant 0 : i32
    %c0_i32_2 = arith.constant 0 : i32
    return %c0_i32, %c0_i32_0, %c0_i32_1 : i32, i32, i32
  }
  func.func @transform_1(%arg0: i32) -> (i32, i32) {
    %c0_i32 = arith.constant 0 : i32
    %c0_i32_0 = arith.constant 0 : i32
    %c0_i32_1 = arith.constant 0 : i32
    return %c0_i32, %c0_i32_0 : i32, i32
  }
  func.func @transform_2(%arg0: i32) -> (i32, i32) {
    %c0_i32 = arith.constant 0 : i32
    %c0_i32_0 = arith.constant 0 : i32
    %c0_i32_1 = arith.constant 0 : i32
    return %c0_i32, %c0_i32_0 : i32, i32
  }
  func.func @transform_3(%arg0: i32) -> (i32, i32) {
    %c0_i32 = arith.constant 0 : i32
    %c0_i32_0 = arith.constant 0 : i32
    %c0_i32_1 = arith.constant 0 : i32
    return %c0_i32, %c0_i32_0 : i32, i32
  }
  func.func @transform_4(%arg0: i32) -> (i32, i32) {
    %c0_i32 = arith.constant 0 : i32
    %c0_i32_0 = arith.constant 0 : i32
    %c0_i32_1 = arith.constant 0 : i32
    return %c0_i32, %c0_i32_0 : i32, i32
  }
  func.func @transform_5(%arg0: i32) -> (i32, i32) {
    %c0_i32 = arith.constant 0 : i32
    %c0_i32_0 = arith.constant 0 : i32
    %c0_i32_1 = arith.constant 0 : i32
    return %c0_i32, %c0_i32_0 : i32, i32
  }
}

module attributes {stable_mosaic.version = 11 : i64} {
  func.func @_lstm_kernel(%arg0: i32, %arg1: memref<4x8x8xf32, #tpu.memory_space<vmem>>, %arg2: memref<8x128xf32, #tpu.memory_space<vmem>>, %arg3: memref<32x128xf32, #tpu.memory_space<vmem>>, %arg4: memref<1x128xf32, #tpu.memory_space<vmem>>, %arg5: memref<4x8x32xf32, #tpu.memory_space<vmem>>) attributes {dimension_semantics = [#tpu.dimension_semantics<arbitrary>], iteration_bounds = array<i64: 1>, scalar_prefetch = 0 : i64, scratch_operands = 0 : i64, tpu.core_type = #tpu.core_type<tc>, window_params = [{pipeline_mode = #tpu.pipeline_mode<synchronous>, transform_indices = @transform_0, window_bounds = array<i64: 4, 8, 8>}, {pipeline_mode = #tpu.pipeline_mode<synchronous>, transform_indices = @transform_1, window_bounds = array<i64: 8, 128>}, {pipeline_mode = #tpu.pipeline_mode<synchronous>, transform_indices = @transform_2, window_bounds = array<i64: 32, 128>}, {pipeline_mode = #tpu.pipeline_mode<synchronous>, transform_indices = @transform_3, window_bounds = array<i64: 1, 128>}, {pipeline_mode = #tpu.pipeline_mode<synchronous>, transform_indices = @transform_4, window_bounds = array<i64: 4, 8, 32>}]} {
    %c0 = arith.constant 0 : index
    %c0_0 = arith.constant 0 : index
    %c0_1 = arith.constant 0 : index
    %0 = vector.load %arg1[%c0, %c0_0, %c0_1] : memref<4x8x8xf32, #tpu.memory_space<vmem>>, vector<4x8x8xf32>
    %1 = vector.shape_cast %0 : vector<4x8x8xf32> to vector<32x8xf32>
    %c0_2 = arith.constant 0 : index
    %c0_3 = arith.constant 0 : index
    %2 = vector.load %arg2[%c0_2, %c0_3] : memref<8x128xf32, #tpu.memory_space<vmem>>, vector<8x128xf32>
    %cst = arith.constant dense<0.000000e+00> : vector<32x128xf32>
    %3 = tpu.matmul %1, %2, %cst {dimension_numbers = #tpu.dot_dimension_numbers<[1], [0], [0], [1], [0, 0, 1, 1], [], []>} : vector<32x8xf32>, vector<8x128xf32>, vector<32x128xf32> -> vector<32x128xf32>
    %c0_4 = arith.constant 0 : index
    %c0_5 = arith.constant 0 : index
    %4 = vector.load %arg4[%c0_4, %c0_5] : memref<1x128xf32, #tpu.memory_space<vmem>>, vector<1x128xf32>
    %5 = vector.broadcast %4 : vector<1x128xf32> to vector<32x128xf32>
    %6 = arith.addf %3, %5 : vector<32x128xf32>
    %7 = vector.shape_cast %6 : vector<32x128xf32> to vector<4x8x128xf32>
    %c0_6 = arith.constant 0 : index
    %c0_7 = arith.constant 0 : index
    %8 = vector.load %arg3[%c0_6, %c0_7] : memref<32x128xf32, #tpu.memory_space<vmem>>, vector<32x128xf32>
    %cst_8 = arith.constant 0.000000e+00 : f32
    %9 = vector.broadcast %cst_8 : f32 to vector<4x32xf32>
    %cst_9 = arith.constant 0.000000e+00 : f32
    %10 = vector.broadcast %cst_9 : f32 to vector<4x32xf32>
    %11 = vector.extract_strided_slice %7 {offsets = [0, 0, 0], sizes = [4, 1, 128], strides = [1, 1, 1]} : vector<4x8x128xf32> to vector<4x1x128xf32>
    %12 = vector.shape_cast %11 : vector<4x1x128xf32> to vector<4x128xf32>
    %cst_10 = arith.constant dense<0.000000e+00> : vector<4x128xf32>
    %13 = tpu.matmul %9, %8, %cst_10 {dimension_numbers = #tpu.dot_dimension_numbers<[1], [0], [0], [1], [0, 0, 1, 1], [], []>} : vector<4x32xf32>, vector<32x128xf32>, vector<4x128xf32> -> vector<4x128xf32>
    %14 = arith.addf %12, %13 : vector<4x128xf32>
    %15 = vector.extract_strided_slice %14 {offsets = [0, 0], sizes = [4, 32], strides = [1, 1]} : vector<4x128xf32> to vector<4x32xf32>
    %cst_11 = arith.constant 0.000000e+00 : f32
    %16 = vector.broadcast %cst_11 : f32 to vector<4x32xf32>
    %17 = arith.subf %16, %15 : vector<4x32xf32>
    %18 = math.exp %17 : vector<4x32xf32>
    %cst_12 = arith.constant 1.000000e+00 : f32
    %19 = vector.broadcast %cst_12 : f32 to vector<4x32xf32>
    %20 = arith.addf %19, %18 : vector<4x32xf32>
    %cst_13 = arith.constant 1.000000e+00 : f32
    %21 = vector.broadcast %cst_13 : f32 to vector<4x32xf32>
    %22 = arith.divf %21, %20 : vector<4x32xf32>
    %23 = vector.extract_strided_slice %14 {offsets = [0, 32], sizes = [4, 32], strides = [1, 1]} : vector<4x128xf32> to vector<4x32xf32>
    %cst_14 = arith.constant 0.000000e+00 : f32
    %24 = vector.broadcast %cst_14 : f32 to vector<4x32xf32>
    %25 = arith.subf %24, %23 : vector<4x32xf32>
    %26 = math.exp %25 : vector<4x32xf32>
    %cst_15 = arith.constant 1.000000e+00 : f32
    %27 = vector.broadcast %cst_15 : f32 to vector<4x32xf32>
    %28 = arith.addf %27, %26 : vector<4x32xf32>
    %cst_16 = arith.constant 1.000000e+00 : f32
    %29 = vector.broadcast %cst_16 : f32 to vector<4x32xf32>
    %30 = arith.divf %29, %28 : vector<4x32xf32>
    %31 = vector.extract_strided_slice %14 {offsets = [0, 64], sizes = [4, 32], strides = [1, 1]} : vector<4x128xf32> to vector<4x32xf32>
    %32 = math.tanh %31 : vector<4x32xf32>
    %33 = vector.extract_strided_slice %14 {offsets = [0, 96], sizes = [4, 32], strides = [1, 1]} : vector<4x128xf32> to vector<4x32xf32>
    %cst_17 = arith.constant 0.000000e+00 : f32
    %34 = vector.broadcast %cst_17 : f32 to vector<4x32xf32>
    %35 = arith.subf %34, %33 : vector<4x32xf32>
    %36 = math.exp %35 : vector<4x32xf32>
    %cst_18 = arith.constant 1.000000e+00 : f32
    %37 = vector.broadcast %cst_18 : f32 to vector<4x32xf32>
    %38 = arith.addf %37, %36 : vector<4x32xf32>
    %cst_19 = arith.constant 1.000000e+00 : f32
    %39 = vector.broadcast %cst_19 : f32 to vector<4x32xf32>
    %40 = arith.divf %39, %38 : vector<4x32xf32>
    %41 = arith.mulf %30, %10 : vector<4x32xf32>
    %42 = arith.mulf %22, %32 : vector<4x32xf32>
    %43 = arith.addf %41, %42 : vector<4x32xf32>
    %44 = math.tanh %43 : vector<4x32xf32>
    %45 = arith.mulf %40, %44 : vector<4x32xf32>
    %46 = vector.shape_cast %45 : vector<4x32xf32> to vector<4x1x32xf32>
    %c0_20 = arith.constant 0 : index
    %c0_21 = arith.constant 0 : index
    %c0_22 = arith.constant 0 : index
    %47 = vector.load %arg5[%c0_20, %c0_21, %c0_22] : memref<4x8x32xf32, #tpu.memory_space<vmem>>, vector<4x1x32xf32>
    tpu.vector_store %arg5[%c0_20, %c0_21, %c0_22], %46 {strides = array<i32>} : memref<4x8x32xf32, #tpu.memory_space<vmem>>, vector<4x1x32xf32>,
    %48 = vector.extract_strided_slice %7 {offsets = [0, 1, 0], sizes = [4, 1, 128], strides = [1, 1, 1]} : vector<4x8x128xf32> to vector<4x1x128xf32>
    %49 = vector.shape_cast %48 : vector<4x1x128xf32> to vector<4x128xf32>
    %cst_23 = arith.constant dense<0.000000e+00> : vector<4x128xf32>
    %50 = tpu.matmul %45, %8, %cst_23 {dimension_numbers = #tpu.dot_dimension_numbers<[1], [0], [0], [1], [0, 0, 1, 1], [], []>} : vector<4x32xf32>, vector<32x128xf32>, vector<4x128xf32> -> vector<4x128xf32>
    %51 = arith.addf %49, %50 : vector<4x128xf32>
    %52 = vector.extract_strided_slice %51 {offsets = [0, 0], sizes = [4, 32], strides = [1, 1]} : vector<4x128xf32> to vector<4x32xf32>
    %cst_24 = arith.constant 0.000000e+00 : f32
    %53 = vector.broadcast %cst_24 : f32 to vector<4x32xf32>
    %54 = arith.subf %53, %52 : vector<4x32xf32>
    %55 = math.exp %54 : vector<4x32xf32>
    %cst_25 = arith.constant 1.000000e+00 : f32
    %56 = vector.broadcast %cst_25 : f32 to vector<4x32xf32>
    %57 = arith.addf %56, %55 : vector<4x32xf32>
    %cst_26 = arith.constant 1.000000e+00 : f32
    %58 = vector.broadcast %cst_26 : f32 to vector<4x32xf32>
    %59 = arith.divf %58, %57 : vector<4x32xf32>
    %60 = vector.extract_strided_slice %51 {offsets = [0, 32], sizes = [4, 32], strides = [1, 1]} : vector<4x128xf32> to vector<4x32xf32>
    %cst_27 = arith.constant 0.000000e+00 : f32
    %61 = vector.broadcast %cst_27 : f32 to vector<4x32xf32>
    %62 = arith.subf %61, %60 : vector<4x32xf32>
    %63 = math.exp %62 : vector<4x32xf32>
    %cst_28 = arith.constant 1.000000e+00 : f32
    %64 = vector.broadcast %cst_28 : f32 to vector<4x32xf32>
    %65 = arith.addf %64, %63 : vector<4x32xf32>
    %cst_29 = arith.constant 1.000000e+00 : f32
    %66 = vector.broadcast %cst_29 : f32 to vector<4x32xf32>
    %67 = arith.divf %66, %65 : vector<4x32xf32>
    %68 = vector.extract_strided_slice %51 {offsets = [0, 64], sizes = [4, 32], strides = [1, 1]} : vector<4x128xf32> to vector<4x32xf32>
    %69 = math.tanh %68 : vector<4x32xf32>
    %70 = vector.extract_strided_slice %51 {offsets = [0, 96], sizes = [4, 32], strides = [1, 1]} : vector<4x128xf32> to vector<4x32xf32>
    %cst_30 = arith.constant 0.000000e+00 : f32
    %71 = vector.broadcast %cst_30 : f32 to vector<4x32xf32>
    %72 = arith.subf %71, %70 : vector<4x32xf32>
    %73 = math.exp %72 : vector<4x32xf32>
    %cst_31 = arith.constant 1.000000e+00 : f32
    %74 = vector.broadcast %cst_31 : f32 to vector<4x32xf32>
    %75 = arith.addf %74, %73 : vector<4x32xf32>
    %cst_32 = arith.constant 1.000000e+00 : f32
    %76 = vector.broadcast %cst_32 : f32 to vector<4x32xf32>
    %77 = arith.divf %76, %75 : vector<4x32xf32>
    %78 = arith.mulf %67, %43 : vector<4x32xf32>
    %79 = arith.mulf %59, %69 : vector<4x32xf32>
    %80 = arith.addf %78, %79 : vector<4x32xf32>
    %81 = math.tanh %80 : vector<4x32xf32>
    %82 = arith.mulf %77, %81 : vector<4x32xf32>
    %83 = vector.shape_cast %82 : vector<4x32xf32> to vector<4x1x32xf32>
    %c0_33 = arith.constant 0 : index
    %c1 = arith.constant 1 : index
    %c0_34 = arith.constant 0 : index
    %84 = vector.load %arg5[%c0_33, %c1, %c0_34] : memref<4x8x32xf32, #tpu.memory_space<vmem>>, vector<4x1x32xf32>
    tpu.vector_store %arg5[%c0_33, %c1, %c0_34], %83 {strides = array<i32>} : memref<4x8x32xf32, #tpu.memory_space<vmem>>, vector<4x1x32xf32>,
    %85 = vector.extract_strided_slice %7 {offsets = [0, 2, 0], sizes = [4, 1, 128], strides = [1, 1, 1]} : vector<4x8x128xf32> to vector<4x1x128xf32>
    %86 = vector.shape_cast %85 : vector<4x1x128xf32> to vector<4x128xf32>
    %cst_35 = arith.constant dense<0.000000e+00> : vector<4x128xf32>
    %87 = tpu.matmul %82, %8, %cst_35 {dimension_numbers = #tpu.dot_dimension_numbers<[1], [0], [0], [1], [0, 0, 1, 1], [], []>} : vector<4x32xf32>, vector<32x128xf32>, vector<4x128xf32> -> vector<4x128xf32>
    %88 = arith.addf %86, %87 : vector<4x128xf32>
    %89 = vector.extract_strided_slice %88 {offsets = [0, 0], sizes = [4, 32], strides = [1, 1]} : vector<4x128xf32> to vector<4x32xf32>
    %cst_36 = arith.constant 0.000000e+00 : f32
    %90 = vector.broadcast %cst_36 : f32 to vector<4x32xf32>
    %91 = arith.subf %90, %89 : vector<4x32xf32>
    %92 = math.exp %91 : vector<4x32xf32>
    %cst_37 = arith.constant 1.000000e+00 : f32
    %93 = vector.broadcast %cst_37 : f32 to vector<4x32xf32>
    %94 = arith.addf %93, %92 : vector<4x32xf32>
    %cst_38 = arith.constant 1.000000e+00 : f32
    %95 = vector.broadcast %cst_38 : f32 to vector<4x32xf32>
    %96 = arith.divf %95, %94 : vector<4x32xf32>
    %97 = vector.extract_strided_slice %88 {offsets = [0, 32], sizes = [4, 32], strides = [1, 1]} : vector<4x128xf32> to vector<4x32xf32>
    %cst_39 = arith.constant 0.000000e+00 : f32
    %98 = vector.broadcast %cst_39 : f32 to vector<4x32xf32>
    %99 = arith.subf %98, %97 : vector<4x32xf32>
    %100 = math.exp %99 : vector<4x32xf32>
    %cst_40 = arith.constant 1.000000e+00 : f32
    %101 = vector.broadcast %cst_40 : f32 to vector<4x32xf32>
    %102 = arith.addf %101, %100 : vector<4x32xf32>
    %cst_41 = arith.constant 1.000000e+00 : f32
    %103 = vector.broadcast %cst_41 : f32 to vector<4x32xf32>
    %104 = arith.divf %103, %102 : vector<4x32xf32>
    %105 = vector.extract_strided_slice %88 {offsets = [0, 64], sizes = [4, 32], strides = [1, 1]} : vector<4x128xf32> to vector<4x32xf32>
    %106 = math.tanh %105 : vector<4x32xf32>
    %107 = vector.extract_strided_slice %88 {offsets = [0, 96], sizes = [4, 32], strides = [1, 1]} : vector<4x128xf32> to vector<4x32xf32>
    %cst_42 = arith.constant 0.000000e+00 : f32
    %108 = vector.broadcast %cst_42 : f32 to vector<4x32xf32>
    %109 = arith.subf %108, %107 : vector<4x32xf32>
    %110 = math.exp %109 : vector<4x32xf32>
    %cst_43 = arith.constant 1.000000e+00 : f32
    %111 = vector.broadcast %cst_43 : f32 to vector<4x32xf32>
    %112 = arith.addf %111, %110 : vector<4x32xf32>
    %cst_44 = arith.constant 1.000000e+00 : f32
    %113 = vector.broadcast %cst_44 : f32 to vector<4x32xf32>
    %114 = arith.divf %113, %112 : vector<4x32xf32>
    %115 = arith.mulf %104, %80 : vector<4x32xf32>
    %116 = arith.mulf %96, %106 : vector<4x32xf32>
    %117 = arith.addf %115, %116 : vector<4x32xf32>
    %118 = math.tanh %117 : vector<4x32xf32>
    %119 = arith.mulf %114, %118 : vector<4x32xf32>
    %120 = vector.shape_cast %119 : vector<4x32xf32> to vector<4x1x32xf32>
    %c0_45 = arith.constant 0 : index
    %c2 = arith.constant 2 : index
    %c0_46 = arith.constant 0 : index
    %121 = vector.load %arg5[%c0_45, %c2, %c0_46] : memref<4x8x32xf32, #tpu.memory_space<vmem>>, vector<4x1x32xf32>
    tpu.vector_store %arg5[%c0_45, %c2, %c0_46], %120 {strides = array<i32>} : memref<4x8x32xf32, #tpu.memory_space<vmem>>, vector<4x1x32xf32>,
    %122 = vector.extract_strided_slice %7 {offsets = [0, 3, 0], sizes = [4, 1, 128], strides = [1, 1, 1]} : vector<4x8x128xf32> to vector<4x1x128xf32>
    %123 = vector.shape_cast %122 : vector<4x1x128xf32> to vector<4x128xf32>
    %cst_47 = arith.constant dense<0.000000e+00> : vector<4x128xf32>
    %124 = tpu.matmul %119, %8, %cst_47 {dimension_numbers = #tpu.dot_dimension_numbers<[1], [0], [0], [1], [0, 0, 1, 1], [], []>} : vector<4x32xf32>, vector<32x128xf32>, vector<4x128xf32> -> vector<4x128xf32>
    %125 = arith.addf %123, %124 : vector<4x128xf32>
    %126 = vector.extract_strided_slice %125 {offsets = [0, 0], sizes = [4, 32], strides = [1, 1]} : vector<4x128xf32> to vector<4x32xf32>
    %cst_48 = arith.constant 0.000000e+00 : f32
    %127 = vector.broadcast %cst_48 : f32 to vector<4x32xf32>
    %128 = arith.subf %127, %126 : vector<4x32xf32>
    %129 = math.exp %128 : vector<4x32xf32>
    %cst_49 = arith.constant 1.000000e+00 : f32
    %130 = vector.broadcast %cst_49 : f32 to vector<4x32xf32>
    %131 = arith.addf %130, %129 : vector<4x32xf32>
    %cst_50 = arith.constant 1.000000e+00 : f32
    %132 = vector.broadcast %cst_50 : f32 to vector<4x32xf32>
    %133 = arith.divf %132, %131 : vector<4x32xf32>
    %134 = vector.extract_strided_slice %125 {offsets = [0, 32], sizes = [4, 32], strides = [1, 1]} : vector<4x128xf32> to vector<4x32xf32>
    %cst_51 = arith.constant 0.000000e+00 : f32
    %135 = vector.broadcast %cst_51 : f32 to vector<4x32xf32>
    %136 = arith.subf %135, %134 : vector<4x32xf32>
    %137 = math.exp %136 : vector<4x32xf32>
    %cst_52 = arith.constant 1.000000e+00 : f32
    %138 = vector.broadcast %cst_52 : f32 to vector<4x32xf32>
    %139 = arith.addf %138, %137 : vector<4x32xf32>
    %cst_53 = arith.constant 1.000000e+00 : f32
    %140 = vector.broadcast %cst_53 : f32 to vector<4x32xf32>
    %141 = arith.divf %140, %139 : vector<4x32xf32>
    %142 = vector.extract_strided_slice %125 {offsets = [0, 64], sizes = [4, 32], strides = [1, 1]} : vector<4x128xf32> to vector<4x32xf32>
    %143 = math.tanh %142 : vector<4x32xf32>
    %144 = vector.extract_strided_slice %125 {offsets = [0, 96], sizes = [4, 32], strides = [1, 1]} : vector<4x128xf32> to vector<4x32xf32>
    %cst_54 = arith.constant 0.000000e+00 : f32
    %145 = vector.broadcast %cst_54 : f32 to vector<4x32xf32>
    %146 = arith.subf %145, %144 : vector<4x32xf32>
    %147 = math.exp %146 : vector<4x32xf32>
    %cst_55 = arith.constant 1.000000e+00 : f32
    %148 = vector.broadcast %cst_55 : f32 to vector<4x32xf32>
    %149 = arith.addf %148, %147 : vector<4x32xf32>
    %cst_56 = arith.constant 1.000000e+00 : f32
    %150 = vector.broadcast %cst_56 : f32 to vector<4x32xf32>
    %151 = arith.divf %150, %149 : vector<4x32xf32>
    %152 = arith.mulf %141, %117 : vector<4x32xf32>
    %153 = arith.mulf %133, %143 : vector<4x32xf32>
    %154 = arith.addf %152, %153 : vector<4x32xf32>
    %155 = math.tanh %154 : vector<4x32xf32>
    %156 = arith.mulf %151, %155 : vector<4x32xf32>
    %157 = vector.shape_cast %156 : vector<4x32xf32> to vector<4x1x32xf32>
    %c0_57 = arith.constant 0 : index
    %c3 = arith.constant 3 : index
    %c0_58 = arith.constant 0 : index
    %158 = vector.load %arg5[%c0_57, %c3, %c0_58] : memref<4x8x32xf32, #tpu.memory_space<vmem>>, vector<4x1x32xf32>
    tpu.vector_store %arg5[%c0_57, %c3, %c0_58], %157 {strides = array<i32>} : memref<4x8x32xf32, #tpu.memory_space<vmem>>, vector<4x1x32xf32>,
    %159 = vector.extract_strided_slice %7 {offsets = [0, 4, 0], sizes = [4, 1, 128], strides = [1, 1, 1]} : vector<4x8x128xf32> to vector<4x1x128xf32>
    %160 = vector.shape_cast %159 : vector<4x1x128xf32> to vector<4x128xf32>
    %cst_59 = arith.constant dense<0.000000e+00> : vector<4x128xf32>
    %161 = tpu.matmul %156, %8, %cst_59 {dimension_numbers = #tpu.dot_dimension_numbers<[1], [0], [0], [1], [0, 0, 1, 1], [], []>} : vector<4x32xf32>, vector<32x128xf32>, vector<4x128xf32> -> vector<4x128xf32>
    %162 = arith.addf %160, %161 : vector<4x128xf32>
    %163 = vector.extract_strided_slice %162 {offsets = [0, 0], sizes = [4, 32], strides = [1, 1]} : vector<4x128xf32> to vector<4x32xf32>
    %cst_60 = arith.constant 0.000000e+00 : f32
    %164 = vector.broadcast %cst_60 : f32 to vector<4x32xf32>
    %165 = arith.subf %164, %163 : vector<4x32xf32>
    %166 = math.exp %165 : vector<4x32xf32>
    %cst_61 = arith.constant 1.000000e+00 : f32
    %167 = vector.broadcast %cst_61 : f32 to vector<4x32xf32>
    %168 = arith.addf %167, %166 : vector<4x32xf32>
    %cst_62 = arith.constant 1.000000e+00 : f32
    %169 = vector.broadcast %cst_62 : f32 to vector<4x32xf32>
    %170 = arith.divf %169, %168 : vector<4x32xf32>
    %171 = vector.extract_strided_slice %162 {offsets = [0, 32], sizes = [4, 32], strides = [1, 1]} : vector<4x128xf32> to vector<4x32xf32>
    %cst_63 = arith.constant 0.000000e+00 : f32
    %172 = vector.broadcast %cst_63 : f32 to vector<4x32xf32>
    %173 = arith.subf %172, %171 : vector<4x32xf32>
    %174 = math.exp %173 : vector<4x32xf32>
    %cst_64 = arith.constant 1.000000e+00 : f32
    %175 = vector.broadcast %cst_64 : f32 to vector<4x32xf32>
    %176 = arith.addf %175, %174 : vector<4x32xf32>
    %cst_65 = arith.constant 1.000000e+00 : f32
    %177 = vector.broadcast %cst_65 : f32 to vector<4x32xf32>
    %178 = arith.divf %177, %176 : vector<4x32xf32>
    %179 = vector.extract_strided_slice %162 {offsets = [0, 64], sizes = [4, 32], strides = [1, 1]} : vector<4x128xf32> to vector<4x32xf32>
    %180 = math.tanh %179 : vector<4x32xf32>
    %181 = vector.extract_strided_slice %162 {offsets = [0, 96], sizes = [4, 32], strides = [1, 1]} : vector<4x128xf32> to vector<4x32xf32>
    %cst_66 = arith.constant 0.000000e+00 : f32
    %182 = vector.broadcast %cst_66 : f32 to vector<4x32xf32>
    %183 = arith.subf %182, %181 : vector<4x32xf32>
    %184 = math.exp %183 : vector<4x32xf32>
    %cst_67 = arith.constant 1.000000e+00 : f32
    %185 = vector.broadcast %cst_67 : f32 to vector<4x32xf32>
    %186 = arith.addf %185, %184 : vector<4x32xf32>
    %cst_68 = arith.constant 1.000000e+00 : f32
    %187 = vector.broadcast %cst_68 : f32 to vector<4x32xf32>
    %188 = arith.divf %187, %186 : vector<4x32xf32>
    %189 = arith.mulf %178, %154 : vector<4x32xf32>
    %190 = arith.mulf %170, %180 : vector<4x32xf32>
    %191 = arith.addf %189, %190 : vector<4x32xf32>
    %192 = math.tanh %191 : vector<4x32xf32>
    %193 = arith.mulf %188, %192 : vector<4x32xf32>
    %194 = vector.shape_cast %193 : vector<4x32xf32> to vector<4x1x32xf32>
    %c0_69 = arith.constant 0 : index
    %c4 = arith.constant 4 : index
    %c0_70 = arith.constant 0 : index
    %195 = vector.load %arg5[%c0_69, %c4, %c0_70] : memref<4x8x32xf32, #tpu.memory_space<vmem>>, vector<4x1x32xf32>
    tpu.vector_store %arg5[%c0_69, %c4, %c0_70], %194 {strides = array<i32>} : memref<4x8x32xf32, #tpu.memory_space<vmem>>, vector<4x1x32xf32>,
    %196 = vector.extract_strided_slice %7 {offsets = [0, 5, 0], sizes = [4, 1, 128], strides = [1, 1, 1]} : vector<4x8x128xf32> to vector<4x1x128xf32>
    %197 = vector.shape_cast %196 : vector<4x1x128xf32> to vector<4x128xf32>
    %cst_71 = arith.constant dense<0.000000e+00> : vector<4x128xf32>
    %198 = tpu.matmul %193, %8, %cst_71 {dimension_numbers = #tpu.dot_dimension_numbers<[1], [0], [0], [1], [0, 0, 1, 1], [], []>} : vector<4x32xf32>, vector<32x128xf32>, vector<4x128xf32> -> vector<4x128xf32>
    %199 = arith.addf %197, %198 : vector<4x128xf32>
    %200 = vector.extract_strided_slice %199 {offsets = [0, 0], sizes = [4, 32], strides = [1, 1]} : vector<4x128xf32> to vector<4x32xf32>
    %cst_72 = arith.constant 0.000000e+00 : f32
    %201 = vector.broadcast %cst_72 : f32 to vector<4x32xf32>
    %202 = arith.subf %201, %200 : vector<4x32xf32>
    %203 = math.exp %202 : vector<4x32xf32>
    %cst_73 = arith.constant 1.000000e+00 : f32
    %204 = vector.broadcast %cst_73 : f32 to vector<4x32xf32>
    %205 = arith.addf %204, %203 : vector<4x32xf32>
    %cst_74 = arith.constant 1.000000e+00 : f32
    %206 = vector.broadcast %cst_74 : f32 to vector<4x32xf32>
    %207 = arith.divf %206, %205 : vector<4x32xf32>
    %208 = vector.extract_strided_slice %199 {offsets = [0, 32], sizes = [4, 32], strides = [1, 1]} : vector<4x128xf32> to vector<4x32xf32>
    %cst_75 = arith.constant 0.000000e+00 : f32
    %209 = vector.broadcast %cst_75 : f32 to vector<4x32xf32>
    %210 = arith.subf %209, %208 : vector<4x32xf32>
    %211 = math.exp %210 : vector<4x32xf32>
    %cst_76 = arith.constant 1.000000e+00 : f32
    %212 = vector.broadcast %cst_76 : f32 to vector<4x32xf32>
    %213 = arith.addf %212, %211 : vector<4x32xf32>
    %cst_77 = arith.constant 1.000000e+00 : f32
    %214 = vector.broadcast %cst_77 : f32 to vector<4x32xf32>
    %215 = arith.divf %214, %213 : vector<4x32xf32>
    %216 = vector.extract_strided_slice %199 {offsets = [0, 64], sizes = [4, 32], strides = [1, 1]} : vector<4x128xf32> to vector<4x32xf32>
    %217 = math.tanh %216 : vector<4x32xf32>
    %218 = vector.extract_strided_slice %199 {offsets = [0, 96], sizes = [4, 32], strides = [1, 1]} : vector<4x128xf32> to vector<4x32xf32>
    %cst_78 = arith.constant 0.000000e+00 : f32
    %219 = vector.broadcast %cst_78 : f32 to vector<4x32xf32>
    %220 = arith.subf %219, %218 : vector<4x32xf32>
    %221 = math.exp %220 : vector<4x32xf32>
    %cst_79 = arith.constant 1.000000e+00 : f32
    %222 = vector.broadcast %cst_79 : f32 to vector<4x32xf32>
    %223 = arith.addf %222, %221 : vector<4x32xf32>
    %cst_80 = arith.constant 1.000000e+00 : f32
    %224 = vector.broadcast %cst_80 : f32 to vector<4x32xf32>
    %225 = arith.divf %224, %223 : vector<4x32xf32>
    %226 = arith.mulf %215, %191 : vector<4x32xf32>
    %227 = arith.mulf %207, %217 : vector<4x32xf32>
    %228 = arith.addf %226, %227 : vector<4x32xf32>
    %229 = math.tanh %228 : vector<4x32xf32>
    %230 = arith.mulf %225, %229 : vector<4x32xf32>
    %231 = vector.shape_cast %230 : vector<4x32xf32> to vector<4x1x32xf32>
    %c0_81 = arith.constant 0 : index
    %c5 = arith.constant 5 : index
    %c0_82 = arith.constant 0 : index
    %232 = vector.load %arg5[%c0_81, %c5, %c0_82] : memref<4x8x32xf32, #tpu.memory_space<vmem>>, vector<4x1x32xf32>
    tpu.vector_store %arg5[%c0_81, %c5, %c0_82], %231 {strides = array<i32>} : memref<4x8x32xf32, #tpu.memory_space<vmem>>, vector<4x1x32xf32>,
    %233 = vector.extract_strided_slice %7 {offsets = [0, 6, 0], sizes = [4, 1, 128], strides = [1, 1, 1]} : vector<4x8x128xf32> to vector<4x1x128xf32>
    %234 = vector.shape_cast %233 : vector<4x1x128xf32> to vector<4x128xf32>
    %cst_83 = arith.constant dense<0.000000e+00> : vector<4x128xf32>
    %235 = tpu.matmul %230, %8, %cst_83 {dimension_numbers = #tpu.dot_dimension_numbers<[1], [0], [0], [1], [0, 0, 1, 1], [], []>} : vector<4x32xf32>, vector<32x128xf32>, vector<4x128xf32> -> vector<4x128xf32>
    %236 = arith.addf %234, %235 : vector<4x128xf32>
    %237 = vector.extract_strided_slice %236 {offsets = [0, 0], sizes = [4, 32], strides = [1, 1]} : vector<4x128xf32> to vector<4x32xf32>
    %cst_84 = arith.constant 0.000000e+00 : f32
    %238 = vector.broadcast %cst_84 : f32 to vector<4x32xf32>
    %239 = arith.subf %238, %237 : vector<4x32xf32>
    %240 = math.exp %239 : vector<4x32xf32>
    %cst_85 = arith.constant 1.000000e+00 : f32
    %241 = vector.broadcast %cst_85 : f32 to vector<4x32xf32>
    %242 = arith.addf %241, %240 : vector<4x32xf32>
    %cst_86 = arith.constant 1.000000e+00 : f32
    %243 = vector.broadcast %cst_86 : f32 to vector<4x32xf32>
    %244 = arith.divf %243, %242 : vector<4x32xf32>
    %245 = vector.extract_strided_slice %236 {offsets = [0, 32], sizes = [4, 32], strides = [1, 1]} : vector<4x128xf32> to vector<4x32xf32>
    %cst_87 = arith.constant 0.000000e+00 : f32
    %246 = vector.broadcast %cst_87 : f32 to vector<4x32xf32>
    %247 = arith.subf %246, %245 : vector<4x32xf32>
    %248 = math.exp %247 : vector<4x32xf32>
    %cst_88 = arith.constant 1.000000e+00 : f32
    %249 = vector.broadcast %cst_88 : f32 to vector<4x32xf32>
    %250 = arith.addf %249, %248 : vector<4x32xf32>
    %cst_89 = arith.constant 1.000000e+00 : f32
    %251 = vector.broadcast %cst_89 : f32 to vector<4x32xf32>
    %252 = arith.divf %251, %250 : vector<4x32xf32>
    %253 = vector.extract_strided_slice %236 {offsets = [0, 64], sizes = [4, 32], strides = [1, 1]} : vector<4x128xf32> to vector<4x32xf32>
    %254 = math.tanh %253 : vector<4x32xf32>
    %255 = vector.extract_strided_slice %236 {offsets = [0, 96], sizes = [4, 32], strides = [1, 1]} : vector<4x128xf32> to vector<4x32xf32>
    %cst_90 = arith.constant 0.000000e+00 : f32
    %256 = vector.broadcast %cst_90 : f32 to vector<4x32xf32>
    %257 = arith.subf %256, %255 : vector<4x32xf32>
    %258 = math.exp %257 : vector<4x32xf32>
    %cst_91 = arith.constant 1.000000e+00 : f32
    %259 = vector.broadcast %cst_91 : f32 to vector<4x32xf32>
    %260 = arith.addf %259, %258 : vector<4x32xf32>
    %cst_92 = arith.constant 1.000000e+00 : f32
    %261 = vector.broadcast %cst_92 : f32 to vector<4x32xf32>
    %262 = arith.divf %261, %260 : vector<4x32xf32>
    %263 = arith.mulf %252, %228 : vector<4x32xf32>
    %264 = arith.mulf %244, %254 : vector<4x32xf32>
    %265 = arith.addf %263, %264 : vector<4x32xf32>
    %266 = math.tanh %265 : vector<4x32xf32>
    %267 = arith.mulf %262, %266 : vector<4x32xf32>
    %268 = vector.shape_cast %267 : vector<4x32xf32> to vector<4x1x32xf32>
    %c0_93 = arith.constant 0 : index
    %c6 = arith.constant 6 : index
    %c0_94 = arith.constant 0 : index
    %269 = vector.load %arg5[%c0_93, %c6, %c0_94] : memref<4x8x32xf32, #tpu.memory_space<vmem>>, vector<4x1x32xf32>
    tpu.vector_store %arg5[%c0_93, %c6, %c0_94], %268 {strides = array<i32>} : memref<4x8x32xf32, #tpu.memory_space<vmem>>, vector<4x1x32xf32>,
    %270 = vector.extract_strided_slice %7 {offsets = [0, 7, 0], sizes = [4, 1, 128], strides = [1, 1, 1]} : vector<4x8x128xf32> to vector<4x1x128xf32>
    %271 = vector.shape_cast %270 : vector<4x1x128xf32> to vector<4x128xf32>
    %cst_95 = arith.constant dense<0.000000e+00> : vector<4x128xf32>
    %272 = tpu.matmul %267, %8, %cst_95 {dimension_numbers = #tpu.dot_dimension_numbers<[1], [0], [0], [1], [0, 0, 1, 1], [], []>} : vector<4x32xf32>, vector<32x128xf32>, vector<4x128xf32> -> vector<4x128xf32>
    %273 = arith.addf %271, %272 : vector<4x128xf32>
    %274 = vector.extract_strided_slice %273 {offsets = [0, 0], sizes = [4, 32], strides = [1, 1]} : vector<4x128xf32> to vector<4x32xf32>
    %cst_96 = arith.constant 0.000000e+00 : f32
    %275 = vector.broadcast %cst_96 : f32 to vector<4x32xf32>
    %276 = arith.subf %275, %274 : vector<4x32xf32>
    %277 = math.exp %276 : vector<4x32xf32>
    %cst_97 = arith.constant 1.000000e+00 : f32
    %278 = vector.broadcast %cst_97 : f32 to vector<4x32xf32>
    %279 = arith.addf %278, %277 : vector<4x32xf32>
    %cst_98 = arith.constant 1.000000e+00 : f32
    %280 = vector.broadcast %cst_98 : f32 to vector<4x32xf32>
    %281 = arith.divf %280, %279 : vector<4x32xf32>
    %282 = vector.extract_strided_slice %273 {offsets = [0, 32], sizes = [4, 32], strides = [1, 1]} : vector<4x128xf32> to vector<4x32xf32>
    %cst_99 = arith.constant 0.000000e+00 : f32
    %283 = vector.broadcast %cst_99 : f32 to vector<4x32xf32>
    %284 = arith.subf %283, %282 : vector<4x32xf32>
    %285 = math.exp %284 : vector<4x32xf32>
    %cst_100 = arith.constant 1.000000e+00 : f32
    %286 = vector.broadcast %cst_100 : f32 to vector<4x32xf32>
    %287 = arith.addf %286, %285 : vector<4x32xf32>
    %cst_101 = arith.constant 1.000000e+00 : f32
    %288 = vector.broadcast %cst_101 : f32 to vector<4x32xf32>
    %289 = arith.divf %288, %287 : vector<4x32xf32>
    %290 = vector.extract_strided_slice %273 {offsets = [0, 64], sizes = [4, 32], strides = [1, 1]} : vector<4x128xf32> to vector<4x32xf32>
    %291 = math.tanh %290 : vector<4x32xf32>
    %292 = vector.extract_strided_slice %273 {offsets = [0, 96], sizes = [4, 32], strides = [1, 1]} : vector<4x128xf32> to vector<4x32xf32>
    %cst_102 = arith.constant 0.000000e+00 : f32
    %293 = vector.broadcast %cst_102 : f32 to vector<4x32xf32>
    %294 = arith.subf %293, %292 : vector<4x32xf32>
    %295 = math.exp %294 : vector<4x32xf32>
    %cst_103 = arith.constant 1.000000e+00 : f32
    %296 = vector.broadcast %cst_103 : f32 to vector<4x32xf32>
    %297 = arith.addf %296, %295 : vector<4x32xf32>
    %cst_104 = arith.constant 1.000000e+00 : f32
    %298 = vector.broadcast %cst_104 : f32 to vector<4x32xf32>
    %299 = arith.divf %298, %297 : vector<4x32xf32>
    %300 = arith.mulf %289, %265 : vector<4x32xf32>
    %301 = arith.mulf %281, %291 : vector<4x32xf32>
    %302 = arith.addf %300, %301 : vector<4x32xf32>
    %303 = math.tanh %302 : vector<4x32xf32>
    %304 = arith.mulf %299, %303 : vector<4x32xf32>
    %305 = vector.shape_cast %304 : vector<4x32xf32> to vector<4x1x32xf32>
    %c0_105 = arith.constant 0 : index
    %c7 = arith.constant 7 : index
    %c0_106 = arith.constant 0 : index
    %306 = vector.load %arg5[%c0_105, %c7, %c0_106] : memref<4x8x32xf32, #tpu.memory_space<vmem>>, vector<4x1x32xf32>
    tpu.vector_store %arg5[%c0_105, %c7, %c0_106], %305 {strides = array<i32>} : memref<4x8x32xf32, #tpu.memory_space<vmem>>, vector<4x1x32xf32>,
    return
  }
  func.func @transform_0(%arg0: i32) -> (i32, i32, i32) {
    %c0_i32 = arith.constant 0 : i32
    %c0_i32_0 = arith.constant 0 : i32
    %c0_i32_1 = arith.constant 0 : i32
    %c0_i32_2 = arith.constant 0 : i32
    return %c0_i32, %c0_i32_0, %c0_i32_1 : i32, i32, i32
  }
  func.func @transform_1(%arg0: i32) -> (i32, i32) {
    %c0_i32 = arith.constant 0 : i32
    %c0_i32_0 = arith.constant 0 : i32
    %c0_i32_1 = arith.constant 0 : i32
    return %c0_i32, %c0_i32_0 : i32, i32
  }
  func.func @transform_2(%arg0: i32) -> (i32, i32) {
    %c0_i32 = arith.constant 0 : i32
    %c0_i32_0 = arith.constant 0 : i32
    %c0_i32_1 = arith.constant 0 : i32
    return %c0_i32, %c0_i32_0 : i32, i32
  }
  func.func @transform_3(%arg0: i32) -> (i32, i32) {
    %c0_i32 = arith.constant 0 : i32
    %c0_i32_0 = arith.constant 0 : i32
    %c0_i32_1 = arith.constant 0 : i32
    return %c0_i32, %c0_i32_0 : i32, i32
  }
  func.func @transform_4(%arg0: i32) -> (i32, i32, i32) {
    %c0_i32 = arith.constant 0 : i32
    %c0_i32_0 = arith.constant 0 : i32
    %c0_i32_1 = arith.constant 0 : i32
    %c0_i32_2 = arith.constant 0 : i32
    return %c0_i32, %c0_i32_0, %c0_i32_1 : i32, i32, i32
  }
}

</mosaic_0001>

<bundles_post_ra>
// kernel: fp_sam_encoder.3
= control target key start
LH: loop header
LB: loop body
LE: loop exit
PB: predicated region body
PF: predicated region fallthrough
CT: control target
= control target key end

     0   :  { %vm29_vm0 = vcmask 64512   ;;  %v2357_v0 = vmov 0.0|0.0   ;;  %vm2358_vm1 = vmmov 0   ;;  %v2359_v4 = vmov 0.0   ;;  %s2361_s6 = smov 32   ;;  %s3021_s1 = inlined_call_operand.vmem [shape: f32[8,128], index: 1, kind: input, shape index: {}]   ;;  %s3022_s2 = inlined_call_operand.vmem [shape: f32[32,128], index: 2, kind: input, shape index: {}]   ;;  %s3023_s0 = inlined_call_operand.vmem [shape: f32[4,8,8], index: 0, kind: input, shape index: {}]   ;;  %s3024_s3 = inlined_call_operand.vmem [shape: f32[1,128], index: 3, kind: input, shape index: {}]   ;;  %s3025_s4 = inlined_call_operand.vmem [shape: f32[4,8,32], index: 4, kind: output, shape index: {}]  }
   0x1   :  { %2048 = vmatprep.subr.bf16.mxu1 %v2357_v0  ;;  %v21_v1 = vld [vmem:[%s3021_s1] sm:$0xff]  ;;  %v128_v3 = vld [vmem:[%s3022_s2 + $0x8] sm:$0xff]  ;;  %1968 = vmatprep.mubr.msk.f32.mxu1 %vm2358_vm1, %v2359_v4  ;;  %v129_v8 = vld [vmem:[%s3022_s2 + $0x10] sm:$0xff]  ;;  %vm335_vm2 = vcmask 1041409   ;;  %vm338_vm3 = vcmask 1042434   ;;  %vm341_vm4 = vcmask 1043459  }
   0x2   :  { %v127_v2 = vld [vmem:[%s3022_s2] sm:$0xff]  ;;  %1952 = vmatprep.subr.mxu0 %v21_v1  ;;  %v18_v7 = vld [vmem:[%s3023_s0 + $0x8] sm:$0xff]  ;;  %v130_v9 = vld [vmem:[%s3022_s2 + $0x18] sm:$0xff]  ;;  %vm131_vm5 = vcmask 261120   ;;  %vm329_vm6 = vcmask 253952   ;;  %vm553_vm7 = vcmask 254977  }
   0x3   :  { %v2399_v5 = vpack.c.bf16 %v128_v3, %v127_v2  ;;  %v17_v6 = vld [vmem:[%s3023_s0] sm:$0xff]  ;;  %1953 = vmatpush3.msra.mxu0 %v21_v1  ;;  %v19_v10 = vld [vmem:[%s3023_s0 + $0x10] sm:$0xff]  ;;  %v2419_v11 = vpack.c.bf16 %v130_v9, %v129_v8  ;;  %v20_v12 = vld [vmem:[%s3023_s0 + $0x18] sm:$0xff]  ;;  %vm774_vm8 = vcmask 256002   ;;  %vm995_vm9 = vcmask 257027  }
   0x4   :  { %1954 = vmatprep.mubr.msk.f32.mxu0 %vm29_vm0, %v17_v6  ;;  %2054 = vmatprep.subr.bf16.mxu0 %v2357_v0  ;;  %v1895_v14 = vld [vmem:[%s3024_s3] ss:$0 sm:$0xff]  ;;  %s2360_s3 = smov 64   ;;  %vm1217_vm10 = vcmask 258052   ;;  %vm1440_vm11 = vcmask 259077   ;;  %vm1663_vm12 = vcmask 260102  }
   0x5   :  { %2050 = vmatpush3.bf16.msra.mxu1 %v2399_v5  ;;  %1955 = vmatmul.mubr.msk.f32.vlgmr.msra.gmra.mrb[0].mxu0 %vm29_vm0, %v18_v7  ;;  %vm1886_vm13 = vcmask 261127  }
   0x6   :  { %2051 = vmatprep.subr.bf16.mxu1 %v2357_v0  ;;  %1957 = vmatprep.mubr.msk.f32.mxu0 %vm29_vm0, %v19_v10 }
   0x7   :  { %2056 = vmatpush3.bf16.msra.mxu0 %v2399_v5 }
   0x8   :  { %2057 = vmatprep.subr.bf16.mxu0 %v2357_v0 }
   0x9   :  { %2053 = vmatpush3.bf16.msra.mxu1 %v2419_v11  ;;  %1958 = vmatmul.mubr.msk.f32.gmra.mrb[2].mxu0 %vm29_vm0, %v20_v12 }
   0xa   :  { %1979 = vmatprep.mubr.msk.f32.mxu0 %vm2358_vm1, %v2359_v4  ;;  %2060 = vmatprep.subr.bf16.mxu1 %v2357_v0 }
   0xb   :  { %2059 = vmatpush3.bf16.msra.mxu0 %v2419_v11 }
   0xc   :  { %1969 = vmatmul.mubr.f32.vlgmr.msra.gmra.mrb[0].mxu1 %v2359_v4  ;;  %2066 = vmatprep.subr.bf16.mxu0 %v2357_v0 }
   0xd   :  { %2062 = vmatpush3.bf16.msra.mxu1 %v2399_v5  ;;  %1990 = vmatprep.mubr.msk.f32.mxu1 %vm2358_vm1, %v2359_v4 }
   0xe   :  { %2063 = vmatprep.subr.bf16.mxu1 %v2357_v0 }
  0x11   :  { %2065 = vmatpush3.bf16.msra.mxu1 %v2419_v11 }
  0x12   :  { %2072 = vmatprep.subr.bf16.mxu1 %v2357_v0 }
  0xd8   :  { %v1956_v13 = vpop.f32.mrb[0].mxu0 }
  0xd9   :  { %v108_v15 = vpop.f32.mrb[1].mxu0  ;;  %v2448_v19 = vadd.f32 %v1956_v13, %v1895_v14 }
  0xda   :  { %v2446_v16 = vadd.f32 %v1895_v14, %v108_v15 }
  0xdc   :  { %v1959_v17 = vpop.f32.mrb[2].mxu0 }
  0xdd   :  { %v118_v18 = vpop.f32.mrb[3].mxu0  ;;  %v2454_v27 = vadd.f32 %v1959_v17, %v1895_v14 }
  0xde   :  { %v2451_v24 = vadd.f32 %v1895_v14, %v118_v18 }
  0xdf   :  { %v201_v20 = vpop.f32.mrb[0].mxu1 }
  0xe0   :  { %v206_v21 = vrot.slane %v201_v20, 1  ;;  %v213_v22 = vadd.f32 %v201_v20, %v2446_v16  ;;  %v1970_v23 = vpop.f32.mrb[1].mxu1  ;;  %v207_v25 = vrot.slane %v201_v20, 2  ;;  %v208_v28 = vrot.slane %v201_v20, 3 }
  0xe2   :  { %v214_v26 = vadd.f32 %v206_v21, %v2448_v19  ;;  %2101 = vtanh.f32 %v213_v22  ;;  %v215_v29 = vadd.f32 %v207_v25, %v2451_v24  ;;  %v216_v30 = vadd.f32 %v208_v28, %v2454_v27 }
  0xe3   :  { %v217_v36 = vsub.f32 0.0, %v213_v22 }
  0xe4   :  { %2103 = vtanh.f32 %v214_v26  ;;  %v218_v35 = vsub.f32 0.0, %v214_v26  ;;  %v219_v37 = vsub.f32 0.0, %v215_v29  ;;  %v220_v40 = vsub.f32 0.0, %v216_v30 }
  0xe5   :  { %2105 = vtanh.f32 %v215_v29  ;;  %v221_v39 = vmul.f32 1.442695, %v217_v36 }
  0xe6   :  { %2107 = vtanh.f32 %v216_v30  ;;  %v223_v38 = vmul.f32 1.442695, %v218_v35  ;;  %v225_v41 = vmul.f32 1.442695, %v219_v37  ;;  %v227_v42 = vmul.f32 1.442695, %v220_v40 }
  0xe8   :  { %2109 = vpow2.f32 %v223_v38 }
  0xe9   :  { %2111 = vpow2.f32 %v221_v39 }
  0xea   :  { %2113 = vpow2.f32 %v225_v41 }
  0xeb   :  { %2115 = vpow2.f32 %v227_v42 }
  0xec   :  { %v2102_v31 = vpop.eup %2101 }
  0xed   :  { %253 = vrot.lane.b32.xlu1 %v2102_v31, %s2360_s3 }
  0xee   :  { %v2104_v32 = vpop.eup %2103 }
  0xef   :  { %255 = vrot.lane.b32.xlu0 %v2104_v32, %s2360_s3  ;;  %v2106_v33 = vpop.eup %2105 }
  0xf0   :  { %v2108_v34 = vpop.eup %2107 }
  0xf1   :  { %259 = vrot.lane.b32.xlu1 %v2108_v34, %s2360_s3 }
  0xf2   :  { %v2110_v43 = vpop.eup %2109 }
  0xf3   :  { %257 = vrot.lane.b32.xlu0 %v2106_v33, %s2360_s3  ;;  %v2112_v44 = vpop.eup %2111  ;;  %v230_v45 = vadd.f32 1.0, %v2110_v43 }
  0xf4   :  { %v2114_v46 = vpop.eup %2113  ;;  %v229_v47 = vadd.f32 1.0, %v2112_v44 }
  0xf5   :  { %v231_v48 = vadd.f32 1.0, %v2114_v46  ;;  %2117 = vrcp.f32 %v230_v45  ;;  %v2116_v49 = vpop.eup %2115 }
  0xf6   :  { %2119 = vrcp.f32 %v229_v47  ;;  %v232_v50 = vadd.f32 1.0, %v2116_v49 }
  0xf7   :  { %2121 = vrcp.f32 %v231_v48 }
  0xf8   :  { %2123 = vrcp.f32 %v232_v50 }
  0xff   :  { %v2118_v51 = vpop.eup %2117 }
 0x100   :  { %v2120_v55 = vpop.eup %2119  ;;  %v246_v63 = vmul.f32 0.0, %v2118_v51 }
 0x101   :  { %v2122_v56 = vpop.eup %2121  ;;  %v245_v6 = vmul.f32 0.0, %v2120_v55 }
 0x102   :  { %v2124_v61 = vpop.eup %2123  ;;  %v247_v3 = vmul.f32 0.0, %v2122_v56 }
 0x103   :  { %v248_v12 = vmul.f32 0.0, %v2124_v61 }
 0x15f   :  { %v254_v52 = vpop.permute.xlu1 %253 }
 0x160   :  { %v265_v58 = vmul.f32 %v2120_v55, %v254_v52 }
 0x161   :  { %v256_v53 = vpop.permute.xlu0 %255 }
 0x162   :  { %v266_v54 = vmul.f32 %v2118_v51, %v256_v53 }
 0x163   :  { %v260_v60 = vpop.permute.xlu1 %259 }
 0x164   :  { %275 = vrot.lane.b32.xlu0 %v266_v54, %s2361_s6  ;;  %v268_v62 = vmul.f32 %v2124_v61, %v260_v60 }
 0x165   :  { %v258_v57 = vpop.permute.xlu0 %257 }
 0x166   :  { %v267_v59 = vmul.f32 %v2122_v56, %v258_v57 }
 0x168   :  { %277 = vrot.lane.b32.xlu1 %v267_v59, %s2361_s6  ;;  %273 = vrot.lane.b32.xlu0 %v265_v58, %s2361_s6 }
 0x16c   :  { %279 = vrot.lane.b32.xlu1 %v268_v62, %s2361_s6 }
 0x1d6   :  { %v276_v1 = vpop.permute.xlu0 %275 }
 0x1d7   :  { %v2466_v2 = vadd.f32 %v276_v1, %v246_v63 }
 0x1d9   :  { %2125 = vtanh.f32 %v2466_v2 }
 0x1da   :  { %v278_v7 = vpop.permute.xlu1 %277  ;;  %v274_v8 = vpop.permute.xlu0 %273 }
 0x1db   :  { %v2469_v9 = vadd.f32 %v278_v7, %v247_v3  ;;  %v2471_v10 = vadd.f32 %v274_v8, %v245_v6 }
 0x1dd   :  { %2127 = vtanh.f32 %v2469_v9 }
 0x1de   :  { %2129 = vtanh.f32 %v2471_v10  ;;  %v280_v13 = vpop.permute.xlu1 %279 }
 0x1df   :  { %v2475_v14 = vadd.f32 %v280_v13, %v248_v12 }
 0x1e1   :  { %2131 = vtanh.f32 %v2475_v14 }
 0x1e3   :  { %v2126_v15 = vpop.eup %2125 }
 0x1e4   :  { %299 = vrot.lane.b32.xlu0 %v2126_v15, %s2360_s3 }
 0x1e7   :  { %v2128_v17 = vpop.eup %2127 }
 0x1e8   :  { %v2130_v18 = vpop.eup %2129  ;;  %301 = vrot.lane.b32.xlu1 %v2128_v17, %s2360_s3 }
 0x1e9   :  { %297 = vrot.lane.b32.xlu0 %v2130_v18, %s2360_s3 }
 0x1eb   :  { %v2132_v20 = vpop.eup %2131 }
 0x1ec   :  { %303 = vrot.lane.b32.xlu1 %v2132_v20, %s2360_s3 }
 0x256   :  { %v300_v21 = vpop.permute.xlu0 %299 }
 0x257   :  { %v2482_v22 = vmul.f32 %v2118_v51, %v300_v21 }
 0x259   :  { %v334_v29 = vrot.slane %v2482_v22, 7 }
 0x25a   :  { %v302_v23 = vpop.permute.xlu1 %301 }
 0x25b   :  { %v2484_v25 = vmul.f32 %v2122_v56, %v302_v23  ;;  %v298_v26 = vpop.permute.xlu0 %297 }
 0x25c   :  { %v2486_v28 = vmul.f32 %v2120_v55, %v298_v26 }
 0x25d   :  { %v337_v30 = vrot.slane %v2484_v25, 6 }
 0x25e   :  { %v304_v31 = vpop.permute.xlu1 %303  ;;  %v336_v33 = vsel %vm335_vm2, %v334_v29, %v2486_v28 }
 0x25f   :  { %v2490_v32 = vmul.f32 %v2124_v61, %v304_v31  ;;  %v339_v35 = vsel %vm338_vm3, %v337_v30, %v336_v33  ;;  %v461_v30 = vrot.slane %v2471_v10, 7  ;;  %v463_v31 = vrot.slane %v2469_v9, 7 }
 0x261   :  { %v340_v34 = vrot.slane %v2490_v32, 5 }
 0x263   :  { %v342_v36 = vsel %vm341_vm4, %v340_v34, %v339_v35  ;;  %v462_v35 = vrot.slane %v2466_v2, 7 }
 0x264   :  { %343 = vrot.lane.b32.xlu0 %v342_v36, %s2361_s6 }
 0x2d6   :  { %v344_v37 = vpop.permute.xlu0 %343 }
 0x2d7   :  { %1980 = vmatmul.mubr.msk.f32.vlgmr.msra.gmra.mrb[4].mxu0 %vm131_vm5, %v344_v37 }
 0x2d8   :  { %2068 = vmatpush3.bf16.msra.mxu0 %v2399_v5  ;;  %2001 = vmatprep.mubr.msk.f32.mxu0 %vm2358_vm1, %v2359_v4 }
 0x2d9   :  { %2069 = vmatprep.subr.bf16.mxu0 %v2357_v0 }
 0x2dc   :  { %2071 = vmatpush3.bf16.msra.mxu0 %v2419_v11 }
 0x2dd   :  { %2078 = vmatprep.subr.bf16.mxu0 %v2357_v0 }
 0x3aa   :  { %v413_v38 = vpop.f32.mrb[4].mxu0 }
 0x3ab   :  { %v418_v39 = vrot.slane %v413_v38, 7  ;;  %v419_v40 = vrot.slane %v413_v38, 1  ;;  %v1981_v41 = vpop.f32.mrb[5].mxu0  ;;  %v420_v43 = vrot.slane %v413_v38, 2  ;;  %v426_v45 = vadd.f32 %v413_v38, %v2448_v19 }
 0x3ad   :  { %v425_v42 = vadd.f32 %v418_v39, %v2446_v16  ;;  %v427_v44 = vadd.f32 %v419_v40, %v2451_v24  ;;  %v428_v46 = vadd.f32 %v420_v43, %v2454_v27  ;;  %v430_v53 = vsub.f32 0.0, %v426_v45 }
 0x3ae   :  { %v464_v39 = vrot.slane %v2475_v14, 7 }
 0x3af   :  { %2133 = vtanh.f32 %v425_v42  ;;  %v429_v51 = vsub.f32 0.0, %v425_v42  ;;  %v431_v52 = vsub.f32 0.0, %v427_v44  ;;  %v432_v55 = vsub.f32 0.0, %v428_v46 }
 0x3b0   :  { %2135 = vtanh.f32 %v427_v44  ;;  %v435_v57 = vmul.f32 1.442695, %v430_v53 }
 0x3b1   :  { %2137 = vtanh.f32 %v426_v45  ;;  %v433_v54 = vmul.f32 1.442695, %v429_v51  ;;  %v437_v56 = vmul.f32 1.442695, %v431_v52  ;;  %v439_v58 = vmul.f32 1.442695, %v432_v55 }
 0x3b2   :  { %2139 = vtanh.f32 %v428_v46 }
 0x3b3   :  { %2141 = vpow2.f32 %v433_v54 }
 0x3b4   :  { %2143 = vpow2.f32 %v437_v56 }
 0x3b5   :  { %2145 = vpow2.f32 %v435_v57 }
 0x3b6   :  { %2147 = vpow2.f32 %v439_v58 }
 0x3b9   :  { %v2134_v47 = vpop.eup %2133 }
 0x3ba   :  { %477 = vrot.lane.b32.xlu1 %v2134_v47, %s2360_s3  ;;  %v2136_v48 = vpop.eup %2135 }
 0x3bb   :  { %481 = vrot.lane.b32.xlu0 %v2136_v48, %s2360_s3  ;;  %v2138_v49 = vpop.eup %2137 }
 0x3bc   :  { %v2140_v50 = vpop.eup %2139 }
 0x3bd   :  { %v2142_v59 = vpop.eup %2141 }
 0x3be   :  { %479 = vrot.lane.b32.xlu1 %v2138_v49, %s2360_s3  ;;  %v2144_v60 = vpop.eup %2143  ;;  %v441_v61 = vadd.f32 1.0, %v2142_v59 }
 0x3bf   :  { %483 = vrot.lane.b32.xlu0 %v2140_v50, %s2360_s3  ;;  %v2146_v62 = vpop.eup %2145  ;;  %v443_v63 = vadd.f32 1.0, %v2144_v60 }
 0x3c0   :  { %v2148_v1 = vpop.eup %2147  ;;  %v442_v3 = vadd.f32 1.0, %v2146_v62  ;;  %2149 = vrcp.f32 %v441_v61 }
 0x3c1   :  { %v444_v6 = vadd.f32 1.0, %v2148_v1  ;;  %2151 = vrcp.f32 %v443_v63 }
 0x3c2   :  { %2153 = vrcp.f32 %v442_v3 }
 0x3c3   :  { %2155 = vrcp.f32 %v444_v6 }
 0x3ca   :  { %v2150_v7 = vpop.eup %2149 }
 0x3cb   :  { %v2152_v13 = vpop.eup %2151  ;;  %v469_v33 = vmul.f32 %v2150_v7, %v461_v30 }
 0x3cc   :  { %v2154_v18 = vpop.eup %2153  ;;  %v471_v36 = vmul.f32 %v2152_v13, %v463_v31 }
 0x3cd   :  { %v2156_v23 = vpop.eup %2155  ;;  %v470_v41 = vmul.f32 %v2154_v18, %v462_v35 }
 0x3ce   :  { %v472_v10 = vmul.f32 %v2156_v23, %v464_v39 }
 0x42c   :  { %v478_v8 = vpop.permute.xlu1 %477 }
 0x42d   :  { %v489_v12 = vmul.f32 %v2150_v7, %v478_v8  ;;  %v482_v15 = vpop.permute.xlu0 %481 }
 0x42e   :  { %v491_v17 = vmul.f32 %v2152_v13, %v482_v15 }
 0x42f   :  { %497 = vrot.lane.b32.xlu1 %v489_v12, %s2361_s6 }
 0x430   :  { %v480_v20 = vpop.permute.xlu1 %479  ;;  %501 = vrot.lane.b32.xlu0 %v491_v17, %s2361_s6 }
 0x431   :  { %v490_v21 = vmul.f32 %v2154_v18, %v480_v20  ;;  %v484_v26 = vpop.permute.xlu0 %483 }
 0x432   :  { %v492_v29 = vmul.f32 %v2156_v23, %v484_v26 }
 0x433   :  { %499 = vrot.lane.b32.xlu1 %v490_v21, %s2361_s6 }
 0x434   :  { %503 = vrot.lane.b32.xlu0 %v492_v29, %s2361_s6 }
 0x4a1   :  { %v498_v34 = vpop.permute.xlu1 %497 }
 0x4a2   :  { %v2520_v37 = vadd.f32 %v498_v34, %v469_v33  ;;  %v502_v38 = vpop.permute.xlu0 %501 }
 0x4a3   :  { %v2523_v40 = vadd.f32 %v502_v38, %v471_v36 }
 0x4a4   :  { %2157 = vtanh.f32 %v2520_v37 }
 0x4a5   :  { %v500_v42 = vpop.permute.xlu1 %499  ;;  %2159 = vtanh.f32 %v2523_v40 }
 0x4a6   :  { %v2527_v9 = vadd.f32 %v500_v42, %v470_v41  ;;  %v504_v43 = vpop.permute.xlu0 %503 }
 0x4a7   :  { %v2529_v44 = vadd.f32 %v504_v43, %v472_v10 }
 0x4a8   :  { %2161 = vtanh.f32 %v2527_v9 }
 0x4a9   :  { %2163 = vtanh.f32 %v2529_v44 }
 0x4ae   :  { %v2158_v2 = vpop.eup %2157 }
 0x4af   :  { %521 = vrot.lane.b32.xlu1 %v2158_v2, %s2360_s3  ;;  %v2160_v14 = vpop.eup %2159 }
 0x4b0   :  { %525 = vrot.lane.b32.xlu0 %v2160_v14, %s2360_s3 }
 0x4b2   :  { %v2162_v45 = vpop.eup %2161 }
 0x4b3   :  { %523 = vrot.lane.b32.xlu1 %v2162_v45, %s2360_s3  ;;  %v2164_v46 = vpop.eup %2163 }
 0x4b4   :  { %527 = vrot.lane.b32.xlu0 %v2164_v46, %s2360_s3 }
 0x521   :  { %v522_v47 = vpop.permute.xlu1 %521 }
 0x522   :  { %v2537_v48 = vmul.f32 %v2150_v7, %v522_v47  ;;  %v526_v49 = vpop.permute.xlu0 %525 }
 0x523   :  { %v2539_v50 = vmul.f32 %v2152_v13, %v526_v49 }
 0x524   :  { %v558_v52 = vrot.slane %v2537_v48, 1 }
 0x525   :  { %v524_v51 = vpop.permute.xlu1 %523  ;;  %v560_v54 = vrot.slane %v2539_v50, 7 }
 0x526   :  { %v2542_v53 = vmul.f32 %v2154_v18, %v524_v51  ;;  %v528_v55 = vpop.permute.xlu0 %527 }
 0x527   :  { %v2545_v56 = vmul.f32 %v2156_v23, %v528_v55 }
 0x528   :  { %v559_v57 = vsel %vm335_vm2, %v2542_v53, %v558_v52 }
 0x529   :  { %v561_v58 = vsel %vm338_vm3, %v560_v54, %v559_v57  ;;  %v562_v59 = vrot.slane %v2545_v56, 6 }
 0x52b   :  { %v563_v60 = vsel %vm341_vm4, %v562_v59, %v561_v58  ;;  %v682_v59 = vrot.slane %v2520_v37, 7 }
 0x52c   :  { %564 = vrot.lane.b32.xlu1 %v563_v60, %s2361_s6  ;;  %v683_v60 = vrot.slane %v2527_v9, 7 }
 0x59e   :  { %v565_v61 = vpop.permute.xlu1 %564 }
 0x59f   :  { %1991 = vmatmul.mubr.msk.f32.vlgmr.msra.gmra.mrb[2].mxu1 %vm131_vm5, %v565_v61 }
 0x5a0   :  { %2074 = vmatpush3.bf16.msra.mxu1 %v2399_v5  ;;  %2012 = vmatprep.mubr.msk.f32.mxu1 %vm2358_vm1, %v2359_v4 }
 0x5a1   :  { %2075 = vmatprep.subr.bf16.mxu1 %v2357_v0 }
 0x5a4   :  { %2077 = vmatpush3.bf16.msra.mxu1 %v2419_v11 }
 0x5a5   :  { %2084 = vmatprep.subr.bf16.mxu1 %v2357_v0 }
 0x672   :  { %v634_v62 = vpop.f32.mrb[2].mxu1 }
 0x673   :  { %v639_v63 = vrot.slane %v634_v62, 6  ;;  %v640_v1 = vrot.slane %v634_v62, 7  ;;  %v1992_v3 = vpop.f32.mrb[3].mxu1  ;;  %v641_v7 = vrot.slane %v634_v62, 1  ;;  %v648_v12 = vadd.f32 %v634_v62, %v2451_v24 }
 0x675   :  { %v646_v6 = vadd.f32 %v639_v63, %v2446_v16  ;;  %v647_v8 = vadd.f32 %v640_v1, %v2448_v19  ;;  %v649_v13 = vadd.f32 %v641_v7, %v2454_v27  ;;  %v652_v29 = vsub.f32 0.0, %v648_v12 }
 0x676   :  { %v685_v7 = vrot.slane %v2529_v44, 7 }
 0x677   :  { %2165 = vtanh.f32 %v646_v6  ;;  %v650_v21 = vsub.f32 0.0, %v646_v6  ;;  %v651_v23 = vsub.f32 0.0, %v647_v8  ;;  %v653_v30 = vsub.f32 0.0, %v649_v13 }
 0x678   :  { %2167 = vtanh.f32 %v647_v8  ;;  %v658_v33 = vmul.f32 1.442695, %v652_v29  ;;  %v684_v6 = vrot.slane %v2523_v40, 7 }
 0x679   :  { %2169 = vtanh.f32 %v648_v12  ;;  %v654_v26 = vmul.f32 1.442695, %v650_v21  ;;  %v656_v31 = vmul.f32 1.442695, %v651_v23  ;;  %v660_v34 = vmul.f32 1.442695, %v653_v30 }
 0x67a   :  { %2171 = vtanh.f32 %v649_v13 }
 0x67b   :  { %2173 = vpow2.f32 %v654_v26 }
 0x67c   :  { %2175 = vpow2.f32 %v656_v31 }
 0x67d   :  { %2177 = vpow2.f32 %v658_v33 }
 0x67e   :  { %2179 = vpow2.f32 %v660_v34 }
 0x681   :  { %v2166_v15 = vpop.eup %2165 }
 0x682   :  { %698 = vrot.lane.b32.xlu0 %v2166_v15, %s2360_s3  ;;  %v2168_v17 = vpop.eup %2167 }
 0x683   :  { %700 = vrot.lane.b32.xlu1 %v2168_v17, %s2360_s3  ;;  %v2170_v18 = vpop.eup %2169 }
 0x684   :  { %v2172_v20 = vpop.eup %2171 }
 0x685   :  { %v2174_v35 = vpop.eup %2173 }
 0x686   :  { %704 = vrot.lane.b32.xlu0 %v2172_v20, %s2360_s3  ;;  %v2176_v36 = vpop.eup %2175  ;;  %v662_v38 = vadd.f32 1.0, %v2174_v35 }
 0x687   :  { %702 = vrot.lane.b32.xlu1 %v2170_v18, %s2360_s3  ;;  %v2178_v39 = vpop.eup %2177  ;;  %v663_v41 = vadd.f32 1.0, %v2176_v36 }
 0x688   :  { %v2180_v42 = vpop.eup %2179  ;;  %2181 = vrcp.f32 %v662_v38  ;;  %v664_v10 = vadd.f32 1.0, %v2178_v39 }
 0x689   :  { %v665_v43 = vadd.f32 1.0, %v2180_v42  ;;  %2183 = vrcp.f32 %v663_v41 }
 0x68a   :  { %2185 = vrcp.f32 %v664_v10 }
 0x68b   :  { %2187 = vrcp.f32 %v665_v43 }
 0x692   :  { %v2182_v2 = vpop.eup %2181 }
 0x693   :  { %v2184_v46 = vpop.eup %2183  ;;  %v690_v61 = vmul.f32 %v2182_v2, %v682_v59 }
 0x694   :  { %v2186_v51 = vpop.eup %2185  ;;  %v691_v63 = vmul.f32 %v2184_v46, %v683_v60 }
 0x695   :  { %v2188_v52 = vpop.eup %2187  ;;  %v692_v12 = vmul.f32 %v2186_v51, %v684_v6 }
 0x696   :  { %v693_v37 = vmul.f32 %v2188_v52, %v685_v7 }
 0x6f4   :  { %v699_v14 = vpop.permute.xlu0 %698 }
 0x6f5   :  { %v710_v45 = vmul.f32 %v2182_v2, %v699_v14  ;;  %v701_v47 = vpop.permute.xlu1 %700 }
 0x6f6   :  { %v711_v49 = vmul.f32 %v2184_v46, %v701_v47 }
 0x6f7   :  { %718 = vrot.lane.b32.xlu0 %v710_v45, %s2361_s6 }
 0x6f8   :  { %720 = vrot.lane.b32.xlu1 %v711_v49, %s2361_s6  ;;  %v705_v55 = vpop.permute.xlu0 %704 }
 0x6f9   :  { %v703_v54 = vpop.permute.xlu1 %702  ;;  %v713_v58 = vmul.f32 %v2188_v52, %v705_v55 }
 0x6fa   :  { %v712_v57 = vmul.f32 %v2186_v51, %v703_v54 }
 0x6fb   :  { %724 = vrot.lane.b32.xlu0 %v713_v58, %s2361_s6 }
 0x6fc   :  { %722 = vrot.lane.b32.xlu1 %v712_v57, %s2361_s6 }
 0x769   :  { %v719_v62 = vpop.permute.xlu0 %718 }
 0x76a   :  { %v2574_v1 = vadd.f32 %v719_v62, %v690_v61  ;;  %v721_v3 = vpop.permute.xlu1 %720 }
 0x76b   :  { %v2578_v8 = vadd.f32 %v721_v3, %v691_v63 }
 0x76c   :  { %2189 = vtanh.f32 %v2574_v1 }
 0x76d   :  { %2191 = vtanh.f32 %v2578_v8  ;;  %v725_v9 = vpop.permute.xlu0 %724 }
 0x76e   :  { %v723_v13 = vpop.permute.xlu1 %722  ;;  %v2584_v17 = vadd.f32 %v725_v9, %v693_v37 }
 0x76f   :  { %v2582_v15 = vadd.f32 %v723_v13, %v692_v12 }
 0x771   :  { %2193 = vtanh.f32 %v2582_v15 }
 0x772   :  { %2195 = vtanh.f32 %v2584_v17 }
 0x776   :  { %v2190_v40 = vpop.eup %2189 }
 0x777   :  { %742 = vrot.lane.b32.xlu0 %v2190_v40, %s2360_s3  ;;  %v2192_v44 = vpop.eup %2191 }
 0x778   :  { %744 = vrot.lane.b32.xlu1 %v2192_v44, %s2360_s3 }
 0x77b   :  { %v2194_v18 = vpop.eup %2193 }
 0x77c   :  { %v2196_v20 = vpop.eup %2195  ;;  %746 = vrot.lane.b32.xlu1 %v2194_v18, %s2360_s3 }
 0x77d   :  { %748 = vrot.lane.b32.xlu0 %v2196_v20, %s2360_s3 }
 0x7e9   :  { %v743_v21 = vpop.permute.xlu0 %742 }
 0x7ea   :  { %v2592_v23 = vmul.f32 %v2182_v2, %v743_v21  ;;  %v745_v26 = vpop.permute.xlu1 %744 }
 0x7eb   :  { %v2594_v29 = vmul.f32 %v2184_v46, %v745_v26 }
 0x7ec   :  { %v779_v30 = vrot.slane %v2592_v23, 2 }
 0x7ed   :  { %v780_v31 = vrot.slane %v2594_v29, 1 }
 0x7ee   :  { %v747_v33 = vpop.permute.xlu1 %746 }
 0x7ef   :  { %v2598_v34 = vmul.f32 %v2186_v51, %v747_v33  ;;  %v749_v35 = vpop.permute.xlu0 %748  ;;  %v781_v36 = vsel %vm335_vm2, %v780_v31, %v779_v30 }
 0x7f0   :  { %v2601_v38 = vmul.f32 %v2188_v52, %v749_v35 }
 0x7f1   :  { %v782_v39 = vsel %vm338_vm3, %v2598_v34, %v781_v36 }
 0x7f2   :  { %v783_v41 = vrot.slane %v2601_v38, 7 }
 0x7f4   :  { %v784_v42 = vsel %vm341_vm4, %v783_v41, %v782_v39 }
 0x7f5   :  { %785 = vrot.lane.b32.xlu0 %v784_v42, %s2361_s6 }
 0x867   :  { %v786_v10 = vpop.permute.xlu0 %785 }
 0x868   :  { %2002 = vmatmul.mubr.msk.f32.vlgmr.msra.gmra.mrb[6].mxu0 %vm131_vm5, %v786_v10 }
 0x869   :  { %2080 = vmatpush3.bf16.msra.mxu0 %v2399_v5  ;;  %2023 = vmatprep.mubr.msk.f32.mxu0 %vm2358_vm1, %v2359_v4 }
 0x86a   :  { %2081 = vmatprep.subr.bf16.mxu0 %v2357_v0 }
 0x86d   :  { %2083 = vmatpush3.bf16.msra.mxu0 %v2419_v11 }
 0x86e   :  { %2090 = vmatprep.subr.bf16.mxu0 %v2357_v0 }
 0x93b   :  { %v855_v43 = vpop.f32.mrb[6].mxu0 }
 0x93c   :  { %v860_v2 = vrot.slane %v855_v43, 5  ;;  %v861_v14 = vrot.slane %v855_v43, 6  ;;  %v2003_v45 = vpop.f32.mrb[7].mxu0  ;;  %v862_v47 = vrot.slane %v855_v43, 7  ;;  %v870_v51 = vadd.f32 %v855_v43, %v2454_v27 }
 0x93e   :  { %v867_v46 = vadd.f32 %v860_v2, %v2446_v16  ;;  %v868_v49 = vadd.f32 %v861_v14, %v2448_v19  ;;  %v869_v52 = vadd.f32 %v862_v47, %v2451_v24  ;;  %v874_v62 = vsub.f32 0.0, %v870_v51 }
 0x93f   :  { %v903_v2 = vrot.slane %v2574_v1, 7  ;;  %v904_v14 = vrot.slane %v2578_v8, 7 }
 0x940   :  { %2197 = vtanh.f32 %v867_v46  ;;  %v871_v59 = vsub.f32 0.0, %v867_v46  ;;  %v872_v60 = vsub.f32 0.0, %v868_v49  ;;  %v873_v63 = vsub.f32 0.0, %v869_v52 }
 0x941   :  { %2199 = vtanh.f32 %v868_v49  ;;  %v881_v6 = vmul.f32 1.442695, %v874_v62 }
 0x942   :  { %2201 = vtanh.f32 %v870_v51  ;;  %v875_v61 = vmul.f32 1.442695, %v871_v59  ;;  %v877_v3 = vmul.f32 1.442695, %v872_v60  ;;  %v879_v7 = vmul.f32 1.442695, %v873_v63 }
 0x943   :  { %2203 = vtanh.f32 %v869_v52  ;;  %v905_v52 = vrot.slane %v2582_v15, 7 }
 0x944   :  { %2205 = vpow2.f32 %v875_v61 }
 0x945   :  { %2207 = vpow2.f32 %v877_v3 }
 0x946   :  { %2209 = vpow2.f32 %v881_v6 }
 0x947   :  { %2211 = vpow2.f32 %v879_v7 }
 0x94a   :  { %v2198_v54 = vpop.eup %2197 }
 0x94b   :  { %919 = vrot.lane.b32.xlu1 %v2198_v54, %s2360_s3  ;;  %v2200_v55 = vpop.eup %2199  ;;  %v906_v54 = vrot.slane %v2584_v17, 7 }
 0x94c   :  { %921 = vrot.lane.b32.xlu0 %v2200_v55, %s2360_s3  ;;  %v2202_v57 = vpop.eup %2201 }
 0x94d   :  { %v2204_v58 = vpop.eup %2203 }
 0x94e   :  { %v2206_v12 = vpop.eup %2205 }
 0x94f   :  { %923 = vrot.lane.b32.xlu1 %v2204_v58, %s2360_s3  ;;  %v2208_v37 = vpop.eup %2207  ;;  %v883_v13 = vadd.f32 1.0, %v2206_v12 }
 0x950   :  { %925 = vrot.lane.b32.xlu0 %v2202_v57, %s2360_s3  ;;  %v2210_v9 = vpop.eup %2209  ;;  %v884_v40 = vadd.f32 1.0, %v2208_v37 }
 0x951   :  { %v2212_v44 = vpop.eup %2211  ;;  %2213 = vrcp.f32 %v883_v13  ;;  %v886_v18 = vadd.f32 1.0, %v2210_v9 }
 0x952   :  { %v885_v20 = vadd.f32 1.0, %v2212_v44  ;;  %2215 = vrcp.f32 %v884_v40 }
 0x953   :  { %2217 = vrcp.f32 %v886_v18 }
 0x954   :  { %2219 = vrcp.f32 %v885_v20 }
 0x95b   :  { %v2214_v21 = vpop.eup %2213 }
 0x95c   :  { %v2216_v31 = vpop.eup %2215  ;;  %v911_v45 = vmul.f32 %v2214_v21, %v903_v2 }
 0x95d   :  { %v2218_v36 = vpop.eup %2217  ;;  %v912_v47 = vmul.f32 %v2216_v31, %v904_v14 }
 0x95e   :  { %v2220_v39 = vpop.eup %2219  ;;  %v914_v57 = vmul.f32 %v2218_v36, %v906_v54 }
 0x95f   :  { %v913_v1 = vmul.f32 %v2220_v39, %v905_v52 }
 0x9bd   :  { %v920_v26 = vpop.permute.xlu1 %919 }
 0x9be   :  { %v931_v30 = vmul.f32 %v2214_v21, %v920_v26  ;;  %v922_v33 = vpop.permute.xlu0 %921 }
 0x9bf   :  { %v932_v35 = vmul.f32 %v2216_v31, %v922_v33 }
 0x9c0   :  { %939 = vrot.lane.b32.xlu1 %v931_v30, %s2361_s6 }
 0x9c1   :  { %941 = vrot.lane.b32.xlu0 %v932_v35, %s2361_s6  ;;  %v924_v42 = vpop.permute.xlu1 %923 }
 0x9c2   :  { %v926_v41 = vpop.permute.xlu0 %925  ;;  %v933_v43 = vmul.f32 %v2220_v39, %v924_v42 }
 0x9c3   :  { %v934_v10 = vmul.f32 %v2218_v36, %v926_v41 }
 0x9c4   :  { %943 = vrot.lane.b32.xlu1 %v933_v43, %s2361_s6 }
 0x9c5   :  { %945 = vrot.lane.b32.xlu0 %v934_v10, %s2361_s6 }
 0xa32   :  { %v940_v46 = vpop.permute.xlu1 %939 }
 0xa33   :  { %v2629_v49 = vadd.f32 %v940_v46, %v911_v45  ;;  %v942_v51 = vpop.permute.xlu0 %941 }
 0xa34   :  { %v2633_v55 = vadd.f32 %v942_v51, %v912_v47 }
 0xa35   :  { %2221 = vtanh.f32 %v2629_v49 }
 0xa36   :  { %2223 = vtanh.f32 %v2633_v55  ;;  %v944_v8 = vpop.permute.xlu1 %943 }
 0xa37   :  { %v946_v58 = vpop.permute.xlu0 %945  ;;  %v2639_v60 = vadd.f32 %v944_v8, %v913_v1 }
 0xa38   :  { %v2637_v59 = vadd.f32 %v946_v58, %v914_v57 }
 0xa3a   :  { %2225 = vtanh.f32 %v2637_v59 }
 0xa3b   :  { %2227 = vtanh.f32 %v2639_v60 }
 0xa3f   :  { %v2222_v15 = vpop.eup %2221 }
 0xa40   :  { %963 = vrot.lane.b32.xlu1 %v2222_v15, %s2360_s3  ;;  %v2224_v17 = vpop.eup %2223 }
 0xa41   :  { %965 = vrot.lane.b32.xlu0 %v2224_v17, %s2360_s3 }
 0xa44   :  { %v2226_v61 = vpop.eup %2225 }
 0xa45   :  { %v2228_v62 = vpop.eup %2227  ;;  %969 = vrot.lane.b32.xlu0 %v2226_v61, %s2360_s3 }
 0xa46   :  { %967 = vrot.lane.b32.xlu1 %v2228_v62, %s2360_s3 }
 0xab2   :  { %v964_v63 = vpop.permute.xlu1 %963 }
 0xab3   :  { %v966_v3 = vpop.permute.xlu0 %965  ;;  %v2649_v7 = vmul.f32 %v2214_v21, %v964_v63 }
 0xab4   :  { %v2647_v6 = vmul.f32 %v2216_v31, %v966_v3 }
 0xab5   :  { %v1000_v37 = vrot.slane %v2649_v7, 3 }
 0xab6   :  { %v1001_v12 = vrot.slane %v2647_v6, 2 }
 0xab7   :  { %v970_v9 = vpop.permute.xlu0 %969 }
 0xab8   :  { %v968_v13 = vpop.permute.xlu1 %967  ;;  %v2656_v18 = vmul.f32 %v2218_v36, %v970_v9  ;;  %v1002_v20 = vsel %vm335_vm2, %v1001_v12, %v1000_v37 }
 0xab9   :  { %v2653_v40 = vmul.f32 %v2220_v39, %v968_v13 }
 0xabb   :  { %v1003_v44 = vrot.slane %v2653_v40, 1 }
 0xabd   :  { %v1004_v26 = vsel %vm338_vm3, %v1003_v44, %v1002_v20 }
 0xabe   :  { %v1005_v21 = vsel %vm341_vm4, %v2656_v18, %v1004_v26 }
 0xabf   :  { %1006 = vrot.lane.b32.xlu1 %v1005_v21, %s2361_s6 }
 0xb31   :  { %v1007_v30 = vpop.permute.xlu1 %1006 }
 0xb32   :  { %2013 = vmatmul.mubr.msk.f32.vlgmr.msra.gmra.mrb[4].mxu1 %vm131_vm5, %v1007_v30 }
 0xb33   :  { %2086 = vmatpush3.bf16.msra.mxu1 %v2399_v5  ;;  %2034 = vmatprep.mubr.msk.f32.mxu1 %vm2358_vm1, %v2359_v4 }
 0xb34   :  { %2087 = vmatprep.subr.bf16.mxu1 %v2357_v0 }
 0xb37   :  { %2089 = vmatpush3.bf16.msra.mxu1 %v2419_v11 }
 0xc05   :  { %v1076_v31 = vpop.f32.mrb[4].mxu1 }
 0xc06   :  { %v1081_v33 = vrot.slane %v1076_v31, 4  ;;  %v1082_v35 = vrot.slane %v1076_v31, 5  ;;  %v2014_v36 = vpop.f32.mrb[5].mxu1  ;;  %v1083_v39 = vrot.slane %v1076_v31, 6  ;;  %v1084_v10 = vrot.slane %v1076_v31, 7 }
 0xc08   :  { %v1089_v41 = vadd.f32 %v1081_v33, %v2446_v16  ;;  %v1090_v42 = vadd.f32 %v1082_v35, %v2448_v19  ;;  %v1091_v43 = vadd.f32 %v1083_v39, %v2451_v24  ;;  %v1092_v2 = vadd.f32 %v1084_v10, %v2454_v27 }
 0xc09   :  { %v1126_v10 = vrot.slane %v2633_v55, 7 }
 0xc0a   :  { %2229 = vtanh.f32 %v1089_v41  ;;  %v1093_v51 = vsub.f32 0.0, %v1089_v41  ;;  %v1094_v52 = vsub.f32 0.0, %v1090_v42  ;;  %v1095_v54 = vsub.f32 0.0, %v1091_v43 }
 0xc0b   :  { %2231 = vtanh.f32 %v1090_v42  ;;  %v1096_v58 = vsub.f32 0.0, %v1092_v2  ;;  %v1125_v42 = vrot.slane %v2629_v49, 7 }
 0xc0c   :  { %2233 = vtanh.f32 %v1091_v43  ;;  %v1097_v57 = vmul.f32 1.442695, %v1093_v51  ;;  %v1099_v1 = vmul.f32 1.442695, %v1094_v52  ;;  %v1101_v8 = vmul.f32 1.442695, %v1095_v54 }
 0xc0d   :  { %2235 = vtanh.f32 %v1092_v2  ;;  %v1103_v15 = vmul.f32 1.442695, %v1096_v58  ;;  %v1128_v54 = vrot.slane %v2637_v59, 7 }
 0xc0e   :  { %2237 = vpow2.f32 %v1097_v57 }
 0xc0f   :  { %2239 = vpow2.f32 %v1099_v1 }
 0xc10   :  { %2241 = vpow2.f32 %v1101_v8 }
 0xc11   :  { %2243 = vpow2.f32 %v1103_v15 }
 0xc14   :  { %v2230_v14 = vpop.eup %2229 }
 0xc15   :  { %v2232_v45 = vpop.eup %2231  ;;  %1141 = vrot.lane.b32.xlu0 %v2230_v14, %s2360_s3 }
 0xc16   :  { %1143 = vrot.lane.b32.xlu1 %v2232_v45, %s2360_s3  ;;  %v2234_v46 = vpop.eup %2233  ;;  %v1127_v45 = vrot.slane %v2639_v60, 7 }
 0xc17   :  { %v2236_v47 = vpop.eup %2235 }
 0xc18   :  { %v2238_v17 = vpop.eup %2237 }
 0xc19   :  { %1145 = vrot.lane.b32.xlu0 %v2234_v46, %s2360_s3  ;;  %v2240_v61 = vpop.eup %2239  ;;  %v1105_v62 = vadd.f32 1.0, %v2238_v17 }
 0xc1a   :  { %1147 = vrot.lane.b32.xlu1 %v2236_v47, %s2360_s3  ;;  %v2242_v63 = vpop.eup %2241  ;;  %v1106_v3 = vadd.f32 1.0, %v2240_v61 }
 0xc1b   :  { %v2244_v12 = vpop.eup %2243  ;;  %v1107_v37 = vadd.f32 1.0, %v2242_v63  ;;  %2245 = vrcp.f32 %v1105_v62 }
 0xc1c   :  { %2247 = vrcp.f32 %v1106_v3  ;;  %v1108_v13 = vadd.f32 1.0, %v2244_v12 }
 0xc1d   :  { %2249 = vrcp.f32 %v1107_v37 }
 0xc1e   :  { %2251 = vrcp.f32 %v1108_v13 }
 0xc25   :  { %v2246_v9 = vpop.eup %2245 }
 0xc26   :  { %v2248_v20 = vpop.eup %2247  ;;  %v1133_v43 = vmul.f32 %v2246_v9, %v1125_v42 }
 0xc27   :  { %v2250_v31 = vpop.eup %2249  ;;  %v1134_v2 = vmul.f32 %v2248_v20, %v1126_v10 }
 0xc28   :  { %v2252_v36 = vpop.eup %2251  ;;  %v1135_v52 = vmul.f32 %v2250_v31, %v1127_v45 }
 0xc29   :  { %v1136_v55 = vmul.f32 %v2252_v36, %v1128_v54 }
 0xc87   :  { %v1142_v44 = vpop.permute.xlu0 %1141 }
 0xc88   :  { %v1144_v26 = vpop.permute.xlu1 %1143  ;;  %v1153_v21 = vmul.f32 %v2246_v9, %v1142_v44 }
 0xc89   :  { %v1154_v30 = vmul.f32 %v2248_v20, %v1144_v26 }
 0xc8a   :  { %1161 = vrot.lane.b32.xlu0 %v1153_v21, %s2361_s6 }
 0xc8b   :  { %1163 = vrot.lane.b32.xlu1 %v1154_v30, %s2361_s6  ;;  %v1146_v33 = vpop.permute.xlu0 %1145 }
 0xc8c   :  { %v1155_v35 = vmul.f32 %v2250_v31, %v1146_v33  ;;  %v1148_v39 = vpop.permute.xlu1 %1147 }
 0xc8d   :  { %v1156_v41 = vmul.f32 %v2252_v36, %v1148_v39 }
 0xc8e   :  { %1165 = vrot.lane.b32.xlu0 %v1155_v35, %s2361_s6 }
 0xc8f   :  { %1167 = vrot.lane.b32.xlu1 %v1156_v41, %s2361_s6 }
 0xcfc   :  { %v1162_v14 = vpop.permute.xlu0 %1161 }
 0xcfd   :  { %v1164_v46 = vpop.permute.xlu1 %1163  ;;  %v2684_v47 = vadd.f32 %v1162_v14, %v1133_v43 }
 0xcfe   :  { %v2686_v51 = vadd.f32 %v1164_v46, %v1134_v2 }
 0xcff   :  { %2253 = vtanh.f32 %v2684_v47 }
 0xd00   :  { %2255 = vtanh.f32 %v2686_v51  ;;  %v1166_v49 = vpop.permute.xlu0 %1165 }
 0xd01   :  { %v2691_v57 = vadd.f32 %v1166_v49, %v1135_v52  ;;  %v1168_v1 = vpop.permute.xlu1 %1167 }
 0xd02   :  { %v2694_v60 = vadd.f32 %v1168_v1, %v1136_v55 }
 0xd03   :  { %2257 = vtanh.f32 %v2691_v57 }
 0xd04   :  { %2259 = vtanh.f32 %v2694_v60 }
 0xd09   :  { %v2254_v58 = vpop.eup %2253 }
 0xd0a   :  { %v2256_v8 = vpop.eup %2255  ;;  %1185 = vrot.lane.b32.xlu0 %v2254_v58, %s2360_s3 }
 0xd0b   :  { %1187 = vrot.lane.b32.xlu1 %v2256_v8, %s2360_s3 }
 0xd0d   :  { %v2258_v59 = vpop.eup %2257 }
 0xd0e   :  { %1189 = vrot.lane.b32.xlu0 %v2258_v59, %s2360_s3  ;;  %v2260_v15 = vpop.eup %2259 }
 0xd0f   :  { %1191 = vrot.lane.b32.xlu1 %v2260_v15, %s2360_s3 }
 0xd7c   :  { %v1186_v17 = vpop.permute.xlu0 %1185 }
 0xd7d   :  { %v1188_v61 = vpop.permute.xlu1 %1187  ;;  %v2701_v62 = vmul.f32 %v2246_v9, %v1186_v17 }
 0xd7e   :  { %v2703_v63 = vmul.f32 %v2248_v20, %v1188_v61 }
 0xd7f   :  { %v1222_v12 = vrot.slane %v2701_v62, 4 }
 0xd80   :  { %v1223_v3 = vrot.slane %v2703_v63, 3  ;;  %v1190_v37 = vpop.permute.xlu0 %1189 }
 0xd81   :  { %v2707_v13 = vmul.f32 %v2250_v31, %v1190_v37  ;;  %v1192_v44 = vpop.permute.xlu1 %1191 }
 0xd82   :  { %v2710_v21 = vmul.f32 %v2252_v36, %v1192_v44  ;;  %v1224_v30 = vsel %vm335_vm2, %v1223_v3, %v1222_v12 }
 0xd83   :  { %v1225_v26 = vrot.slane %v2707_v13, 2 }
 0xd84   :  { %v1227_v9 = vrot.slane %v2710_v21, 1 }
 0xd85   :  { %v1226_v33 = vsel %vm338_vm3, %v1225_v26, %v1224_v30 }
 0xd86   :  { %v1228_v20 = vsel %vm341_vm4, %v1227_v9, %v1226_v33 }
 0xd87   :  { %1229 = vrot.lane.b32.xlu0 %v1228_v20, %s2361_s6 }
 0xdf9   :  { %v1230_v35 = vpop.permute.xlu0 %1229 }
 0xdfa   :  { %2024 = vmatmul.mubr.msk.f32.vlgmr.msra.gmra.mrb[8].mxu0 %vm131_vm5, %v1230_v35 }
 0xdfb   :  { %2092 = vmatpush3.bf16.msra.mxu0 %v2399_v5  ;;  %2045 = vmatprep.mubr.msk.f32.mxu0 %vm2358_vm1, %v2359_v4 }
 0xdfc   :  { %2093 = vmatprep.subr.bf16.mxu0 %v2357_v0 }
 0xdff   :  { %2095 = vmatpush3.bf16.msra.mxu0 %v2419_v11 }
 0xecd   :  { %v1299_v31 = vpop.f32.mrb[8].mxu0 }
 0xece   :  { %v1304_v36 = vrot.slane %v1299_v31, 3  ;;  %v1305_v39 = vrot.slane %v1299_v31, 4  ;;  %v2025_v41 = vpop.f32.mrb[9].mxu0  ;;  %v1306_v42 = vrot.slane %v1299_v31, 5  ;;  %v1307_v2 = vrot.slane %v1299_v31, 6 }
 0xed0   :  { %v1312_v10 = vadd.f32 %v1304_v36, %v2446_v16  ;;  %v1313_v43 = vadd.f32 %v1305_v39, %v2448_v19  ;;  %v1314_v14 = vadd.f32 %v1306_v42, %v2451_v24  ;;  %v1315_v4 = vadd.f32 %v1307_v2, %v2454_v27 }
 0xed1   :  { %v1349_v2 = vrot.slane %v2686_v51, 7 }
 0xed2   :  { %2261 = vtanh.f32 %v1312_v10  ;;  %v1316_v46 = vsub.f32 0.0, %v1312_v10  ;;  %v1317_v52 = vsub.f32 0.0, %v1313_v43  ;;  %v1318_v54 = vsub.f32 0.0, %v1314_v14 }
 0xed3   :  { %2263 = vtanh.f32 %v1313_v43  ;;  %v1319_v1 = vsub.f32 0.0, %v1315_v4  ;;  %v1348_v43 = vrot.slane %v2684_v47, 7 }
 0xed4   :  { %2265 = vtanh.f32 %v1314_v14  ;;  %v1320_v49 = vmul.f32 1.442695, %v1316_v46  ;;  %v1322_v55 = vmul.f32 1.442695, %v1317_v52  ;;  %v1324_v58 = vmul.f32 1.442695, %v1318_v54 }
 0xed5   :  { %2267 = vtanh.f32 %v1315_v4  ;;  %v1326_v8 = vmul.f32 1.442695, %v1319_v1  ;;  %v1351_v54 = vrot.slane %v2694_v60, 7 }
 0xed6   :  { %2269 = vpow2.f32 %v1320_v49 }
 0xed7   :  { %2271 = vpow2.f32 %v1322_v55 }
 0xed8   :  { %2273 = vpow2.f32 %v1324_v58 }
 0xed9   :  { %2275 = vpow2.f32 %v1326_v8 }
 0xedc   :  { %v2262_v0 = vpop.eup %2261 }
 0xedd   :  { %v2264_v5 = vpop.eup %2263  ;;  %1364 = vrot.lane.b32.xlu1 %v2262_v0, %s2360_s3 }
 0xede   :  { %1366 = vrot.lane.b32.xlu0 %v2264_v5, %s2360_s3  ;;  %v2266_v11 = vpop.eup %2265  ;;  %v1350_v5 = vrot.slane %v2691_v57, 7 }
 0xedf   :  { %v2268_v45 = vpop.eup %2267 }
 0xee0   :  { %v2270_v59 = vpop.eup %2269 }
 0xee1   :  { %1368 = vrot.lane.b32.xlu1 %v2266_v11, %s2360_s3  ;;  %v2272_v15 = vpop.eup %2271  ;;  %v1328_v17 = vadd.f32 1.0, %v2270_v59 }
 0xee2   :  { %1370 = vrot.lane.b32.xlu0 %v2268_v45, %s2360_s3  ;;  %v2274_v61 = vpop.eup %2273  ;;  %v1329_v3 = vadd.f32 1.0, %v2272_v15 }
 0xee3   :  { %v2276_v12 = vpop.eup %2275  ;;  %v1330_v37 = vadd.f32 1.0, %v2274_v61  ;;  %2277 = vrcp.f32 %v1328_v17 }
 0xee4   :  { %2279 = vrcp.f32 %v1329_v3  ;;  %v1331_v44 = vadd.f32 1.0, %v2276_v12 }
 0xee5   :  { %2281 = vrcp.f32 %v1330_v37 }
 0xee6   :  { %2283 = vrcp.f32 %v1331_v44 }
 0xeed   :  { %v2278_v26 = vpop.eup %2277 }
 0xeee   :  { %v2280_v33 = vpop.eup %2279  ;;  %v1356_v14 = vmul.f32 %v2278_v26, %v1348_v43 }
 0xeef   :  { %v2282_v31 = vpop.eup %2281  ;;  %v1357_v4 = vmul.f32 %v2280_v33, %v1349_v2 }
 0xef0   :  { %v2284_v41 = vpop.eup %2283  ;;  %v1358_v52 = vmul.f32 %v2282_v31, %v1350_v5 }
 0xef1   :  { %v1359_v51 = vmul.f32 %v2284_v41, %v1351_v54 }
 0xf4f   :  { %v1365_v30 = vpop.permute.xlu1 %1364 }
 0xf50   :  { %v1367_v9 = vpop.permute.xlu0 %1366  ;;  %v1376_v20 = vmul.f32 %v2278_v26, %v1365_v30 }
 0xf51   :  { %v1377_v35 = vmul.f32 %v2280_v33, %v1367_v9 }
 0xf52   :  { %1384 = vrot.lane.b32.xlu1 %v1376_v20, %s2361_s6 }
 0xf53   :  { %1386 = vrot.lane.b32.xlu0 %v1377_v35, %s2361_s6  ;;  %v1369_v36 = vpop.permute.xlu1 %1368 }
 0xf54   :  { %v1378_v39 = vmul.f32 %v2282_v31, %v1369_v36  ;;  %v1371_v42 = vpop.permute.xlu0 %1370 }
 0xf55   :  { %v1379_v10 = vmul.f32 %v2284_v41, %v1371_v42 }
 0xf56   :  { %1388 = vrot.lane.b32.xlu1 %v1378_v39, %s2361_s6 }
 0xf57   :  { %1390 = vrot.lane.b32.xlu0 %v1379_v10, %s2361_s6 }
 0xfc4   :  { %v1385_v0 = vpop.permute.xlu1 %1384 }
 0xfc5   :  { %v1387_v11 = vpop.permute.xlu0 %1386  ;;  %v2738_v45 = vadd.f32 %v1385_v0, %v1356_v14 }
 0xfc6   :  { %v2740_v46 = vadd.f32 %v1387_v11, %v1357_v4 }
 0xfc7   :  { %2285 = vtanh.f32 %v2738_v45 }
 0xfc8   :  { %2287 = vtanh.f32 %v2740_v46  ;;  %v1389_v47 = vpop.permute.xlu1 %1388 }
 0xfc9   :  { %v2745_v49 = vadd.f32 %v1389_v47, %v1358_v52  ;;  %v1391_v55 = vpop.permute.xlu0 %1390 }
 0xfca   :  { %v2748_v57 = vadd.f32 %v1391_v55, %v1359_v51 }
 0xfcb   :  { %2289 = vtanh.f32 %v2745_v49 }
 0xfcc   :  { %2291 = vtanh.f32 %v2748_v57 }
 0xfd1   :  { %v2286_v1 = vpop.eup %2285 }
 0xfd2   :  { %v2288_v58 = vpop.eup %2287  ;;  %1408 = vrot.lane.b32.xlu1 %v2286_v1, %s2360_s3 }
 0xfd3   :  { %1410 = vrot.lane.b32.xlu0 %v2288_v58, %s2360_s3 }
 0xfd5   :  { %v2290_v60 = vpop.eup %2289 }
 0xfd6   :  { %1412 = vrot.lane.b32.xlu1 %v2290_v60, %s2360_s3  ;;  %v2292_v8 = vpop.eup %2291 }
 0xfd7   :  { %1414 = vrot.lane.b32.xlu0 %v2292_v8, %s2360_s3 }
0x1044   :  { %v1409_v59 = vpop.permute.xlu1 %1408 }
0x1045   :  { %v1411_v15 = vpop.permute.xlu0 %1410  ;;  %v2755_v17 = vmul.f32 %v2278_v26, %v1409_v59 }
0x1046   :  { %v2757_v61 = vmul.f32 %v2280_v33, %v1411_v15 }
0x1047   :  { %v1445_v12 = vrot.slane %v2755_v17, 5 }
0x1048   :  { %v1446_v3 = vrot.slane %v2757_v61, 4  ;;  %v1413_v37 = vpop.permute.xlu1 %1412 }
0x1049   :  { %v2761_v44 = vmul.f32 %v2282_v31, %v1413_v37  ;;  %v1415_v30 = vpop.permute.xlu0 %1414 }
0x104a   :  { %v2764_v20 = vmul.f32 %v2284_v41, %v1415_v30  ;;  %v1447_v35 = vsel %vm335_vm2, %v1446_v3, %v1445_v12 }
0x104b   :  { %v1448_v9 = vrot.slane %v2761_v44, 3 }
0x104c   :  { %v1450_v26 = vrot.slane %v2764_v20, 2 }
0x104d   :  { %v1449_v36 = vsel %vm338_vm3, %v1448_v9, %v1447_v35 }
0x104e   :  { %v1451_v33 = vsel %vm341_vm4, %v1450_v26, %v1449_v36 }
0x104f   :  { %1452 = vrot.lane.b32.xlu1 %v1451_v33, %s2361_s6 }
0x10c1   :  { %v1453_v39 = vpop.permute.xlu1 %1452 }
0x10c2   :  { %2035 = vmatmul.mubr.msk.f32.vlgmr.msra.gmra.mrb[6].mxu1 %vm131_vm5, %v1453_v39 }
0x1195   :  { %v1522_v31 = vpop.f32.mrb[6].mxu1 }
0x1196   :  { %v1527_v42 = vrot.slane %v1522_v31, 2  ;;  %v1528_v10 = vrot.slane %v1522_v31, 3  ;;  %v2036_v43 = vpop.f32.mrb[7].mxu1  ;;  %v1529_v2 = vrot.slane %v1522_v31, 4  ;;  %v1530_v4 = vrot.slane %v1522_v31, 5 }
0x1198   :  { %v1535_v41 = vadd.f32 %v1527_v42, %v2446_v16  ;;  %v1536_v14 = vadd.f32 %v1528_v10, %v2448_v19  ;;  %v1537_v0 = vadd.f32 %v1529_v2, %v2451_v24  ;;  %v1538_v5 = vadd.f32 %v1530_v4, %v2454_v27 }
0x119a   :  { %2293 = vtanh.f32 %v1535_v41  ;;  %v1539_v51 = vsub.f32 0.0, %v1535_v41  ;;  %v1540_v55 = vsub.f32 0.0, %v1536_v14  ;;  %v1541_v1 = vsub.f32 0.0, %v1537_v0 }
0x119b   :  { %2295 = vtanh.f32 %v1536_v14  ;;  %v1542_v8 = vsub.f32 0.0, %v1538_v5 }
0x119c   :  { %2297 = vtanh.f32 %v1537_v0  ;;  %v1543_v58 = vmul.f32 1.442695, %v1539_v51  ;;  %v1545_v60 = vmul.f32 1.442695, %v1540_v55  ;;  %v1547_v59 = vmul.f32 1.442695, %v1541_v1 }
0x119d   :  { %2299 = vtanh.f32 %v1538_v5  ;;  %v1549_v15 = vmul.f32 1.442695, %v1542_v8  ;;  %v1573_v55 = vrot.slane %v2745_v49, 7 }
0x119e   :  { %2301 = vpow2.f32 %v1543_v58 }
0x119f   :  { %2303 = vpow2.f32 %v1545_v60 }
0x11a0   :  { %2305 = vpow2.f32 %v1547_v59  ;;  %v1574_v59 = vrot.slane %v2748_v57, 7 }
0x11a1   :  { %2307 = vpow2.f32 %v1549_v15 }
0x11a4   :  { %v2294_v11 = vpop.eup %2293 }
0x11a5   :  { %v2296_v52 = vpop.eup %2295  ;;  %1587 = vrot.lane.b32.xlu0 %v2294_v11, %s2360_s3  ;;  %v1571_v11 = vrot.slane %v2738_v45, 7 }
0x11a6   :  { %1589 = vrot.lane.b32.xlu1 %v2296_v52, %s2360_s3  ;;  %v2298_v54 = vpop.eup %2297  ;;  %v1572_v52 = vrot.slane %v2740_v46, 7 }
0x11a7   :  { %v2300_v47 = vpop.eup %2299 }
0x11a8   :  { %v2302_v3 = vpop.eup %2301 }
0x11a9   :  { %1591 = vrot.lane.b32.xlu0 %v2298_v54, %s2360_s3  ;;  %v2304_v12 = vpop.eup %2303  ;;  %v1551_v37 = vadd.f32 1.0, %v2302_v3 }
0x11aa   :  { %1593 = vrot.lane.b32.xlu1 %v2300_v47, %s2360_s3  ;;  %v2306_v30 = vpop.eup %2305  ;;  %v1552_v9 = vadd.f32 1.0, %v2304_v12 }
0x11ab   :  { %v2308_v35 = vpop.eup %2307  ;;  %v1553_v36 = vadd.f32 1.0, %v2306_v30  ;;  %2309 = vrcp.f32 %v1551_v37 }
0x11ac   :  { %2311 = vrcp.f32 %v1552_v9  ;;  %v1554_v26 = vadd.f32 1.0, %v2308_v35 }
0x11ad   :  { %2313 = vrcp.f32 %v1553_v36 }
0x11ae   :  { %2315 = vrcp.f32 %v1554_v26 }
0x11b5   :  { %v2310_v33 = vpop.eup %2309 }
0x11b6   :  { %v2312_v31 = vpop.eup %2311  ;;  %v1579_v54 = vmul.f32 %v2310_v33, %v1571_v11 }
0x11b7   :  { %v2314_v2 = vpop.eup %2313  ;;  %v1580_v47 = vmul.f32 %v2312_v31, %v1572_v52 }
0x11b8   :  { %v2316_v4 = vpop.eup %2315  ;;  %v1581_v8 = vmul.f32 %v2314_v2, %v1573_v55 }
0x11b9   :  { %v1582_v46 = vmul.f32 %v2316_v4, %v1574_v59 }
0x1217   :  { %v1588_v39 = vpop.permute.xlu0 %1587 }
0x1218   :  { %v1590_v42 = vpop.permute.xlu1 %1589  ;;  %v1599_v10 = vmul.f32 %v2310_v33, %v1588_v39 }
0x1219   :  { %v1600_v43 = vmul.f32 %v2312_v31, %v1590_v42 }
0x121a   :  { %1607 = vrot.lane.b32.xlu0 %v1599_v10, %s2361_s6 }
0x121b   :  { %1609 = vrot.lane.b32.xlu1 %v1600_v43, %s2361_s6  ;;  %v1592_v41 = vpop.permute.xlu0 %1591 }
0x121c   :  { %v1601_v14 = vmul.f32 %v2314_v2, %v1592_v41  ;;  %v1594_v0 = vpop.permute.xlu1 %1593 }
0x121d   :  { %v1602_v5 = vmul.f32 %v2316_v4, %v1594_v0 }
0x121e   :  { %1611 = vrot.lane.b32.xlu0 %v1601_v14, %s2361_s6 }
0x121f   :  { %1613 = vrot.lane.b32.xlu1 %v1602_v5, %s2361_s6 }
0x128c   :  { %v1608_v51 = vpop.permute.xlu0 %1607 }
0x128d   :  { %v1610_v1 = vpop.permute.xlu1 %1609  ;;  %v2787_v58 = vadd.f32 %v1608_v51, %v1579_v54 }
0x128e   :  { %v2789_v60 = vadd.f32 %v1610_v1, %v1580_v47 }
0x128f   :  { %2317 = vtanh.f32 %v2787_v58 }
0x1290   :  { %2319 = vtanh.f32 %v2789_v60  ;;  %v1612_v45 = vpop.permute.xlu0 %1611 }
0x1291   :  { %v2794_v15 = vadd.f32 %v1612_v45, %v1581_v8  ;;  %v1614_v3 = vpop.permute.xlu1 %1613 }
0x1292   :  { %v2797_v49 = vadd.f32 %v1614_v3, %v1582_v46 }
0x1293   :  { %2321 = vtanh.f32 %v2794_v15 }
0x1294   :  { %2323 = vtanh.f32 %v2797_v49 }
0x1299   :  { %v2318_v12 = vpop.eup %2317 }
0x129a   :  { %v2320_v37 = vpop.eup %2319  ;;  %1631 = vrot.lane.b32.xlu0 %v2318_v12, %s2360_s3 }
0x129b   :  { %1633 = vrot.lane.b32.xlu1 %v2320_v37, %s2360_s3 }
0x129d   :  { %v2322_v57 = vpop.eup %2321 }
0x129e   :  { %1635 = vrot.lane.b32.xlu0 %v2322_v57, %s2360_s3  ;;  %v2324_v30 = vpop.eup %2323 }
0x129f   :  { %1637 = vrot.lane.b32.xlu1 %v2324_v30, %s2360_s3 }
0x130c   :  { %v1632_v9 = vpop.permute.xlu0 %1631 }
0x130d   :  { %v1634_v35 = vpop.permute.xlu1 %1633  ;;  %v2804_v36 = vmul.f32 %v2310_v33, %v1632_v9 }
0x130e   :  { %v2806_v26 = vmul.f32 %v2312_v31, %v1634_v35 }
0x130f   :  { %v1668_v42 = vrot.slane %v2804_v36, 6 }
0x1310   :  { %v1669_v39 = vrot.slane %v2806_v26, 5  ;;  %v1636_v10 = vpop.permute.xlu0 %1635 }
0x1311   :  { %v2810_v43 = vmul.f32 %v2314_v2, %v1636_v10  ;;  %v1638_v41 = vpop.permute.xlu1 %1637 }
0x1312   :  { %v2813_v0 = vmul.f32 %v2316_v4, %v1638_v41  ;;  %v1670_v5 = vsel %vm335_vm2, %v1669_v39, %v1668_v42 }
0x1313   :  { %v1671_v14 = vrot.slane %v2810_v43, 4 }
0x1314   :  { %v1673_v33 = vrot.slane %v2813_v0, 3 }
0x1315   :  { %v1672_v11 = vsel %vm338_vm3, %v1671_v14, %v1670_v5 }
0x1316   :  { %v1674_v31 = vsel %vm341_vm4, %v1673_v33, %v1672_v11 }
0x1317   :  { %1675 = vrot.lane.b32.xlu0 %v1674_v31, %s2361_s6 }
0x1389   :  { %v1676_v52 = vpop.permute.xlu0 %1675 }
0x138a   :  { %2046 = vmatmul.mubr.msk.f32.vlgmr.msra.gmra.mrb[10].mxu0 %vm131_vm5, %v1676_v52 }
0x145d   :  { %v1745_v2 = vpop.f32.mrb[10].mxu0 }
0x145e   :  { %v1750_v54 = vrot.slane %v1745_v2, 1  ;;  %v1751_v47 = vrot.slane %v1745_v2, 2  ;;  %v2047_v51 = vpop.f32.mrb[11].mxu0  ;;  %v1752_v55 = vrot.slane %v1745_v2, 3  ;;  %v1753_v8 = vrot.slane %v1745_v2, 4 }
0x1460   :  { %v1758_v4 = vadd.f32 %v1750_v54, %v2446_v16  ;;  %v1759_v1 = vadd.f32 %v1751_v47, %v2448_v19  ;;  %v1760_v59 = vadd.f32 %v1752_v55, %v2451_v24  ;;  %v1761_v45 = vadd.f32 %v1753_v8, %v2454_v27 }
0x1462   :  { %2325 = vtanh.f32 %v1758_v4  ;;  %v1762_v19 = vsub.f32 0.0, %v1758_v4  ;;  %v1763_v24 = vsub.f32 0.0, %v1759_v1  ;;  %v1764_v37 = vsub.f32 0.0, %v1760_v59 }
0x1463   :  { %2327 = vtanh.f32 %v1759_v1  ;;  %v1765_v27 = vsub.f32 0.0, %v1761_v45 }
0x1464   :  { %2329 = vtanh.f32 %v1760_v59  ;;  %v1766_v57 = vmul.f32 1.442695, %v1762_v19  ;;  %v1768_v30 = vmul.f32 1.442695, %v1763_v24  ;;  %v1770_v9 = vmul.f32 1.442695, %v1764_v37 }
0x1465   :  { %2331 = vtanh.f32 %v1761_v45  ;;  %v1772_v35 = vmul.f32 1.442695, %v1765_v27  ;;  %v1796_v24 = vrot.slane %v2794_v15, 7  ;;  %v1797_v27 = vrot.slane %v2797_v49, 7 }
0x1466   :  { %2333 = vpow2.f32 %v1766_v57 }
0x1467   :  { %2335 = vpow2.f32 %v1768_v30 }
0x1468   :  { %2337 = vpow2.f32 %v1770_v9 }
0x1469   :  { %2339 = vpow2.f32 %v1772_v35 }
0x146c   :  { %v2326_v46 = vpop.eup %2325 }
0x146d   :  { %v2328_v3 = vpop.eup %2327  ;;  %1810 = vrot.lane.b32.xlu1 %v2326_v46, %s2360_s3  ;;  %v1794_v46 = vrot.slane %v2787_v58, 7 }
0x146e   :  { %1812 = vrot.lane.b32.xlu0 %v2328_v3, %s2360_s3  ;;  %v2330_v12 = vpop.eup %2329  ;;  %v1795_v3 = vrot.slane %v2789_v60, 7 }
0x146f   :  { %v2332_v16 = vpop.eup %2331 }
0x1470   :  { %v2334_v39 = vpop.eup %2333 }
0x1471   :  { %1814 = vrot.lane.b32.xlu1 %v2330_v12, %s2360_s3  ;;  %v2336_v42 = vpop.eup %2335  ;;  %v1774_v10 = vadd.f32 1.0, %v2334_v39 }
0x1472   :  { %1816 = vrot.lane.b32.xlu0 %v2332_v16, %s2360_s3  ;;  %v2338_v41 = vpop.eup %2337  ;;  %v1775_v14 = vadd.f32 1.0, %v2336_v42 }
0x1473   :  { %v2340_v5 = vpop.eup %2339  ;;  %v1776_v11 = vadd.f32 1.0, %v2338_v41  ;;  %2341 = vrcp.f32 %v1774_v10 }
0x1474   :  { %2343 = vrcp.f32 %v1775_v14  ;;  %v1777_v33 = vadd.f32 1.0, %v2340_v5 }
0x1475   :  { %2345 = vrcp.f32 %v1776_v11 }
0x1476   :  { %2347 = vrcp.f32 %v1777_v33 }
0x147d   :  { %v2829_v31 = vpop.eup %2341 }
0x147e   :  { %v2831_v2 = vpop.eup %2343  ;;  %v1802_v12 = vmul.f32 %v2829_v31, %v1794_v46 }
0x147f   :  { %v2836_v55 = vpop.eup %2345  ;;  %v1803_v16 = vmul.f32 %v2831_v2, %v1795_v3 }
0x1480   :  { %v2840_v8 = vpop.eup %2347 }
0x1481   :  { %v1805_v60 = vmul.f32 %v2840_v8, %v1797_v27 }
0x14df   :  { %v1811_v52 = vpop.permute.xlu1 %1810 }
0x14e0   :  { %v1813_v54 = vpop.permute.xlu0 %1812  ;;  %v1822_v47 = vmul.f32 %v2829_v31, %v1811_v52 }
0x14e1   :  { %v1823_v51 = vmul.f32 %v2831_v2, %v1813_v54 }
0x14e2   :  { %1830 = vrot.lane.b32.xlu1 %v1822_v47, %s2361_s6 }
0x14e3   :  { %1832 = vrot.lane.b32.xlu0 %v1823_v51, %s2361_s6  ;;  %v1815_v4 = vpop.permute.xlu1 %1814 }
0x14e4   :  { %v1824_v1 = vmul.f32 %v2836_v55, %v1815_v4  ;;  %v1817_v59 = vpop.permute.xlu0 %1816 }
0x14e5   :  { %v1825_v45 = vmul.f32 %v2840_v8, %v1817_v59 }
0x14e6   :  { %1834 = vrot.lane.b32.xlu1 %v1824_v1, %s2361_s6 }
0x14e7   :  { %1836 = vrot.lane.b32.xlu0 %v1825_v45, %s2361_s6 }
0x14ea   :  { %317 = vrot.lane.b32.xlu1 %v2486_v28, %s2361_s6  ;;  %v1804_v28 = vmul.f32 %v2836_v55, %v1796_v24 }
0x14eb   :  { %319 = vrot.lane.b32.xlu0 %v2482_v22, %s2361_s6 }
0x1554   :  { %v1831_v19 = vpop.permute.xlu1 %1830 }
0x1555   :  { %v1833_v37 = vpop.permute.xlu0 %1832  ;;  %v1842_v57 = vadd.f32 %v1831_v19, %v1802_v12 }
0x1556   :  { %v1843_v30 = vadd.f32 %v1833_v37, %v1803_v16 }
0x1557   :  { %2349 = vtanh.f32 %v1842_v57 }
0x1558   :  { %2351 = vtanh.f32 %v1843_v30  ;;  %v1835_v22 = vpop.permute.xlu1 %1834 }
0x1559   :  { %v1844_v58 = vadd.f32 %v1835_v22, %v1804_v28  ;;  %v1837_v9 = vpop.permute.xlu0 %1836 }
0x155a   :  { %v1845_v35 = vadd.f32 %v1837_v9, %v1805_v60 }
0x155b   :  { %2353 = vtanh.f32 %v1844_v58 }
0x155c   :  { %v318_v39 = vpop.permute.xlu1 %317  ;;  %2355 = vtanh.f32 %v1845_v35 }
0x155d   :  { %330 = vst.msk [vmem:[%s3025_s4] sm:$0x1] %vm329_vm6, %v318_v39  ;;  %v320_v15 = vpop.permute.xlu0 %319 }
0x155e   :  { %331 = vst.msk [vmem:[%s3025_s4 + $0x8] sm:$0x1] %vm329_vm6, %v320_v15 }
0x1561   :  { %v2350_v49 = vpop.eup %2349 }
0x1562   :  { %v2352_v42 = vpop.eup %2351  ;;  %1854 = vrot.lane.b32.xlu1 %v2350_v49, %s2360_s3 }
0x1563   :  { %1856 = vrot.lane.b32.xlu0 %v2352_v42, %s2360_s3 }
0x1565   :  { %v2354_v10 = vpop.eup %2353 }
0x1566   :  { %1858 = vrot.lane.b32.xlu1 %v2354_v10, %s2360_s3  ;;  %v2356_v41 = vpop.eup %2355 }
0x1567   :  { %1860 = vrot.lane.b32.xlu0 %v2356_v41, %s2360_s3 }
0x156a   :  { %321 = vrot.lane.b32.xlu1 %v2484_v25, %s2361_s6 }
0x156b   :  { %323 = vrot.lane.b32.xlu0 %v2490_v32, %s2361_s6 }
0x156e   :  { %541 = vrot.lane.b32.xlu1 %v2537_v48, %s2361_s6 }
0x156f   :  { %543 = vrot.lane.b32.xlu0 %v2542_v53, %s2361_s6 }
0x1572   :  { %545 = vrot.lane.b32.xlu1 %v2539_v50, %s2361_s6 }
0x1573   :  { %547 = vrot.lane.b32.xlu0 %v2545_v56, %s2361_s6 }
0x1576   :  { %762 = vrot.lane.b32.xlu1 %v2592_v23, %s2361_s6 }
0x1577   :  { %764 = vrot.lane.b32.xlu0 %v2594_v29, %s2361_s6 }
0x157a   :  { %766 = vrot.lane.b32.xlu1 %v2598_v34, %s2361_s6 }
0x157b   :  { %768 = vrot.lane.b32.xlu0 %v2601_v38, %s2361_s6 }
0x157e   :  { %983 = vrot.lane.b32.xlu1 %v2649_v7, %s2361_s6 }
0x157f   :  { %985 = vrot.lane.b32.xlu0 %v2647_v6, %s2361_s6 }
0x1582   :  { %987 = vrot.lane.b32.xlu1 %v2653_v40, %s2361_s6 }
0x1583   :  { %989 = vrot.lane.b32.xlu0 %v2656_v18, %s2361_s6 }
0x1586   :  { %1205 = vrot.lane.b32.xlu1 %v2701_v62, %s2361_s6 }
0x1587   :  { %1207 = vrot.lane.b32.xlu0 %v2703_v63, %s2361_s6 }
0x158a   :  { %1209 = vrot.lane.b32.xlu1 %v2707_v13, %s2361_s6 }
0x158b   :  { %1211 = vrot.lane.b32.xlu0 %v2710_v21, %s2361_s6 }
0x158e   :  { %1428 = vrot.lane.b32.xlu1 %v2755_v17, %s2361_s6 }
0x158f   :  { %1430 = vrot.lane.b32.xlu0 %v2757_v61, %s2361_s6 }
0x1592   :  { %1432 = vrot.lane.b32.xlu1 %v2761_v44, %s2361_s6 }
0x1593   :  { %1434 = vrot.lane.b32.xlu0 %v2764_v20, %s2361_s6 }
0x1596   :  { %1651 = vrot.lane.b32.xlu1 %v2804_v36, %s2361_s6 }
0x1597   :  { %1653 = vrot.lane.b32.xlu0 %v2806_v26, %s2361_s6 }
0x159a   :  { %1655 = vrot.lane.b32.xlu1 %v2810_v43, %s2361_s6 }
0x159b   :  { %1657 = vrot.lane.b32.xlu0 %v2813_v0, %s2361_s6 }
0x15d4   :  { %v1855_v25 = vpop.permute.xlu1 %1854 }
0x15d5   :  { %v1857_v32 = vpop.permute.xlu0 %1856  ;;  %v1866_v48 = vmul.f32 %v2829_v31, %v1855_v25 }
0x15d6   :  { %v1867_v50 = vmul.f32 %v2831_v2, %v1857_v32 }
0x15d7   :  { %1874 = vrot.lane.b32.xlu1 %v1866_v48, %s2361_s6 }
0x15d8   :  { %1876 = vrot.lane.b32.xlu0 %v1867_v50, %s2361_s6  ;;  %v1859_v53 = vpop.permute.xlu1 %1858 }
0x15d9   :  { %v1868_v56 = vmul.f32 %v2836_v55, %v1859_v53  ;;  %v1861_v23 = vpop.permute.xlu0 %1860 }
0x15da   :  { %v1869_v29 = vmul.f32 %v2840_v8, %v1861_v23 }
0x15db   :  { %1878 = vrot.lane.b32.xlu1 %v1868_v56, %s2361_s6 }
0x15dc   :  { %v322_v34 = vpop.permute.xlu1 %321  ;;  %1880 = vrot.lane.b32.xlu0 %v1869_v29, %s2361_s6 }
0x15dd   :  { %332 = vst.msk [vmem:[%s3025_s4 + $0x10] sm:$0x1] %vm329_vm6, %v322_v34  ;;  %v324_v38 = vpop.permute.xlu0 %323 }
0x15de   :  { %333 = vst.msk [vmem:[%s3025_s4 + $0x18] sm:$0x1] %vm329_vm6, %v324_v38 }
0x15e0   :  { %v542_v6 = vpop.permute.xlu1 %541 }
0x15e1   :  { %554 = vst.msk [vmem:[%s3025_s4] sm:$0x2] %vm553_vm7, %v542_v6  ;;  %v544_v7 = vpop.permute.xlu0 %543 }
0x15e2   :  { %555 = vst.msk [vmem:[%s3025_s4 + $0x8] sm:$0x2] %vm553_vm7, %v544_v7 }
0x15e4   :  { %v546_v40 = vpop.permute.xlu1 %545 }
0x15e5   :  { %556 = vst.msk [vmem:[%s3025_s4 + $0x10] sm:$0x2] %vm553_vm7, %v546_v40  ;;  %v548_v18 = vpop.permute.xlu0 %547 }
0x15e6   :  { %557 = vst.msk [vmem:[%s3025_s4 + $0x18] sm:$0x2] %vm553_vm7, %v548_v18 }
0x15e8   :  { %v763_v62 = vpop.permute.xlu1 %762 }
0x15e9   :  { %775 = vst.msk [vmem:[%s3025_s4] sm:$0x4] %vm774_vm8, %v763_v62  ;;  %v765_v63 = vpop.permute.xlu0 %764 }
0x15ea   :  { %776 = vst.msk [vmem:[%s3025_s4 + $0x8] sm:$0x4] %vm774_vm8, %v765_v63 }
0x15ec   :  { %v767_v13 = vpop.permute.xlu1 %766 }
0x15ed   :  { %777 = vst.msk [vmem:[%s3025_s4 + $0x10] sm:$0x4] %vm774_vm8, %v767_v13  ;;  %v769_v21 = vpop.permute.xlu0 %768 }
0x15ee   :  { %778 = vst.msk [vmem:[%s3025_s4 + $0x18] sm:$0x4] %vm774_vm8, %v769_v21 }
0x15f0   :  { %v984_v17 = vpop.permute.xlu1 %983 }
0x15f1   :  { %996 = vst.msk [vmem:[%s3025_s4] sm:$0x8] %vm995_vm9, %v984_v17  ;;  %v986_v61 = vpop.permute.xlu0 %985 }
0x15f2   :  { %997 = vst.msk [vmem:[%s3025_s4 + $0x8] sm:$0x8] %vm995_vm9, %v986_v61 }
0x15f4   :  { %v988_v44 = vpop.permute.xlu1 %987 }
0x15f5   :  { %998 = vst.msk [vmem:[%s3025_s4 + $0x10] sm:$0x8] %vm995_vm9, %v988_v44  ;;  %v990_v20 = vpop.permute.xlu0 %989 }
0x15f6   :  { %999 = vst.msk [vmem:[%s3025_s4 + $0x18] sm:$0x8] %vm995_vm9, %v990_v20 }
0x15f8   :  { %v1206_v36 = vpop.permute.xlu1 %1205 }
0x15f9   :  { %1218 = vst.msk [vmem:[%s3025_s4] sm:$0x10] %vm1217_vm10, %v1206_v36  ;;  %v1208_v26 = vpop.permute.xlu0 %1207 }
0x15fa   :  { %1219 = vst.msk [vmem:[%s3025_s4 + $0x8] sm:$0x10] %vm1217_vm10, %v1208_v26 }
0x15fc   :  { %v1210_v43 = vpop.permute.xlu1 %1209 }
0x15fd   :  { %1220 = vst.msk [vmem:[%s3025_s4 + $0x10] sm:$0x10] %vm1217_vm10, %v1210_v43  ;;  %v1212_v0 = vpop.permute.xlu0 %1211 }
0x15fe   :  { %1221 = vst.msk [vmem:[%s3025_s4 + $0x18] sm:$0x10] %vm1217_vm10, %v1212_v0 }
0x1600   :  { %v1429_v14 = vpop.permute.xlu1 %1428 }
0x1601   :  { %1441 = vst.msk [vmem:[%s3025_s4] sm:$0x20] %vm1440_vm11, %v1429_v14  ;;  %v1431_v5 = vpop.permute.xlu0 %1430 }
0x1602   :  { %1442 = vst.msk [vmem:[%s3025_s4 + $0x8] sm:$0x20] %vm1440_vm11, %v1431_v5 }
0x1604   :  { %v1433_v11 = vpop.permute.xlu1 %1432 }
0x1605   :  { %1443 = vst.msk [vmem:[%s3025_s4 + $0x10] sm:$0x20] %vm1440_vm11, %v1433_v11  ;;  %v1435_v33 = vpop.permute.xlu0 %1434 }
0x1606   :  { %1444 = vst.msk [vmem:[%s3025_s4 + $0x18] sm:$0x20] %vm1440_vm11, %v1435_v33 }
0x1608   :  { %v1652_v31 = vpop.permute.xlu1 %1651 }
0x1609   :  { %1664 = vst.msk [vmem:[%s3025_s4] sm:$0x40] %vm1663_vm12, %v1652_v31  ;;  %v1654_v52 = vpop.permute.xlu0 %1653 }
0x160a   :  { %1665 = vst.msk [vmem:[%s3025_s4 + $0x8] sm:$0x40] %vm1663_vm12, %v1654_v52 }
0x160c   :  { %v1656_v2 = vpop.permute.xlu1 %1655 }
0x160d   :  { %1666 = vst.msk [vmem:[%s3025_s4 + $0x10] sm:$0x40] %vm1663_vm12, %v1656_v2  ;;  %v1658_v54 = vpop.permute.xlu0 %1657 }
0x160e   :  { %1667 = vst.msk [vmem:[%s3025_s4 + $0x18] sm:$0x40] %vm1663_vm12, %v1658_v54 }
0x1649   :  { %v1875_v47 = vpop.permute.xlu1 %1874 }
0x164a   :  { %v1877_v51 = vpop.permute.xlu0 %1876  ;;  %1887 = vst.msk [vmem:[%s3025_s4] sm:$0x80] %vm1886_vm13, %v1875_v47 }
0x164b   :  { %1888 = vst.msk [vmem:[%s3025_s4 + $0x8] sm:$0x80] %vm1886_vm13, %v1877_v51 }
0x164d   :  { %v1879_v55 = vpop.permute.xlu1 %1878 }
0x164e   :  { %1889 = vst.msk [vmem:[%s3025_s4 + $0x10] sm:$0x80] %vm1886_vm13, %v1879_v55  ;;  %v1881_v4 = vpop.permute.xlu0 %1880 }
0x164f   :  { %1890 = vst.msk [vmem:[%s3025_s4 + $0x18] sm:$0x80] %vm1886_vm13, %v1881_v4 }

// kernel: fp_sam_encoder.4
= control target key start
LH: loop header
LB: loop body
LE: loop exit
PB: predicated region body
PF: predicated region fallthrough
CT: control target
= control target key end

     0   :  { %s2773_s25 = smov 0   ;;  %s3035_s0 = inlined_call_operand.vmem [shape: f32[4,8,32], index: 0, kind: input, shape index: {}]   ;;  %s3036_s1 = inlined_call_operand.vmem [shape: f32[32,96], index: 1, kind: input, shape index: {}]   ;;  %s3037_s2 = inlined_call_operand.vmem [shape: f32[1,96], index: 2, kind: input, shape index: {}]   ;;  %s3038_s3 = inlined_call_operand.vmem [shape: f32[32,32], index: 3, kind: input, shape index: {}]   ;;  %s3039_s4 = inlined_call_operand.vmem [shape: f32[1,32], index: 4, kind: input, shape index: {}]   ;;  %s3040_s5 = inlined_call_operand.vmem [shape: f32[1,32], index: 5, kind: input, shape index: {}]   ;;  %s3041_s6 = inlined_call_operand.vmem [shape: f32[1,32], index: 6, kind: input, shape index: {}]   ;;  %s3042_s7 = inlined_call_operand.vmem [shape: f32[32,64], index: 7, kind: input, shape index: {}]   ;;  %s3043_s8 = inlined_call_operand.vmem [shape: f32[1,64], index: 8, kind: input, shape index: {}]   ;;  %s3044_s9 = inlined_call_operand.vmem [shape: f32[64,32], index: 9, kind: input, shape index: {}]   ;;  %s3045_s10 = inlined_call_operand.vmem [shape: f32[1,32], index: 10, kind: input, shape index: {}]   ;;  %s3046_s11 = inlined_call_operand.vmem [shape: f32[1,32], index: 11, kind: input, shape index: {}]   ;;  %s3047_s12 = inlined_call_operand.vmem [shape: f32[1,32], index: 12, kind: input, shape index: {}]   ;;  %s3048_s13 = inlined_call_operand.vmem [shape: f32[4,8,32], index: 13, kind: output, shape index: {}]  }
   0x1 LB: > { %s2332_s26 = sadd.s32 4294967295, %s2685_s25   ;;  %p2336_p0 = scmp.ge.s32.totalorder %s2685_s25, 1  ;;  %s2685_s25 = sphi %s2773_s25, %s23_s25  }
   0x2   : > { %p388_p1 = scmp.lt.s32.totalorder %s2685_s25, 3 }
   0x4   : > { %p389_p2 = pnand %p2336_p0, %p388_p1 }
   0x5   : > { %v446_v0 = vld [vmem:[%s3036_s1] sm:$0xff] (!%p389_p2)  ;;  %v447_v1 = vld [vmem:[%s3036_s1 + $0x8] sm:$0xff] (!%p389_p2)  ;;  %v448_v2 = vld [vmem:[%s3036_s1 + $0x10] sm:$0xff] (!%p389_p2)  ;;  %s2337_s16 = sshll.u32 (!%p389_p2), %s2332_s26, 1  ;;  %vm457_vm0 = vcmask (!%p389_p2), 261120   ;;  %v2687_v8 = vmov (!%p389_p2), 0.0  }
   0x6   : > { %392 = sbr.rel (%p389_p2) target bundleno = 4090 (0xffa), region = 72  ;;  %v2575_v3 = vpack.c.bf16 (!%p389_p2), %v447_v1, %v446_v0  ;;  %v449_v4 = vld [vmem:[%s3036_s1 + $0x18] sm:$0xff] (!%p389_p2)  ;;  %p433_p3 = scmp.lt.s32.totalorder (!%p389_p2), %s2337_s16, 3  ;;  %2464 = vmatprep.subr.mxu0 (!%p389_p2), %v2687_v8  ;;  %vm2688_vm1 = vmmov (!%p389_p2), 0   ;;  %v2341_v9 = vld [vmem:[%s3037_s2] ss:$0 sm:$0xff] (!%p389_p2) }
   0x7   : > { %v2579_v5 = vpack.c.bf16 (!%p389_p2), %v449_v4, %v448_v2  ;;  %2466 = vmatprep.mubr.msk.f32.mxu0 (!%p389_p2), %vm2688_vm1, %v2687_v8  ;;  %s2689_s26 = smov (!%p389_p2), 96   ;;  %vm542_vm2 = vcmask (!%p389_p2), 64512   ;;  %s2690_s27 = smov (!%p389_p2), 64   ;;  %vm1895_vm3 = vcmask (!%p389_p2), 195584   ;;  %vm1892_vm4 = vcmask (!%p389_p2), 130048  }
   0x8   : > { %2576 = vmatprep.subr.bf16.mxu1 (!%p389_p2), %v2575_v3  ;;  %s2691_s28 = smov (!%p389_p2), 88   ;;  %s2692_s29 = smov (!%p389_p2), 120   ;;  %vm2146_vm5 = vcmask (!%p389_p2), 523264  }
   0x9   : > { %2578 = vmatpush3.bf16.msra.mxu1 (!%p389_p2), %v2575_v3  ;;  %s2693_s30 = smov (!%p389_p2), 56   ;;  %s2694_s14 = smov (!%p389_p2), 80  }
   0xa   : > { %2580 = vmatprep.subr.bf16.mxu1 (!%p389_p2), %v2579_v5  ;;  %s2695_s15 = smov (!%p389_p2), 112   ;;  %s2696_s17 = smov (!%p389_p2), 48  }
   0xb   : > { %s2697_s18 = smov (!%p389_p2), 72   ;;  %s2698_s20 = smov (!%p389_p2), 104  }
   0xc   : > { %s2699_s21 = smov (!%p389_p2), 40   ;;  %s2701_s23 = smov (!%p389_p2), 16  }
   0xd   : > { %s3050_s16 = smov (!%p433_p3, %s2337_s16), 3  ;;  %2582 = vmatpush3.bf16.msra.mxu1 %v2579_v5 }
   0xe   : > { %s2338_s19 = sshll.u32 %s3050_s16, 3  ;;  %2454 = vmatprep.subr.mxu1 %v2687_v8 }
   0xf   : > { %s436_s22 = scalar_lea.vmem %s3035_s0, %s2338_s19 }
  0x10   : > { %v2801_v6 = vld [vmem:[%s436_s22] sm:$0xff]  ;;  %v2803_v7 = vld [vmem:[%s436_s22 + $0x8] sm:$0xff]  ;;  %s2700_s22 = smov 8  }
  0x11   : > { %2451 = vmatprep.mubr.msk.f32.mxu1 %vm457_vm0, %v2801_v6 }
  0x12   : > { %2452 = vmatmul.mubr.msk.f32.vlgmr.msra.gmra.mrb[0].mxu1 %vm457_vm0, %v2803_v7 }
  0x13   : > { %2456 = vmatprep.mubr.msk.f32.mxu1 %vm2688_vm1, %v2687_v8 }
  0xe5   : > { %v2453_v10 = vpop.f32.mrb[0].mxu1 }
  0xe6   : > { %v530_v11 = vpop.f32.mrb[1].mxu1  ;;  %v2821_v13 = vadd.f32 %v2453_v10, %v2341_v9 }
  0xe7   : > { %v2818_v12 = vadd.f32 %v2341_v9, %v530_v11 }
  0xe9   : > { %540 = vrot.lane.b32.xlu0 %v2818_v12, %s2689_s26 }
  0xed   : > { %618 = vrot.lane.b32.xlu0 %v2821_v13, %s2689_s26 }
 0x15b   : > { %v541_v14 = vpop.permute.xlu0 %540 }
 0x15c   : > { %2455 = vmatpush3.xpose.msk.msra.mxu1 %vm542_vm2, %v541_v14 }
 0x15d   : > { %2459 = vmatprep.subr.mxu1 %v2687_v8 }
 0x15f   : > { %2457 = vmatmul.mubr.msk.f32.vlgmr.msra.gmra.mrb[2].mxu1 %vm542_vm2, %v2818_v12  ;;  %v619_v15 = vpop.permute.xlu0 %618 }
 0x160   : > { %2460 = vmatpush3.xpose.msk.msra.mxu1 %vm542_vm2, %v619_v15  ;;  %2461 = vmatprep.mubr.msk.f32.mxu1 %vm2688_vm1, %v2687_v8 }
 0x161   : > { %2469 = vmatprep.subr.mxu1 %v2687_v8 }
 0x163   : > { %2462 = vmatmul.mubr.msk.f32.vlgmr.msra.gmra.mrb[4].mxu1 %vm542_vm2, %v2821_v13 }
 0x164   : > { %2471 = vmatprep.mubr.msk.f32.mxu1 %vm2688_vm1, %v2687_v8 }
 0x232   : > { %v613_v16 = vpop.f32.mrb[2].mxu1 }
 0x233   : > { %v694_v17 = vmul.f32 0.35355338, %v613_v16  ;;  %v2458_v18 = vpop.f32.mrb[3].mxu1 }
 0x235   : > { %v696_v19 = vsel %vm542_vm2, %v694_v17, -inf }
 0x236   : > { %697 = vmax.xlane.f32.xlu1 %v696_v19  ;;  %v690_v20 = vpop.f32.mrb[4].mxu1 }
 0x237   : > { %v695_v21 = vmul.f32 0.35355338, %v690_v20  ;;  %v2463_v22 = vpop.f32.mrb[5].mxu1 }
 0x239   : > { %v699_v23 = vsel %vm542_vm2, %v695_v21, -inf }
 0x23a   : > { %700 = vmax.xlane.f32.xlu1 %v699_v23 }
 0x24b   : > { %718 = vrot.lane.b32.xlu1 %v2818_v12, %s2690_s27 }
 0x24f   : > { %794 = vrot.lane.b32.xlu1 %v2821_v13, %s2690_s27 }
 0x253   : > { %872 = vrot.lane.b32.xlu1 %v2818_v12, %s2691_s28 }
 0x257   : > { %950 = vrot.lane.b32.xlu1 %v2821_v13, %s2691_s28 }
 0x2c3   : > { %v698_v24 = vpop.xlane.xlu1 %697 }
 0x2c4   : > { %v702_v25 = vsub.f32 %v694_v17, %v698_v24 }
 0x2c6   : > { %v704_v26 = vmul.f32 1.442695, %v702_v25 }
 0x2c7   : > { %v701_v27 = vpop.xlane.xlu1 %700 }
 0x2c8   : > { %2639 = vpow2.f32 %v704_v26  ;;  %v703_v28 = vsub.f32 %v695_v21, %v701_v27 }
 0x2ca   : > { %v706_v29 = vmul.f32 1.442695, %v703_v28 }
 0x2cb   : > { %v719_v30 = vpop.permute.xlu1 %718 }
 0x2cc   : > { %2641 = vpow2.f32 %v706_v29  ;;  %2465 = vmatpush3.msra.mxu0 %v719_v30 }
 0x2cd   : > { %2474 = vmatprep.subr.mxu0 %v2687_v8 }
 0x2cf   : > { %v795_v31 = vpop.permute.xlu1 %794 }
 0x2d0   : > { %2470 = vmatpush3.msra.mxu1 %v795_v31 }
 0x2d1   : > { %2479 = vmatprep.subr.mxu1 %v2687_v8 }
 0x2d2   : > { %v2640_v32 = vpop.eup %2639 }
 0x2d3   : > { %v708_v33 = vsel %vm542_vm2, %v2640_v32, 0.0  ;;  %v873_v36 = vpop.permute.xlu1 %872 }
 0x2d4   : > { %709 = vadd.xlane.f32.xlu0 %v708_v33 }
 0x2d6   : > { %v2642_v34 = vpop.eup %2641 }
 0x2d7   : > { %v711_v35 = vsel %vm542_vm2, %v2642_v34, 0.0  ;;  %v951_v37 = vpop.permute.xlu1 %950 }
 0x2d8   : > { %712 = vadd.xlane.f32.xlu1 %v711_v35 }
 0x2e9   : > { %948 = vrot.lane.b32.xlu1 %v2821_v13, %s2692_s29 }
 0x2ea   : > { %870 = vrot.lane.b32.xlu0 %v2818_v12, %s2692_s29 }
 0x361   : > { %v710_v38 = vpop.xlane.xlu0 %709 }
 0x362   : > { %2643 = vrcp.f32 %v710_v38 }
 0x365   : > { %v713_v39 = vpop.xlane.xlu1 %712  ;;  %v871_v44 = vpop.permute.xlu0 %870 }
 0x366   : > { %2645 = vrcp.f32 %v713_v39 }
 0x369   : > { %v949_v45 = vpop.permute.xlu1 %948 }
 0x36c   : > { %v2644_v40 = vpop.eup %2643 }
 0x36d   : > { %v715_v41 = vmul.f32 %v2644_v40, %v2640_v32 }
 0x36f   : > { %2467 = vmatmul.mubr.msk.f32.vlgmr.msra.gmra.mrb[0].mxu0 %vm542_vm2, %v715_v41 }
 0x370   : > { %v2646_v42 = vpop.eup %2645  ;;  %2475 = vmatpush3.xpose.msk.msra.mxu0 %vm542_vm2, %v873_v36  ;;  %2476 = vmatprep.mubr.msk.f32.mxu0 %vm2688_vm1, %v2687_v8 }
 0x371   : > { %v717_v43 = vmul.f32 %v2646_v42, %v2642_v34  ;;  %2484 = vmatprep.subr.mxu0 %v2687_v8 }
 0x373   : > { %2472 = vmatmul.mubr.msk.f32.vlgmr.msra.gmra.mrb[6].mxu1 %vm542_vm2, %v717_v43  ;;  %2477 = vmatmul.mubr.msk.f32.vlgmr.msra.gmra.mrb[2].mxu0 %vm542_vm2, %v871_v44 }
 0x374   : > { %2480 = vmatpush3.xpose.msk.msra.mxu1 %vm542_vm2, %v951_v37  ;;  %2481 = vmatprep.mubr.msk.f32.mxu1 %vm2688_vm1, %v2687_v8 }
 0x375   : > { %2489 = vmatprep.subr.mxu1 %v2687_v8  ;;  %2486 = vmatprep.mubr.msk.f32.mxu0 %vm2688_vm1, %v2687_v8 }
 0x377   : > { %2482 = vmatmul.mubr.msk.f32.vlgmr.msra.gmra.mrb[8].mxu1 %vm542_vm2, %v949_v45 }
 0x378   : > { %2491 = vmatprep.mubr.msk.f32.mxu1 %vm2688_vm1, %v2687_v8 }
 0x442   : > { %v2864_v46 = vpop.f32.mrb[0].mxu0 }
 0x443   : > { %v2468_v47 = vpop.f32.mrb[1].mxu0 }
 0x446   : > { %v2866_v48 = vpop.f32.mrb[6].mxu1  ;;  %v944_v49 = vpop.f32.mrb[2].mxu0 }
 0x447   : > { %v1026_v50 = vmul.f32 0.35355338, %v944_v49  ;;  %v2473_v51 = vpop.f32.mrb[7].mxu1  ;;  %v2478_v52 = vpop.f32.mrb[3].mxu0 }
 0x449   : > { %v1028_v53 = vsel %vm542_vm2, %v1026_v50, -inf }
 0x44a   : > { %v1022_v54 = vpop.f32.mrb[8].mxu1  ;;  %1029 = vmax.xlane.f32.xlu1 %v1028_v53 }
 0x44b   : > { %v1027_v55 = vmul.f32 0.35355338, %v1022_v54  ;;  %v2483_v56 = vpop.f32.mrb[9].mxu1 }
 0x44d   : > { %v1031_v57 = vsel %vm542_vm2, %v1027_v55, -inf }
 0x44e   : > { %1032 = vmax.xlane.f32.xlu0 %v1031_v57 }
 0x45b   : > { %1050 = vrot.lane.b32.xlu1 %v2818_v12, %s2693_s30 }
 0x45f   : > { %1204 = vrot.lane.b32.xlu1 %v2818_v12, %s2694_s14 }
 0x463   : > { %1282 = vrot.lane.b32.xlu1 %v2821_v13, %s2694_s14 }
 0x464   : > { %1126 = vrot.lane.b32.xlu0 %v2821_v13, %s2693_s30 }
 0x468   : > { %1202 = vrot.lane.b32.xlu0 %v2818_v12, %s2695_s15 }
 0x4d7   : > { %v1030_v58 = vpop.xlane.xlu1 %1029 }
 0x4d8   : > { %v1034_v59 = vsub.f32 %v1026_v50, %v1030_v58 }
 0x4da   : > { %v1036_v60 = vmul.f32 1.442695, %v1034_v59 }
 0x4db   : > { %v1051_v61 = vpop.permute.xlu1 %1050  ;;  %v1033_v62 = vpop.xlane.xlu0 %1032 }
 0x4dc   : > { %2647 = vpow2.f32 %v1036_v60  ;;  %v1035_v63 = vsub.f32 %v1027_v55, %v1033_v62  ;;  %2485 = vmatpush3.msra.mxu0 %v1051_v61 }
 0x4dd   : > { %2494 = vmatprep.subr.mxu0 %v2687_v8 }
 0x4de   : > { %v1038_v0 = vmul.f32 1.442695, %v1035_v63 }
 0x4df   : > { %v1127_v1 = vpop.permute.xlu0 %1126  ;;  %v1205_v9 = vpop.permute.xlu1 %1204 }
 0x4e0   : > { %2649 = vpow2.f32 %v1038_v0  ;;  %2490 = vmatpush3.msra.mxu1 %v1127_v1 }
 0x4e1   : > { %2499 = vmatprep.subr.mxu1 %v2687_v8 }
 0x4e3   : > { %v1283_v10 = vpop.permute.xlu1 %1282  ;;  %v1203_v19 = vpop.permute.xlu0 %1202 }
 0x4e6   : > { %v2648_v2 = vpop.eup %2647 }
 0x4e7   : > { %v1040_v3 = vsel %vm542_vm2, %v2648_v2, 0.0 }
 0x4e8   : > { %1041 = vadd.xlane.f32.xlu1 %v1040_v3 }
 0x4ea   : > { %v2650_v4 = vpop.eup %2649 }
 0x4eb   : > { %v1043_v5 = vsel %vm542_vm2, %v2650_v4, 0.0 }
 0x4ec   : > { %1044 = vadd.xlane.f32.xlu1 %v1043_v5 }
 0x4fd   : > { %1280 = vrot.lane.b32.xlu1 %v2821_v13, %s2695_s15  ;;  %s442_s15 = scalar_lea.vmem %s3048_s13, %s2338_s19 }
 0x575   : > { %v1042_v11 = vpop.xlane.xlu1 %1041 }
 0x576   : > { %2651 = vrcp.f32 %v1042_v11 }
 0x579   : > { %v1045_v14 = vpop.xlane.xlu1 %1044 }
 0x57a   : > { %2653 = vrcp.f32 %v1045_v14 }
 0x57d   : > { %v1281_v20 = vpop.permute.xlu1 %1280 }
 0x580   : > { %v2652_v15 = vpop.eup %2651 }
 0x581   : > { %v1047_v16 = vmul.f32 %v2652_v15, %v2648_v2 }
 0x583   : > { %2487 = vmatmul.mubr.msk.f32.vlgmr.msra.gmra.mrb[4].mxu0 %vm542_vm2, %v1047_v16 }
 0x584   : > { %v2654_v17 = vpop.eup %2653  ;;  %2495 = vmatpush3.xpose.msk.msra.mxu0 %vm542_vm2, %v1205_v9  ;;  %2496 = vmatprep.mubr.msk.f32.mxu0 %vm2688_vm1, %v2687_v8 }
 0x585   : > { %v1049_v18 = vmul.f32 %v2654_v17, %v2650_v4  ;;  %2504 = vmatprep.subr.mxu0 %v2687_v8 }
 0x587   : > { %2492 = vmatmul.mubr.msk.f32.vlgmr.msra.gmra.mrb[10].mxu1 %vm542_vm2, %v1049_v18  ;;  %2497 = vmatmul.mubr.msk.f32.vlgmr.msra.gmra.mrb[6].mxu0 %vm542_vm2, %v1203_v19 }
 0x588   : > { %2500 = vmatpush3.xpose.msk.msra.mxu1 %vm542_vm2, %v1283_v10  ;;  %2501 = vmatprep.mubr.msk.f32.mxu1 %vm2688_vm1, %v2687_v8 }
 0x589   : > { %2509 = vmatprep.subr.mxu1 %v2687_v8  ;;  %2506 = vmatprep.mubr.msk.f32.mxu0 %vm2688_vm1, %v2687_v8 }
 0x58b   : > { %2502 = vmatmul.mubr.msk.f32.vlgmr.msra.gmra.mrb[12].mxu1 %vm542_vm2, %v1281_v20 }
 0x58c   : > { %2511 = vmatprep.mubr.msk.f32.mxu1 %vm2688_vm1, %v2687_v8 }
 0x656   : > { %v2896_v21 = vpop.f32.mrb[4].mxu0 }
 0x657   : > { %v2488_v22 = vpop.f32.mrb[5].mxu0 }
 0x65a   : > { %v2898_v23 = vpop.f32.mrb[10].mxu1  ;;  %v1276_v24 = vpop.f32.mrb[6].mxu0 }
 0x65b   : > { %v1358_v25 = vmul.f32 0.35355338, %v1276_v24  ;;  %v2493_v26 = vpop.f32.mrb[11].mxu1  ;;  %v2498_v27 = vpop.f32.mrb[7].mxu0 }
 0x65c   : > { %v1898_v26 = vld [vmem:[%s3038_s3] sm:$0xff] }
 0x65d   : > { %v1360_v28 = vsel %vm542_vm2, %v1358_v25, -inf }
 0x65e   : > { %v1354_v29 = vpop.f32.mrb[12].mxu1  ;;  %1361 = vmax.xlane.f32.xlu0 %v1360_v28  ;;  %v1900_v28 = vld [vmem:[%s3038_s3 + $0x10] sm:$0xff] }
 0x65f   : > { %v1359_v30 = vmul.f32 0.35355338, %v1354_v29  ;;  %v2503_v31 = vpop.f32.mrb[13].mxu1  ;;  %v1901_v29 = vld [vmem:[%s3038_s3 + $0x18] sm:$0xff] }
 0x661   : > { %v1363_v32 = vsel %vm542_vm2, %v1359_v30, -inf }
 0x662   : > { %1364 = vmax.xlane.f32.xlu1 %v1363_v32 }
 0x673   : > { %1382 = vrot.lane.b32.xlu1 %v2818_v12, %s2696_s17 }
 0x674   : > { %1458 = vrot.lane.b32.xlu0 %v2821_v13, %s2696_s17  ;;  %s2702_s17 = smov 24  }
 0x677   : > { %1536 = vrot.lane.b32.xlu1 %v2818_v12, %s2697_s18 }
 0x67b   : > { %1614 = vrot.lane.b32.xlu1 %v2821_v13, %s2697_s18 }
 0x67f   : > { %1612 = vrot.lane.b32.xlu1 %v2821_v13, %s2698_s20 }
 0x6eb   : > { %v1362_v33 = vpop.xlane.xlu0 %1361 }
 0x6ec   : > { %v1366_v34 = vsub.f32 %v1358_v25, %v1362_v33 }
 0x6ee   : > { %v1368_v35 = vmul.f32 1.442695, %v1366_v34 }
 0x6ef   : > { %v1365_v36 = vpop.xlane.xlu1 %1364  ;;  %v1459_v37 = vpop.permute.xlu0 %1458 }
 0x6f0   : > { %2655 = vpow2.f32 %v1368_v35  ;;  %v1367_v38 = vsub.f32 %v1359_v30, %v1365_v36  ;;  %2510 = vmatpush3.msra.mxu1 %v1459_v37  ;;  %v2587_v30 = vpack.c.bf16 %v1901_v29, %v1900_v28 }
 0x6f1   : > { %2519 = vmatprep.subr.mxu1 %v2687_v8 }
 0x6f2   : > { %v1370_v39 = vmul.f32 1.442695, %v1367_v38 }
 0x6f3   : > { %v1383_v40 = vpop.permute.xlu1 %1382 }
 0x6f4   : > { %2657 = vpow2.f32 %v1370_v39  ;;  %2505 = vmatpush3.msra.mxu0 %v1383_v40 }
 0x6f5   : > { %2514 = vmatprep.subr.mxu0 %v2687_v8 }
 0x6f7   : > { %v1537_v49 = vpop.permute.xlu1 %1536 }
 0x6fa   : > { %v2656_v41 = vpop.eup %2655 }
 0x6fb   : > { %v1372_v42 = vsel %vm542_vm2, %v2656_v41, 0.0  ;;  %v1615_v53 = vpop.permute.xlu1 %1614 }
 0x6fc   : > { %1373 = vadd.xlane.f32.xlu0 %v1372_v42 }
 0x6fe   : > { %v2658_v43 = vpop.eup %2657 }
 0x6ff   : > { %v1375_v44 = vsel %vm542_vm2, %v2658_v43, 0.0  ;;  %v1613_v56 = vpop.permute.xlu1 %1612 }
 0x700   : > { %1376 = vadd.xlane.f32.xlu0 %v1375_v44 }
 0x716   : > { %1534 = vrot.lane.b32.xlu0 %v2818_v12, %s2698_s20 }
 0x789   : > { %v1374_v45 = vpop.xlane.xlu0 %1373 }
 0x78a   : > { %2659 = vrcp.f32 %v1374_v45 }
 0x78d   : > { %v1377_v47 = vpop.xlane.xlu0 %1376 }
 0x78e   : > { %2661 = vrcp.f32 %v1377_v47 }
 0x791   : > { %v1535_v55 = vpop.permute.xlu0 %1534 }
 0x794   : > { %v2660_v50 = vpop.eup %2659 }
 0x795   : > { %v1379_v51 = vmul.f32 %v2660_v50, %v2656_v41 }
 0x797   : > { %2507 = vmatmul.mubr.msk.f32.vlgmr.msra.gmra.mrb[8].mxu0 %vm542_vm2, %v1379_v51 }
 0x798   : > { %v2662_v52 = vpop.eup %2661  ;;  %2515 = vmatpush3.xpose.msk.msra.mxu0 %vm542_vm2, %v1537_v49  ;;  %2516 = vmatprep.mubr.msk.f32.mxu0 %vm2688_vm1, %v2687_v8  ;;  %v2368_v49 = vld [vmem:[%s3039_s4] ss:$0 sm:$0xff] }
 0x799   : > { %v1381_v54 = vmul.f32 %v2662_v52, %v2658_v43  ;;  %2524 = vmatprep.subr.mxu0 %v2687_v8 }
 0x79b   : > { %2512 = vmatmul.mubr.msk.f32.vlgmr.msra.gmra.mrb[14].mxu1 %vm542_vm2, %v1381_v54  ;;  %2517 = vmatmul.mubr.msk.f32.vlgmr.msra.gmra.mrb[10].mxu0 %vm542_vm2, %v1535_v55 }
 0x79c   : > { %2520 = vmatpush3.xpose.msk.msra.mxu1 %vm542_vm2, %v1615_v53  ;;  %2521 = vmatprep.mubr.msk.f32.mxu1 %vm2688_vm1, %v2687_v8 }
 0x79d   : > { %2529 = vmatprep.subr.mxu1 %v2687_v8  ;;  %2526 = vmatprep.mubr.msk.f32.mxu0 %vm2688_vm1, %v2687_v8 }
 0x79f   : > { %2522 = vmatmul.mubr.msk.f32.vlgmr.msra.gmra.mrb[16].mxu1 %vm542_vm2, %v1613_v56 }
 0x7a0   : > { %2531 = vmatprep.mubr.msk.f32.mxu1 %vm2688_vm1, %v2687_v8 }
 0x86a   : > { %v1454_v57 = vpop.f32.mrb[8].mxu0 }
 0x86b   : > { %v2508_v58 = vpop.f32.mrb[9].mxu0 }
 0x86e   : > { %v1530_v59 = vpop.f32.mrb[14].mxu1  ;;  %v1608_v60 = vpop.f32.mrb[10].mxu0 }
 0x86f   : > { %v1690_v61 = vmul.f32 0.35355338, %v1608_v60  ;;  %v2513_v62 = vpop.f32.mrb[15].mxu1  ;;  %v2518_v63 = vpop.f32.mrb[11].mxu0 }
 0x871   : > { %v1692_v0 = vsel %vm542_vm2, %v1690_v61, -inf }
 0x872   : > { %v1686_v1 = vpop.f32.mrb[16].mxu1  ;;  %1693 = vmax.xlane.f32.xlu0 %v1692_v0 }
 0x873   : > { %v1691_v2 = vmul.f32 0.35355338, %v1686_v1  ;;  %v2523_v3 = vpop.f32.mrb[17].mxu1  ;;  %v2038_v1 = vld [vmem:[%s3042_s7 + $0x8] sm:$0xff] }
 0x874   : > { %v2039_v3 = vld [vmem:[%s3042_s7 + $0x10] sm:$0xff] }
 0x875   : > { %v1695_v4 = vsel %vm542_vm2, %v1691_v2, -inf }
 0x876   : > { %1696 = vmax.xlane.f32.xlu1 %v1695_v4  ;;  %v2040_v4 = vld [vmem:[%s3042_s7 + $0x18] sm:$0xff] }
 0x887   : > { %1714 = vrot.lane.b32.xlu1 %v2818_v12, %s2699_s21 }
 0x88b   : > { %1868 = vrot.lane.b32.xlu1 %v2896_v21, %s2700_s22 }
 0x88f   : > { %1870 = vrot.lane.b32.xlu1 %v2898_v23, %s2700_s22 }
 0x893   : > { %1878 = vrot.lane.b32.xlu1 %v1530_v59, %s2701_s23 }
 0x8ff   : > { %v1694_v8 = vpop.xlane.xlu0 %1693 }
 0x900   : > { %v1698_v5 = vsub.f32 %v1690_v61, %v1694_v8  ;;  %v2595_v8 = vpack.c.bf16 %v2040_v4, %v2039_v3  ;;  %v2379_v3 = vld [vmem:[%s3046_s11] ss:$0 sm:$0xff] }
 0x902   : > { %v1700_v9 = vmul.f32 1.442695, %v1698_v5  ;;  %v2131_v5 = vld [vmem:[%s3044_s9] sm:$0xff] }
 0x903   : > { %v1697_v10 = vpop.xlane.xlu1 %1696 }
 0x904   : > { %2663 = vpow2.f32 %v1700_v9  ;;  %v1699_v11 = vsub.f32 %v1691_v2, %v1697_v10  ;;  %v2132_v9 = vld [vmem:[%s3044_s9 + $0x8] sm:$0xff]  ;;  %v2133_v10 = vld [vmem:[%s3044_s9 + $0x10] sm:$0xff] }
 0x906   : > { %v1702_v14 = vmul.f32 1.442695, %v1699_v11  ;;  %v2599_v11 = vpack.c.bf16 %v2132_v9, %v2131_v5  ;;  %v2380_v9 = vld [vmem:[%s3047_s12] ss:$0 sm:$0xff] }
 0x907   : > { %v1715_v15 = vpop.permute.xlu1 %1714 }
 0x908   : > { %2665 = vpow2.f32 %v1702_v14  ;;  %2525 = vmatpush3.msra.mxu0 %v1715_v15  ;;  %v2134_v14 = vld [vmem:[%s3044_s9 + $0x18] sm:$0xff] }
 0x909   : > { %v2603_v15 = vpack.c.bf16 %v2134_v14, %v2133_v10 }
 0x90b   : > { %v1869_v35 = vpop.permute.xlu1 %1868 }
 0x90c   : > { %v1890_v38 = vsel %vm542_vm2, %v2864_v46, %v1869_v35 }
 0x90e   : > { %v2664_v16 = vpop.eup %2663 }
 0x90f   : > { %v1704_v12 = vsel %vm542_vm2, %v2664_v16, 0.0  ;;  %v1871_v36 = vpop.permute.xlu1 %1870 }
 0x910   : > { %1705 = vadd.xlane.f32.xlu0 %v1704_v12  ;;  %v1891_v43 = vsel %vm542_vm2, %v2866_v48, %v1871_v36  ;;  %v2136_v12 = vld [vmem:[%s3044_s9 + $0x28] sm:$0xff]  ;;  %v2373_v36 = vld [vmem:[%s3043_s8] ss:$0 sm:$0xff] }
 0x912   : > { %v2666_v17 = vpop.eup %2665 }
 0x913   : > { %v1707_v18 = vsel %vm542_vm2, %v2666_v17, 0.0  ;;  %v1879_v39 = vpop.permute.xlu1 %1878 }
 0x914   : > { %1708 = vadd.xlane.f32.xlu0 %v1707_v18  ;;  %v1894_v44 = vsel %vm1892_vm4, %v1891_v43, %v1879_v39  ;;  %v2376_v43 = vld [vmem:[%s3045_s10] ss:$0 sm:$0xff] }
 0x92a   : > { %1790 = vrot.lane.b32.xlu0 %v2821_v13, %s2699_s21  ;;  %v1899_v13 = vld [vmem:[%s3038_s3 + $0x8] sm:$0xff] }
 0x92b   : > { %v2583_v27 = vpack.c.bf16 %v1899_v13, %v1898_v26  ;;  %v2372_v13 = vld [vmem:[%s3041_s6] ss:$0 sm:$0xff] }
 0x92d   : > { %2584 = vmatprep.subr.bf16.mxu0 %v2583_v27 }
 0x92e   : > { %1876 = vrot.lane.b32.xlu0 %v1454_v57, %s2701_s23 }
 0x99d   : > { %v1706_v19 = vpop.xlane.xlu0 %1705 }
 0x99e   : > { %2667 = vrcp.f32 %v1706_v19 }
 0x9a1   : > { %v1709_v20 = vpop.xlane.xlu0 %1708 }
 0x9a2   : > { %2669 = vrcp.f32 %v1709_v20 }
 0x9a5   : > { %v1791_v21 = vpop.permute.xlu0 %1790 }
 0x9a6   : > { %2530 = vmatpush3.msra.mxu1 %v1791_v21 }
 0x9a8   : > { %v2668_v22 = vpop.eup %2667 }
 0x9a9   : > { %v1711_v23 = vmul.f32 %v2668_v22, %v2664_v16  ;;  %v1877_v37 = vpop.permute.xlu0 %1876  ;;  %v2135_v16 = vld [vmem:[%s3044_s9 + $0x20] sm:$0xff] }
 0x9aa   : > { %v1893_v40 = vsel %vm1892_vm4, %v1890_v38, %v1877_v37 }
 0x9ab   : > { %2527 = vmatmul.mubr.msk.f32.vlgmr.msra.gmra.mrb[12].mxu0 %vm542_vm2, %v1711_v23 }
 0x9ac   : > { %v2670_v24 = vpop.eup %2669  ;;  %2586 = vmatpush3.bf16.msra.mxu0 %v2583_v27 }
 0x9ad   : > { %v1713_v25 = vmul.f32 %v2670_v24, %v2666_v17  ;;  %2588 = vmatprep.subr.bf16.mxu0 %v2587_v30  ;;  %v2607_v17 = vpack.c.bf16 %v2136_v12, %v2135_v16 }
 0x9af   : > { %2532 = vmatmul.mubr.msk.f32.vlgmr.msra.gmra.mrb[18].mxu1 %vm542_vm2, %v1713_v25  ;;  %v2371_v25 = vld [vmem:[%s3040_s5] ss:$0 sm:$0xff] }
 0x9b0   : > { %2590 = vmatpush3.bf16.msra.mxu0 %v2587_v30 }
 0x9b1   : > { %2600 = vmatprep.subr.bf16.mxu0 %v2599_v11 }
 0xa7e   : > { %v1786_v31 = vpop.f32.mrb[12].mxu0 }
 0xa7f   : > { %1884 = vrot.lane.b32.xlu0 %v1786_v31, %s2702_s17  ;;  %v2528_v32 = vpop.f32.mrb[13].mxu0 }
 0xa82   : > { %v1862_v33 = vpop.f32.mrb[18].mxu1 }
 0xa83   : > { %1886 = vrot.lane.b32.xlu1 %v1862_v33, %s2702_s17  ;;  %v2533_v34 = vpop.f32.mrb[19].mxu1  ;;  %v2137_v33 = vld [vmem:[%s3044_s9 + $0x30] sm:$0xff] }
 0xa84   : > { %v2138_v34 = vld [vmem:[%s3044_s9 + $0x38] sm:$0xff] }
 0xa85   : > { %v2611_v35 = vpack.c.bf16 %v2138_v34, %v2137_v33 }
 0xaf1   : > { %v1885_v41 = vpop.permute.xlu0 %1884 }
 0xaf2   : > { %v1896_v42 = vsel %vm1895_vm3, %v1893_v40, %v1885_v41 }
 0xaf3   : > { %2542 = vmatprep.mubr.msk.f32.mxu0 %vm457_vm0, %v1896_v42 }
 0xaf5   : > { %v1887_v45 = vpop.permute.xlu1 %1886 }
 0xaf6   : > { %v1897_v47 = vsel %vm1895_vm3, %v1894_v44, %v1887_v45 }
 0xaf7   : > { %2543 = vmatmul.mubr.msk.f32.vlgmr.msra.gmra.mrb[14].mxu0 %vm457_vm0, %v1897_v47 }
 0xaf8   : > { %2602 = vmatpush3.bf16.msra.mxu0 %v2599_v11 }
 0xaf9   : > { %2604 = vmatprep.subr.bf16.mxu0 %v2603_v15 }
 0xafc   : > { %2606 = vmatpush3.bf16.msra.mxu0 %v2603_v15 }
 0xafd   : > { %2608 = vmatprep.subr.bf16.mxu0 %v2607_v17 }
 0xb00   : > { %2610 = vmatpush3.bf16.msra.mxu0 %v2607_v17 }
 0xb01   : > { %2612 = vmatprep.subr.bf16.mxu0 %v2611_v35 }
 0xb04   : > { %2614 = vmatpush3.bf16.msra.mxu0 %v2611_v35 }
 0xbca   : > { %v2544_v46 = vpop.f32.mrb[14].mxu0 }
 0xbcb   : > { %v1987_v50 = vadd.f32 %v2544_v46, %v2368_v49  ;;  %v1981_v51 = vpop.f32.mrb[15].mxu0 }
 0xbcc   : > { %v1982_v52 = vadd.f32 %v2368_v49, %v1981_v51 }
 0xbcd   : > { %v1991_v53 = vadd.f32 %v1987_v50, %v2803_v7 }
 0xbce   : > { %v1990_v54 = vadd.f32 %v1982_v52, %v2801_v6  ;;  %v2037_v6 = vld [vmem:[%s3042_s7] sm:$0xff] }
 0xbcf   : > { %v1997_v55 = vsel %vm457_vm0, %v1991_v53, 0.0  ;;  %v2591_v2 = vpack.c.bf16 %v2038_v1, %v2037_v6 }
 0xbd0   : > { %1998 = vadd.xlane.f32.xlu1 %v1997_v55  ;;  %v1994_v48 = vsel %vm457_vm0, %v1990_v54, 0.0 }
 0xbd1   : > { %1995 = vadd.xlane.f32.xlu0 %v1994_v48  ;;  %2592 = vmatprep.subr.bf16.mxu1 %v2591_v2 }
 0xbd2   : > { %2594 = vmatpush3.bf16.msra.mxu1 %v2591_v2 }
 0xbd3   : > { %2596 = vmatprep.subr.bf16.mxu1 %v2595_v8 }
 0xbd6   : > { %2598 = vmatpush3.bf16.msra.mxu1 %v2595_v8 }
 0xc5d   : > { %v1999_v56 = vpop.xlane.xlu1 %1998 }
 0xc5e   : > { %v2002_v57 = vmul.f32 0.03125, %v1999_v56  ;;  %v1996_v58 = vpop.xlane.xlu0 %1995 }
 0xc5f   : > { %v2001_v59 = vmul.f32 0.03125, %v1996_v58 }
 0xc60   : > { %v2004_v60 = vsub.f32 %v1991_v53, %v2002_v57 }
 0xc61   : > { %v2003_v61 = vsub.f32 %v1990_v54, %v2001_v59 }
 0xc62   : > { %v2006_v0 = vmul.f32 %v2004_v60, %v2004_v60 }
 0xc63   : > { %v2005_v62 = vmul.f32 %v2003_v61, %v2003_v61 }
 0xc64   : > { %v2010_v7 = vsel %vm457_vm0, %v2006_v0, 0.0 }
 0xc65   : > { %v2007_v63 = vsel %vm457_vm0, %v2005_v62, 0.0 }
 0xc66   : > { %2008 = vadd.xlane.f32.xlu0 %v2007_v63 }
 0xc6a   : > { %2011 = vadd.xlane.f32.xlu0 %v2010_v7 }
 0xcf3   : > { %v2009_v18 = vpop.xlane.xlu0 %2008 }
 0xcf4   : > { %v2013_v19 = vmul.f32 0.03125, %v2009_v18 }
 0xcf6   : > { %v2015_v20 = vadd.f32 1e-05, %v2013_v19 }
 0xcf7   : > { %v2012_v21 = vpop.xlane.xlu0 %2011 }
 0xcf8   : > { %2671 = vrsqrt.f32 %v2015_v20  ;;  %v2014_v22 = vmul.f32 0.03125, %v2012_v21 }
 0xcfa   : > { %v2016_v23 = vadd.f32 1e-05, %v2014_v22 }
 0xcfc   : > { %2673 = vrsqrt.f32 %v2016_v23 }
 0xd02   : > { %v2672_v24 = vpop.eup %2671 }
 0xd03   : > { %v2019_v26 = vmul.f32 %v2672_v24, %v2003_v61 }
 0xd05   : > { %v2027_v27 = vmul.f32 %v2371_v25, %v2019_v26 }
 0xd06   : > { %v2674_v28 = vpop.eup %2673 }
 0xd07   : > { %v2020_v29 = vmul.f32 %v2674_v28, %v2004_v60  ;;  %v2035_v30 = vadd.f32 %v2372_v13, %v2027_v27 }
 0xd09   : > { %v2028_v31 = vmul.f32 %v2371_v25, %v2020_v29  ;;  %2553 = vmatprep.mubr.msk.f32.mxu1 %vm457_vm0, %v2035_v30 }
 0xd0b   : > { %v2036_v32 = vadd.f32 %v2372_v13, %v2028_v31 }
 0xd0d   : > { %2554 = vmatmul.mubr.msk.f32.vlgmr.msra.gmra.mrb[20].mxu1 %vm457_vm0, %v2036_v32 }
 0xde0   : > { %v2555_v37 = vpop.f32.mrb[20].mxu1 }
 0xde1   : > { %v2126_v38 = vadd.f32 %v2555_v37, %v2373_v36  ;;  %v2120_v39 = vpop.f32.mrb[21].mxu1 }
 0xde2   : > { %v2121_v40 = vadd.f32 %v2373_v36, %v2120_v39 }
 0xde3   : > { %v2130_v42 = vmax.f32 %v2126_v38, 0.0 }
 0xde4   : > { %v2129_v41 = vmax.f32 %v2121_v40, 0.0 }
 0xde6   : > { %2572 = vmatprep.mubr.msk.f32.mxu0 %vm2146_vm5, %v2129_v41 }
 0xde7   : > { %2573 = vmatmul.mubr.msk.f32.vlgmr.msra.gmra.mrb[16].mxu0 %vm2146_vm5, %v2130_v42 }
 0xeba   : > { %v2574_v44 = vpop.f32.mrb[16].mxu0 }
 0xebb   : > { %v2225_v45 = vadd.f32 %v2574_v44, %v2376_v43  ;;  %v2219_v47 = vpop.f32.mrb[17].mxu0 }
 0xebc   : > { %v2220_v49 = vadd.f32 %v2376_v43, %v2219_v47 }
 0xebd   : > { %v2229_v46 = vadd.f32 %v2225_v45, %v2036_v32 }
 0xebe   : > { %v2228_v50 = vadd.f32 %v2220_v49, %v2035_v30 }
 0xebf   : > { %v2235_v51 = vsel %vm457_vm0, %v2229_v46, 0.0 }
 0xec0   : > { %2236 = vadd.xlane.f32.xlu0 %v2235_v51  ;;  %v2232_v52 = vsel %vm457_vm0, %v2228_v50, 0.0 }
 0xec1   : > { %2233 = vadd.xlane.f32.xlu1 %v2232_v52 }
 0xf4d   : > { %v2237_v53 = vpop.xlane.xlu0 %2236 }
 0xf4e   : > { %v2239_v54 = vmul.f32 0.03125, %v2237_v53  ;;  %v2234_v55 = vpop.xlane.xlu1 %2233 }
 0xf4f   : > { %v2238_v48 = vmul.f32 0.03125, %v2234_v55 }
 0xf50   : > { %v2241_v56 = vsub.f32 %v2229_v46, %v2239_v54 }
 0xf51   : > { %v2240_v57 = vsub.f32 %v2228_v50, %v2238_v48 }
 0xf52   : > { %v2243_v58 = vmul.f32 %v2241_v56, %v2241_v56 }
 0xf53   : > { %v2242_v59 = vmul.f32 %v2240_v57, %v2240_v57 }
 0xf54   : > { %v2247_v60 = vsel %vm457_vm0, %v2243_v58, 0.0 }
 0xf55   : > { %2248 = vadd.xlane.f32.xlu0 %v2247_v60  ;;  %v2244_v61 = vsel %vm457_vm0, %v2242_v59, 0.0 }
 0xf56   : > { %2245 = vadd.xlane.f32.xlu1 %v2244_v61 }
 0xfe2   : > { %v2249_v62 = vpop.xlane.xlu0 %2248 }
 0xfe3   : > { %v2251_v63 = vmul.f32 0.03125, %v2249_v62  ;;  %v2246_v0 = vpop.xlane.xlu1 %2245 }
 0xfe4   : > { %v2250_v7 = vmul.f32 0.03125, %v2246_v0 }
 0xfe5   : > { %v2253_v6 = vadd.f32 1e-05, %v2251_v63 }
 0xfe6   : > { %v2252_v1 = vadd.f32 1e-05, %v2250_v7 }
 0xfe7   : > { %2675 = vrsqrt.f32 %v2253_v6 }
 0xfe8   : > { %2677 = vrsqrt.f32 %v2252_v1 }
 0xff1   : > { %v2676_v2 = vpop.eup %2675 }
 0xff2   : > { %v2678_v4 = vpop.eup %2677  ;;  %v2257_v8 = vmul.f32 %v2676_v2, %v2241_v56 }
 0xff3   : > { %v2256_v5 = vmul.f32 %v2678_v4, %v2240_v57 }
 0xff4   : > { %v2265_v10 = vmul.f32 %v2379_v3, %v2257_v8 }
 0xff5   : > { %v2264_v11 = vmul.f32 %v2379_v3, %v2256_v5 }
 0xff6   : > { %v2273_v15 = vadd.f32 %v2380_v9, %v2265_v10 }
 0xff7   : > { %v2272_v14 = vadd.f32 %v2380_v9, %v2264_v11 }
 0xff8   : > { %2275 = vst.msk [vmem:[%s442_s15 + $0x8] sm:$0xff] %vm457_vm0, %v2273_v15 }
 0xff9   : > { %2274 = vst.msk [vmem:[%s442_s15] sm:$0xff] %vm457_vm0, %v2272_v14 }
 0xffa PF: > { %s23_s25 = sadd.s32 1, %s2685_s25  }
 0xffb   : > { %p20_p4 = scmp.ge.s32.totalorder %s23_s25, 4  }
 0xffd   :  { %22 = sbr.rel (!%p20_p4) target bundleno = 1 (0x1), region = 102 }

// kernel: fp_sam_encoder.5
= control target key start
LH: loop header
LB: loop body
LE: loop exit
PB: predicated region body
PF: predicated region fallthrough
CT: control target
= control target key end

     0   :  { %vm36_vm0 = vcmask 261120   ;;  %s5688_s0 = inlined_call_operand.vmem [shape: f32[4,8,32], index: 0, kind: input, shape index: {}]   ;;  %s5689_s1 = inlined_call_operand.vmem [shape: f32[32,96], index: 1, kind: input, shape index: {}]   ;;  %s5690_s2 = inlined_call_operand.vmem [shape: f32[1,96], index: 2, kind: input, shape index: {}]   ;;  %s5691_s3 = inlined_call_operand.vmem [shape: f32[32,32], index: 3, kind: input, shape index: {}]   ;;  %s5692_s4 = inlined_call_operand.vmem [shape: f32[1,32], index: 4, kind: input, shape index: {}]   ;;  %s5693_s5 = inlined_call_operand.hbm [shape: f32[2,32], index: 5, kind: output, shape index: {}]  }
   0x1   :  { %v25_v0 = vld [vmem:[%s5689_s1] sm:$0xff]  ;;  %v26_v1 = vld [vmem:[%s5689_s1 + $0x8] sm:$0xff]  ;;  %v27_v2 = vld [vmem:[%s5689_s1 + $0x10] sm:$0xff] }
   0x2   :  { %v4805_v3 = vpack.c.bf16 %v26_v1, %v25_v0  ;;  %v28_v4 = vld [vmem:[%s5689_s1 + $0x18] sm:$0xff]  ;;  %v21_v5 = vld [vmem:[%s5688_s0] sm:$0xff] }
   0x3   :  { %v4809_v6 = vpack.c.bf16 %v28_v4, %v27_v2  ;;  %4548 = vmatprep.mubr.msk.f32.mxu0 %vm36_vm0, %v21_v5 }
   0x4   :  { %10 = vsyncpa [#allocation3], 0  ;;  %4806 = vmatprep.subr.bf16.mxu0 %v4805_v3  ;;  %v22_v7 = vld [vmem:[%s5688_s0 + $0x8] sm:$0xff]  ;;  %v23_v8 = vld [vmem:[%s5688_s0 + $0x10] sm:$0xff]  ;;  %v5694_v10 = vmov 0.0   ;;  %vm4992_vm1 = vmmov 0  }
   0x5   :  { %4808 = vmatpush3.bf16.msra.mxu0 %v4805_v3  ;;  %v24_v9 = vld [vmem:[%s5688_s0 + $0x18] sm:$0xff]  ;;  %4554 = vmatprep.subr.mxu1 %v5694_v10  ;;  %v4345_v14 = vld [vmem:[%s5690_s2] ss:$0 sm:$0xff]  ;;  %s4993_s0 = smov 88   ;;  %s4994_s10 = smov 96   ;;  %vm137_vm2 = vcmask 64512  }
   0x6   :  { %4810 = vmatprep.subr.bf16.mxu0 %v4809_v6  ;;  %4556 = vmatprep.mubr.msk.f32.mxu1 %vm4992_vm1, %v5694_v10  ;;  %s4995_s11 = smov 120   ;;  %s4996_s12 = smov 112   ;;  %vm2889_vm3 = vcmask 130048   ;;  %vm2892_vm4 = vcmask 195584   ;;  %vm4248_vm5 = vcmask 1041409   ;;  %vm4323_vm6 = vcmask 254976  }
   0x7   :  { %s4997_s2 = smov 80   ;;  %s4998_s13 = smov 104  }
   0x8   :  { %s4999_s14 = smov 72   ;;  %s5000_s15 = smov 64  }
   0x9   :  { %4812 = vmatpush3.bf16.msra.mxu0 %v4809_v6  ;;  %s5001_s16 = smov 56   ;;  %s5002_s17 = smov 48  }
   0xa   :  { %4569 = vmatprep.subr.mxu0 %v5694_v10  ;;  %s5003_s18 = smov 40   ;;  %s5004_s19 = smov 8  }
   0xb   :  { %s5005_s20 = smov 16   ;;  %s5006_s21 = smov 24  }
   0xc   :  { %4549 = vmatmul.mubr.msk.f32.vlgmr.msra.gmra.mrb[0].mxu0 %vm36_vm0, %v22_v7  ;;  %s5008_s6 = smov [#allocation2]  }
   0xd   :  { %4551 = vmatprep.mubr.msk.f32.mxu0 %vm36_vm0, %v23_v8  ;;  %s4337_s1 = sshll.u32 %s5008_s6, 4  ;;  %s4338_s1 = int_to_ptr.vmem [resolvable:$true] %s4337_s1 }
   0xe   :  { %p4972_p1 = scmp.lt.s32.totalorder %s4338_s1, %s4338_s1 }
  0x10   :  { %4552 = vmatmul.mubr.msk.f32.gmra.mrb[2].mxu0 %vm36_vm0, %v24_v9 }
  0x11   :  { %4571 = vmatprep.mubr.msk.f32.mxu0 %vm4992_vm1, %v5694_v10 }
  0xdf   :  { %v4550_v11 = vpop.f32.mrb[0].mxu0 }
  0xe0   :  { %v115_v12 = vpop.f32.mrb[1].mxu0  ;;  %v5094_v18 = vadd.f32 %v4550_v11, %v4345_v14 }
  0xe1   :  { %v5096_v19 = vadd.f32 %v4345_v14, %v115_v12 }
  0xe3   :  { %v4553_v13 = vpop.f32.mrb[2].mxu0 }
  0xe4   :  { %v125_v15 = vpop.f32.mrb[3].mxu0  ;;  %v5080_v17 = vadd.f32 %v4553_v13, %v4345_v14 }
  0xe5   :  { %v5076_v16 = vadd.f32 %v4345_v14, %v125_v15 }
  0xe7   :  { %317 = vrot.lane.b32.xlu1 %v5076_v16, %s4993_s0  ;;  %135 = vrot.lane.b32.xlu0 %v5076_v16, %s4994_s10 }
  0xeb   :  { %315 = vrot.lane.b32.xlu1 %v5076_v16, %s4995_s11  ;;  %213 = vrot.lane.b32.xlu0 %v5080_v17, %s4994_s10 }
  0xef   :  { %497 = vrot.lane.b32.xlu1 %v5076_v16, %s4996_s12  ;;  %499 = vrot.lane.b32.xlu0 %v5076_v16, %s4997_s2 }
  0xf3   :  { %679 = vrot.lane.b32.xlu1 %v5076_v16, %s4998_s13  ;;  %681 = vrot.lane.b32.xlu0 %v5076_v16, %s4999_s14 }
  0xf7   :  { %393 = vrot.lane.b32.xlu1 %v5080_v17, %s4995_s11  ;;  %395 = vrot.lane.b32.xlu0 %v5080_v17, %s4993_s0 }
  0xfb   :  { %575 = vrot.lane.b32.xlu1 %v5080_v17, %s4996_s12  ;;  %577 = vrot.lane.b32.xlu0 %v5080_v17, %s4997_s2 }
  0xff   :  { %757 = vrot.lane.b32.xlu1 %v5080_v17, %s4998_s13  ;;  %759 = vrot.lane.b32.xlu0 %v5080_v17, %s4999_s14 }
 0x103   :  { %941 = vrot.lane.b32.xlu1 %v5094_v18, %s4994_s10  ;;  %864 = vrot.lane.b32.xlu0 %v5096_v19, %s4994_s10 }
 0x107   :  { %1123 = vrot.lane.b32.xlu1 %v5094_v18, %s4993_s0  ;;  %1045 = vrot.lane.b32.xlu0 %v5096_v19, %s4993_s0 }
 0x10b   :  { %1121 = vrot.lane.b32.xlu1 %v5094_v18, %s4995_s11  ;;  %1043 = vrot.lane.b32.xlu0 %v5096_v19, %s4995_s11 }
 0x10f   :  { %1305 = vrot.lane.b32.xlu1 %v5094_v18, %s4997_s2  ;;  %1227 = vrot.lane.b32.xlu0 %v5096_v19, %s4997_s2 }
 0x113   :  { %1303 = vrot.lane.b32.xlu1 %v5094_v18, %s4996_s12  ;;  %1225 = vrot.lane.b32.xlu0 %v5096_v19, %s4996_s12 }
 0x117   :  { %1487 = vrot.lane.b32.xlu1 %v5094_v18, %s4999_s14  ;;  %1409 = vrot.lane.b32.xlu0 %v5096_v19, %s4999_s14 }
 0x11b   :  { %1485 = vrot.lane.b32.xlu1 %v5094_v18, %s4998_s13  ;;  %1407 = vrot.lane.b32.xlu0 %v5096_v19, %s4998_s13 }
 0x159   :  { %v5112_v20 = vpop.permute.xlu1 %317  ;;  %v5114_v21 = vpop.permute.xlu0 %135 }
 0x15a   :  { %4555 = vmatpush3.xpose.msk.msra.mxu1 %vm137_vm2, %v5114_v21 }
 0x15b   :  { %4559 = vmatprep.subr.mxu1 %v5694_v10 }
 0x15d   :  { %v5119_v22 = vpop.permute.xlu1 %315  ;;  %4557 = vmatmul.mubr.msk.f32.vlgmr.msra.gmra.mrb[0].mxu1 %vm137_vm2, %v5076_v16  ;;  %v5123_v23 = vpop.permute.xlu0 %213 }
 0x15e   :  { %4560 = vmatpush3.xpose.msk.msra.mxu1 %vm137_vm2, %v5123_v23  ;;  %4561 = vmatprep.mubr.msk.f32.mxu1 %vm4992_vm1, %v5694_v10 }
 0x15f   :  { %4564 = vmatprep.subr.mxu1 %v5694_v10 }
 0x161   :  { %v5130_v24 = vpop.permute.xlu1 %497  ;;  %4562 = vmatmul.mubr.msk.f32.vlgmr.msra.gmra.mrb[2].mxu1 %vm137_vm2, %v5080_v17  ;;  %v5134_v25 = vpop.permute.xlu0 %499 }
 0x162   :  { %4565 = vmatpush3.xpose.msk.msra.mxu1 %vm137_vm2, %v5112_v20  ;;  %4566 = vmatprep.mubr.msk.f32.mxu1 %vm4992_vm1, %v5694_v10 }
 0x163   :  { %4574 = vmatprep.subr.mxu1 %v5694_v10 }
 0x165   :  { %v5141_v26 = vpop.permute.xlu1 %679  ;;  %4567 = vmatmul.mubr.msk.f32.vlgmr.msra.gmra.mrb[4].mxu1 %vm137_vm2, %v5119_v22  ;;  %v5145_v27 = vpop.permute.xlu0 %681 }
 0x166   :  { %5698 = vst [vmem:[#allocation5_spill] sm:$0xff] %v5141_v26  ;;  %4575 = vmatpush3.xpose.msk.msra.mxu1 %vm137_vm2, %v5134_v25  ;;  %4576 = vmatprep.mubr.msk.f32.mxu1 %vm4992_vm1, %v5694_v10 }
 0x167   :  { %4584 = vmatprep.subr.mxu1 %v5694_v10 }
 0x169   :  { %v5152_v28 = vpop.permute.xlu1 %393  ;;  %4577 = vmatmul.mubr.msk.f32.vlgmr.msra.gmra.mrb[6].mxu1 %vm137_vm2, %v5130_v24  ;;  %v5156_v29 = vpop.permute.xlu0 %395 }
 0x16a   :  { %4570 = vmatpush3.xpose.msk.msra.mxu0 %vm137_vm2, %v5156_v29  ;;  %4585 = vmatpush3.xpose.msk.msra.mxu1 %vm137_vm2, %v5145_v27 }
 0x16b   :  { %4586 = vmatprep.mubr.msk.f32.mxu1 %vm4992_vm1, %v5694_v10  ;;  %4579 = vmatprep.subr.mxu0 %v5694_v10 }
 0x16c   :  { %4594 = vmatprep.subr.mxu1 %v5694_v10 }
 0x16d   :  { %v5166_v30 = vpop.permute.xlu1 %575  ;;  %4572 = vmatmul.mubr.msk.f32.vlgmr.msra.gmra.mrb[4].mxu0 %vm137_vm2, %v5152_v28  ;;  %4587 = vmatmul.mubr.msk.f32.vlgmr.msra.gmra.mrb[8].mxu1 %vm137_vm2, %v5141_v26  ;;  %v5172_v31 = vpop.permute.xlu0 %577 }
 0x16e   :  { %4580 = vmatpush3.xpose.msk.msra.mxu0 %vm137_vm2, %v5172_v31  ;;  %4581 = vmatprep.mubr.msk.f32.mxu0 %vm4992_vm1, %v5694_v10 }
 0x16f   :  { %4589 = vmatprep.subr.mxu0 %v5694_v10  ;;  %4596 = vmatprep.mubr.msk.f32.mxu1 %vm4992_vm1, %v5694_v10 }
 0x171   :  { %v5181_v32 = vpop.permute.xlu1 %757  ;;  %4582 = vmatmul.mubr.msk.f32.vlgmr.msra.gmra.mrb[6].mxu0 %vm137_vm2, %v5166_v30  ;;  %v5185_v33 = vpop.permute.xlu0 %759 }
 0x172   :  { %5699 = vst [vmem:[#allocation6_spill] sm:$0xff] %v5181_v32  ;;  %4590 = vmatpush3.xpose.msk.msra.mxu0 %vm137_vm2, %v5185_v33  ;;  %4591 = vmatprep.mubr.msk.f32.mxu0 %vm4992_vm1, %v5694_v10 }
 0x173   :  { %4599 = vmatprep.subr.mxu0 %v5694_v10 }
 0x175   :  { %v5192_v34 = vpop.permute.xlu1 %941  ;;  %4592 = vmatmul.mubr.msk.f32.vlgmr.msra.gmra.mrb[8].mxu0 %vm137_vm2, %v5181_v32  ;;  %v5196_v35 = vpop.permute.xlu0 %864 }
 0x176   :  { %4595 = vmatpush3.xpose.msk.msra.mxu1 %vm137_vm2, %v5196_v35  ;;  %4600 = vmatpush3.xpose.msk.msra.mxu0 %vm137_vm2, %v5192_v34 }
 0x177   :  { %4601 = vmatprep.mubr.msk.f32.mxu0 %vm4992_vm1, %v5694_v10  ;;  %4604 = vmatprep.subr.mxu1 %v5694_v10 }
 0x178   :  { %4609 = vmatprep.subr.mxu0 %v5694_v10 }
 0x179   :  { %v5206_v36 = vpop.permute.xlu1 %1123  ;;  %4597 = vmatmul.mubr.msk.f32.vlgmr.msra.gmra.mrb[10].mxu1 %vm137_vm2, %v5096_v19  ;;  %4602 = vmatmul.mubr.msk.f32.vlgmr.msra.gmra.mrb[10].mxu0 %vm137_vm2, %v5094_v18  ;;  %v5212_v37 = vpop.permute.xlu0 %1045 }
 0x17a   :  { %4605 = vmatpush3.xpose.msk.msra.mxu1 %vm137_vm2, %v5212_v37  ;;  %4610 = vmatpush3.xpose.msk.msra.mxu0 %vm137_vm2, %v5206_v36 }
 0x17b   :  { %4606 = vmatprep.mubr.msk.f32.mxu1 %vm4992_vm1, %v5694_v10  ;;  %4611 = vmatprep.mubr.msk.f32.mxu0 %vm4992_vm1, %v5694_v10 }
 0x17c   :  { %4614 = vmatprep.subr.mxu1 %v5694_v10  ;;  %4619 = vmatprep.subr.mxu0 %v5694_v10 }
 0x17d   :  { %v5224_v38 = vpop.permute.xlu1 %1121  ;;  %v5226_v39 = vpop.permute.xlu0 %1043 }
 0x17e   :  { %4607 = vmatmul.mubr.msk.f32.vlgmr.msra.gmra.mrb[12].mxu1 %vm137_vm2, %v5226_v39  ;;  %4612 = vmatmul.mubr.msk.f32.vlgmr.msra.gmra.mrb[12].mxu0 %vm137_vm2, %v5224_v38 }
 0x17f   :  { %4616 = vmatprep.mubr.msk.f32.mxu1 %vm4992_vm1, %v5694_v10  ;;  %4621 = vmatprep.mubr.msk.f32.mxu0 %vm4992_vm1, %v5694_v10 }
 0x181   :  { %v5236_v40 = vpop.permute.xlu1 %1305  ;;  %v5238_v41 = vpop.permute.xlu0 %1227 }
 0x182   :  { %4615 = vmatpush3.xpose.msk.msra.mxu1 %vm137_vm2, %v5238_v41  ;;  %4620 = vmatpush3.xpose.msk.msra.mxu0 %vm137_vm2, %v5236_v40 }
 0x183   :  { %4624 = vmatprep.subr.mxu1 %v5694_v10  ;;  %4629 = vmatprep.subr.mxu0 %v5694_v10 }
 0x185   :  { %v5246_v42 = vpop.permute.xlu1 %1303  ;;  %v5248_v43 = vpop.permute.xlu0 %1225 }
 0x186   :  { %4617 = vmatmul.mubr.msk.f32.vlgmr.msra.gmra.mrb[14].mxu1 %vm137_vm2, %v5248_v43  ;;  %4622 = vmatmul.mubr.msk.f32.vlgmr.msra.gmra.mrb[14].mxu0 %vm137_vm2, %v5246_v42 }
 0x187   :  { %4626 = vmatprep.mubr.msk.f32.mxu1 %vm4992_vm1, %v5694_v10  ;;  %4631 = vmatprep.mubr.msk.f32.mxu0 %vm4992_vm1, %v5694_v10 }
 0x189   :  { %v5258_v44 = vpop.permute.xlu1 %1487  ;;  %v5260_v45 = vpop.permute.xlu0 %1409 }
 0x18a   :  { %4625 = vmatpush3.xpose.msk.msra.mxu1 %vm137_vm2, %v5260_v45  ;;  %4630 = vmatpush3.xpose.msk.msra.mxu0 %vm137_vm2, %v5258_v44 }
 0x18b   :  { %4634 = vmatprep.subr.mxu1 %v5694_v10  ;;  %4639 = vmatprep.subr.mxu0 %v5694_v10 }
 0x18d   :  { %v5268_v46 = vpop.permute.xlu1 %1485  ;;  %v5270_v47 = vpop.permute.xlu0 %1407 }
 0x18e   :  { %4627 = vmatmul.mubr.msk.f32.vlgmr.msra.gmra.mrb[16].mxu1 %vm137_vm2, %v5270_v47  ;;  %4632 = vmatmul.mubr.msk.f32.vlgmr.msra.gmra.mrb[16].mxu0 %vm137_vm2, %v5268_v46 }
 0x18f   :  { %4635 = vmatpush3.xpose.msk.msra.mxu1 %vm137_vm2, %v5114_v21  ;;  %4640 = vmatpush3.xpose.msk.msra.mxu0 %vm137_vm2, %v5123_v23 }
 0x190   :  { %4636 = vmatprep.mubr.msk.f32.mxu1 %vm4992_vm1, %v5694_v10  ;;  %4641 = vmatprep.mubr.msk.f32.mxu0 %vm4992_vm1, %v5694_v10 }
 0x191   :  { %4644 = vmatprep.subr.mxu1 %v5694_v10  ;;  %4649 = vmatprep.subr.mxu0 %v5694_v10 }
 0x192   :  { %4637 = vmatmul.mubr.msk.f32.vlgmr.msra.gmra.mrb[18].mxu1 %vm137_vm2, %v5096_v19  ;;  %4642 = vmatmul.mubr.msk.f32.vlgmr.msra.gmra.mrb[18].mxu0 %vm137_vm2, %v5094_v18 }
 0x193   :  { %4646 = vmatprep.mubr.msk.f32.mxu1 %vm4992_vm1, %v5694_v10  ;;  %4651 = vmatprep.mubr.msk.f32.mxu0 %vm4992_vm1, %v5694_v10 }
 0x230   :  { %v208_v48 = vpop.f32.mrb[0].mxu1 }
 0x231   :  { %v289_v49 = vmul.f32 0.35355338, %v208_v48  ;;  %v4558_v50 = vpop.f32.mrb[1].mxu1 }
 0x233   :  { %v291_v51 = vsel %vm137_vm2, %v289_v49, -inf }
 0x234   :  { %v5295_v52 = vpop.f32.mrb[2].mxu1  ;;  %292 = vmax.xlane.f32.xlu0 %v291_v51 }
 0x235   :  { %v4563_v53 = vpop.f32.mrb[3].mxu1 }
 0x238   :  { %v389_v54 = vpop.f32.mrb[4].mxu1 }
 0x239   :  { %v471_v55 = vmul.f32 0.35355338, %v389_v54  ;;  %v4568_v56 = vpop.f32.mrb[5].mxu1 }
 0x23b   :  { %v473_v57 = vsel %vm137_vm2, %v471_v55, -inf }
 0x23c   :  { %474 = vmax.xlane.f32.xlu1 %v473_v57  ;;  %v571_v58 = vpop.f32.mrb[6].mxu1 }
 0x23d   :  { %v653_v59 = vmul.f32 0.35355338, %v571_v58  ;;  %v4578_v60 = vpop.f32.mrb[7].mxu1 }
 0x23f   :  { %v655_v61 = vsel %vm137_vm2, %v653_v59, -inf }
 0x240   :  { %v5299_v62 = vpop.f32.mrb[4].mxu0  ;;  %v753_v63 = vpop.f32.mrb[8].mxu1  ;;  %656 = vmax.xlane.f32.xlu0 %v655_v61 }
 0x241   :  { %v835_v0 = vmul.f32 0.35355338, %v753_v63  ;;  %v4573_v1 = vpop.f32.mrb[5].mxu0  ;;  %v4588_v2 = vpop.f32.mrb[9].mxu1 }
 0x243   :  { %v837_v3 = vsel %vm137_vm2, %v835_v0, -inf }
 0x244   :  { %v5302_v4 = vpop.f32.mrb[6].mxu0  ;;  %838 = vmax.xlane.f32.xlu0 %v837_v3 }
 0x245   :  { %v4583_v5 = vpop.f32.mrb[7].mxu0 }
 0x248   :  { %v5304_v6 = vpop.f32.mrb[8].mxu0 }
 0x249   :  { %v4593_v7 = vpop.f32.mrb[9].mxu0 }
 0x24c   :  { %v5306_v8 = vpop.f32.mrb[10].mxu1  ;;  %v5308_v9 = vpop.f32.mrb[10].mxu0 }
 0x24d   :  { %v4598_v11 = vpop.f32.mrb[11].mxu1  ;;  %v4603_v12 = vpop.f32.mrb[11].mxu0 }
 0x251   :  { %v5310_v13 = vpop.f32.mrb[12].mxu1  ;;  %v5312_v14 = vpop.f32.mrb[12].mxu0 }
 0x252   :  { %v4608_v15 = vpop.f32.mrb[13].mxu1  ;;  %v4613_v21 = vpop.f32.mrb[13].mxu0 }
 0x259   :  { %v5314_v23 = vpop.f32.mrb[14].mxu1  ;;  %v5316_v48 = vpop.f32.mrb[14].mxu0 }
 0x25a   :  { %v4618_v50 = vpop.f32.mrb[15].mxu1  ;;  %v4623_v51 = vpop.f32.mrb[15].mxu0 }
 0x261   :  { %v5318_v53 = vpop.f32.mrb[16].mxu1  ;;  %v5320_v54 = vpop.f32.mrb[16].mxu0 }
 0x262   :  { %v4628_v56 = vpop.f32.mrb[17].mxu1  ;;  %v4633_v57 = vpop.f32.mrb[17].mxu0 }
 0x265   :  { %v1657_v58 = vpop.f32.mrb[18].mxu1  ;;  %v1727_v60 = vpop.f32.mrb[18].mxu0 }
 0x266   :  { %v4638_v61 = vpop.f32.mrb[19].mxu1  ;;  %v4643_v63 = vpop.f32.mrb[19].mxu0  ;;  %v1732_v26 = vmul.f32 0.35355338, %v1727_v60 }
 0x2c1   :  { %v293_v1 = vpop.xlane.xlu0 %292 }
 0x2c2   :  { %v297_v2 = vsub.f32 %v289_v49, %v293_v1 }
 0x2c4   :  { %v299_v3 = vmul.f32 1.442695, %v297_v2 }
 0x2c6   :  { %4837 = vpow2.f32 %v299_v3 }
 0x2c9   :  { %v475_v5 = vpop.xlane.xlu1 %474 }
 0x2ca   :  { %v479_v7 = vsub.f32 %v471_v55, %v475_v5 }
 0x2cc   :  { %v481_v11 = vmul.f32 1.442695, %v479_v7 }
 0x2cd   :  { %v657_v12 = vpop.xlane.xlu0 %656 }
 0x2ce   :  { %4839 = vpow2.f32 %v481_v11  ;;  %v661_v15 = vsub.f32 %v653_v59, %v657_v12 }
 0x2d0   :  { %v4838_v21 = vpop.eup %4837  ;;  %v663_v50 = vmul.f32 1.442695, %v661_v15 }
 0x2d1   :  { %v839_v51 = vpop.xlane.xlu0 %838  ;;  %v303_v56 = vsel %vm137_vm2, %v4838_v21, 0.0 }
 0x2d2   :  { %4841 = vpow2.f32 %v663_v50  ;;  %v843_v57 = vsub.f32 %v835_v0, %v839_v51  ;;  %304 = vadd.xlane.f32.xlu1 %v303_v56 }
 0x2d4   :  { %v845_v61 = vmul.f32 1.442695, %v843_v57 }
 0x2d6   :  { %4843 = vpow2.f32 %v845_v61 }
 0x2d8   :  { %v4840_v63 = vpop.eup %4839 }
 0x2d9   :  { %v485_v49 = vsel %vm137_vm2, %v4840_v63, 0.0 }
 0x2da   :  { %486 = vadd.xlane.f32.xlu0 %v485_v49 }
 0x2dc   :  { %v4842_v1 = vpop.eup %4841 }
 0x2dd   :  { %v667_v55 = vsel %vm137_vm2, %v4842_v1, 0.0 }
 0x2de   :  { %668 = vadd.xlane.f32.xlu1 %v667_v55 }
 0x2e0   :  { %v4844_v2 = vpop.eup %4843 }
 0x2e1   :  { %v849_v59 = vsel %vm137_vm2, %v4844_v2, 0.0 }
 0x2e2   :  { %850 = vadd.xlane.f32.xlu0 %v849_v59  ;;  %v1731_v59 = vmul.f32 0.35355338, %v1657_v58 }
 0x35f   :  { %v305_v3 = vpop.xlane.xlu1 %304 }
 0x367   :  { %v487_v5 = vpop.xlane.xlu0 %486 }
 0x368   :  { %4845 = vrcp.f32 %v487_v5 }
 0x369   :  { %4847 = vrcp.f32 %v305_v3 }
 0x36b   :  { %v669_v0 = vpop.xlane.xlu1 %668 }
 0x36c   :  { %4849 = vrcp.f32 %v669_v0 }
 0x36f   :  { %v851_v7 = vpop.xlane.xlu0 %850 }
 0x370   :  { %4851 = vrcp.f32 %v851_v7 }
 0x372   :  { %v4846_v11 = vpop.eup %4845 }
 0x373   :  { %v4848_v12 = vpop.eup %4847  ;;  %v492_v15 = vmul.f32 %v4846_v11, %v4840_v63 }
 0x374   :  { %v310_v51 = vmul.f32 %v4848_v12, %v4838_v21 }
 0x376   :  { %v4850_v50 = vpop.eup %4849  ;;  %v495_v57 = vadd.f32 %v492_v15, %v310_v51  ;;  %v472_v15 = vmul.f32 0.35355338, %v5299_v62  ;;  %v836_v51 = vmul.f32 0.35355338, %v5304_v6 }
 0x377   :  { %v674_v56 = vmul.f32 %v4850_v50, %v4842_v1  ;;  %v290_v50 = vmul.f32 0.35355338, %v5295_v52 }
 0x379   :  { %v677_v55 = vadd.f32 %v674_v56, %v495_v57  ;;  %v476_v56 = vsel %vm137_vm2, %v472_v15, -inf  ;;  %v654_v57 = vmul.f32 0.35355338, %v5302_v4 }
 0x37a   :  { %v4852_v61 = vpop.eup %4851 }
 0x37b   :  { %v856_v49 = vmul.f32 %v4852_v61, %v4844_v2  ;;  %v294_v61 = vsel %vm137_vm2, %v290_v50, -inf }
 0x37d   :  { %v859_v10 = vadd.f32 %v856_v49, %v677_v55  ;;  %v840_v49 = vsel %vm137_vm2, %v836_v51, -inf  ;;  %v658_v55 = vsel %vm137_vm2, %v654_v57, -inf }
 0x37f   :  { %v5326_v32 = vmul.f32 0.25, %v859_v10 }
 0x381   :  { %v1734_v3 = vadd.f32 %v1732_v26, %v5326_v32  ;;  %v1733_v5 = vadd.f32 %v1731_v59, %v5326_v32 }
 0x383   :  { %v1738_v0 = vsel %vm137_vm2, %v1734_v3, -inf  ;;  %v1735_v63 = vsel %vm137_vm2, %v1733_v5, -inf }
 0x384   :  { %1739 = vmax.xlane.f32.xlu0 %v1738_v0  ;;  %1736 = vmax.xlane.f32.xlu1 %v1735_v63 }
 0x411   :  { %v1740_v21 = vpop.xlane.xlu0 %1739  ;;  %v1737_v1 = vpop.xlane.xlu1 %1736 }
 0x412   :  { %v1742_v7 = vsub.f32 %v1734_v3, %v1740_v21  ;;  %v1741_v2 = vsub.f32 %v1733_v5, %v1737_v1  ;;  %v5700_v3 = vmov 0.0  }
 0x414   :  { %v1745_v11 = vmul.f32 1.442695, %v1742_v7  ;;  %v1743_v12 = vmul.f32 1.442695, %v1741_v2 }
 0x416   :  { %4853 = vpow2.f32 %v1745_v11 }
 0x417   :  { %4855 = vpow2.f32 %v1743_v12 }
 0x420   :  { %v4854_v10 = vpop.eup %4853 }
 0x421   :  { %v4856_v58 = vpop.eup %4855  ;;  %v1750_v26 = vsel %vm137_vm2, %v4854_v10, 0.0 }
 0x422   :  { %1751 = vadd.xlane.f32.xlu0 %v1750_v26  ;;  %v1747_v60 = vsel %vm137_vm2, %v4856_v58, 0.0 }
 0x423   :  { %1748 = vadd.xlane.f32.xlu1 %v1747_v60 }
 0x434   :  { %1757 = vrot.lane.b32.xlu1 %v5076_v16, %s5000_s15 }
 0x438   :  { %1833 = vrot.lane.b32.xlu0 %v5080_v17, %s5000_s15 }
 0x457   :  { %477 = vmax.xlane.f32.xlu0 %v476_v56 }
 0x458   :  { %295 = vmax.xlane.f32.xlu1 %v294_v61 }
 0x45b   :  { %841 = vmax.xlane.f32.xlu0 %v840_v49 }
 0x45c   :  { %659 = vmax.xlane.f32.xlu1 %v658_v55 }
 0x4af   :  { %v1752_v59 = vpop.xlane.xlu0 %1751 }
 0x4b0   :  { %4857 = vrcp.f32 %v1752_v59  ;;  %v1749_v62 = vpop.xlane.xlu1 %1748 }
 0x4b1   :  { %4859 = vrcp.f32 %v1749_v62 }
 0x4b3   :  { %v1834_v52 = vpop.permute.xlu0 %1833 }
 0x4b4   :  { %v1758_v6 = vpop.permute.xlu1 %1757  ;;  %4650 = vmatpush3.msra.mxu0 %v1834_v52 }
 0x4b5   :  { %4645 = vmatpush3.msra.mxu1 %v1758_v6  ;;  %4659 = vmatprep.subr.mxu0 %v5700_v3 }
 0x4b6   :  { %4654 = vmatprep.subr.mxu1 %v5700_v3 }
 0x4ba   :  { %v4858_v4 = vpop.eup %4857 }
 0x4bb   :  { %v4860_v5 = vpop.eup %4859  ;;  %v1756_v0 = vmul.f32 %v4858_v4, %v4854_v10 }
 0x4bc   :  { %v1754_v63 = vmul.f32 %v4860_v5, %v4856_v58 }
 0x4bd   :  { %4652 = vmatmul.mubr.msk.f32.vlgmr.msra.gmra.mrb[20].mxu0 %vm137_vm2, %v1756_v0 }
 0x4be   :  { %4647 = vmatmul.mubr.msk.f32.vlgmr.msra.gmra.mrb[20].mxu1 %vm137_vm2, %v1754_v63  ;;  %4660 = vmatpush3.xpose.msk.msra.mxu0 %vm137_vm2, %v5156_v29 }
 0x4bf   :  { %4655 = vmatpush3.xpose.msk.msra.mxu1 %vm137_vm2, %v5112_v20  ;;  %4656 = vmatprep.mubr.msk.f32.mxu1 %vm4992_vm1, %v5700_v3 }
 0x4c0   :  { %4661 = vmatprep.mubr.msk.f32.mxu0 %vm4992_vm1, %v5700_v3  ;;  %4664 = vmatprep.subr.mxu1 %v5700_v3 }
 0x4c1   :  { %4662 = vmatmul.mubr.msk.f32.vlgmr.msra.gmra.mrb[22].mxu0 %vm137_vm2, %v5224_v38  ;;  %4669 = vmatprep.subr.mxu0 %v5700_v3 }
 0x4c2   :  { %4657 = vmatmul.mubr.msk.f32.vlgmr.msra.gmra.mrb[22].mxu1 %vm137_vm2, %v5226_v39  ;;  %4671 = vmatprep.mubr.msk.f32.mxu0 %vm4992_vm1, %v5700_v3 }
 0x4c3   :  { %4666 = vmatprep.mubr.msk.f32.mxu1 %vm4992_vm1, %v5700_v3 }
 0x4e4   :  { %v478_v20 = vpop.xlane.xlu0 %477 }
 0x4e5   :  { %v480_v29 = vsub.f32 %v472_v15, %v478_v20  ;;  %v296_v21 = vpop.xlane.xlu1 %295 }
 0x4e6   :  { %v298_v1 = vsub.f32 %v290_v50, %v296_v21 }
 0x4e7   :  { %v483_v7 = vmul.f32 1.442695, %v480_v29 }
 0x4e8   :  { %v301_v2 = vmul.f32 1.442695, %v298_v1  ;;  %v842_v11 = vpop.xlane.xlu0 %841 }
 0x4e9   :  { %4861 = vpow2.f32 %v483_v7  ;;  %v844_v38 = vsub.f32 %v836_v51, %v842_v11  ;;  %v660_v12 = vpop.xlane.xlu1 %659 }
 0x4ea   :  { %4863 = vpow2.f32 %v301_v2  ;;  %v662_v10 = vsub.f32 %v654_v57, %v660_v12 }
 0x4eb   :  { %v847_v58 = vmul.f32 1.442695, %v844_v38 }
 0x4ec   :  { %v665_v39 = vmul.f32 1.442695, %v662_v10 }
 0x4ed   :  { %4865 = vpow2.f32 %v847_v58 }
 0x4ee   :  { %4867 = vpow2.f32 %v665_v39 }
 0x4f3   :  { %v4862_v26 = vpop.eup %4861 }
 0x4f4   :  { %v4864_v60 = vpop.eup %4863  ;;  %v488_v56 = vsel %vm137_vm2, %v4862_v26, 0.0 }
 0x4f5   :  { %489 = vadd.xlane.f32.xlu0 %v488_v56  ;;  %v306_v15 = vsel %vm137_vm2, %v4864_v60, 0.0 }
 0x4f6   :  { %307 = vadd.xlane.f32.xlu1 %v306_v15 }
 0x4f7   :  { %v4866_v50 = vpop.eup %4865 }
 0x4f8   :  { %v4868_v61 = vpop.eup %4867  ;;  %v852_v49 = vsel %vm137_vm2, %v4866_v50, 0.0 }
 0x4f9   :  { %853 = vadd.xlane.f32.xlu0 %v852_v49  ;;  %v670_v51 = vsel %vm137_vm2, %v4868_v61, 0.0 }
 0x4fa   :  { %671 = vadd.xlane.f32.xlu1 %v670_v51 }
 0x582   :  { %v490_v57 = vpop.xlane.xlu0 %489 }
 0x583   :  { %4869 = vrcp.f32 %v490_v57  ;;  %v308_v55 = vpop.xlane.xlu1 %307 }
 0x584   :  { %4871 = vrcp.f32 %v308_v55 }
 0x586   :  { %v854_v59 = vpop.xlane.xlu0 %853 }
 0x587   :  { %4873 = vrcp.f32 %v854_v59  ;;  %v672_v62 = vpop.xlane.xlu1 %671 }
 0x588   :  { %4875 = vrcp.f32 %v672_v62 }
 0x58d   :  { %v4870_v52 = vpop.eup %4869 }
 0x58e   :  { %v4872_v6 = vpop.eup %4871  ;;  %v494_v4 = vmul.f32 %v4870_v52, %v4862_v26 }
 0x58f   :  { %v312_v5 = vmul.f32 %v4872_v6, %v4864_v60 }
 0x590   :  { %v5372_v0 = vpop.f32.mrb[20].mxu0 }
 0x591   :  { %v4874_v63 = vpop.eup %4873  ;;  %v5374_v20 = vpop.f32.mrb[20].mxu1  ;;  %v496_v7 = vadd.f32 %v494_v4, %v312_v5 }
 0x592   :  { %v4653_v29 = vpop.f32.mrb[21].mxu0  ;;  %v4876_v21 = vpop.eup %4875  ;;  %v858_v38 = vmul.f32 %v4874_v63, %v4866_v50 }
 0x593   :  { %v4648_v1 = vpop.f32.mrb[21].mxu1  ;;  %v676_v2 = vmul.f32 %v4876_v21, %v4868_v61 }
 0x594   :  { %v2045_v11 = vpop.f32.mrb[22].mxu0 }
 0x595   :  { %v1975_v12 = vpop.f32.mrb[22].mxu1  ;;  %v4663_v10 = vpop.f32.mrb[23].mxu0  ;;  %v678_v58 = vadd.f32 %v676_v2, %v496_v7  ;;  %v2050_v26 = vmul.f32 0.35355338, %v2045_v11 }
 0x596   :  { %v4658_v39 = vpop.f32.mrb[23].mxu1  ;;  %v2049_v15 = vmul.f32 0.35355338, %v1975_v12 }
 0x597   :  { %v860_v56 = vadd.f32 %v858_v38, %v678_v58 }
 0x599   :  { %v5376_v60 = vmul.f32 0.25, %v860_v56 }
 0x59b   :  { %v2052_v49 = vadd.f32 %v2050_v26, %v5376_v60  ;;  %v2051_v51 = vadd.f32 %v2049_v15, %v5376_v60 }
 0x59d   :  { %v2056_v57 = vsel %vm137_vm2, %v2052_v49, -inf  ;;  %v2053_v55 = vsel %vm137_vm2, %v2051_v51, -inf }
 0x59e   :  { %2057 = vmax.xlane.f32.xlu0 %v2056_v57  ;;  %2054 = vmax.xlane.f32.xlu1 %v2053_v55 }
 0x62b   :  { %v2058_v50 = vpop.xlane.xlu0 %2057  ;;  %v2055_v61 = vpop.xlane.xlu1 %2054 }
 0x62c   :  { %v2060_v59 = vsub.f32 %v2052_v49, %v2058_v50  ;;  %v2059_v62 = vsub.f32 %v2051_v51, %v2055_v61 }
 0x62e   :  { %v2063_v52 = vmul.f32 1.442695, %v2060_v59  ;;  %v2061_v6 = vmul.f32 1.442695, %v2059_v62 }
 0x630   :  { %4877 = vpow2.f32 %v2063_v52 }
 0x631   :  { %4879 = vpow2.f32 %v2061_v6 }
 0x63a   :  { %v4878_v4 = vpop.eup %4877 }
 0x63b   :  { %v4880_v5 = vpop.eup %4879  ;;  %v2068_v63 = vsel %vm137_vm2, %v4878_v4, 0.0 }
 0x63c   :  { %2069 = vadd.xlane.f32.xlu0 %v2068_v63  ;;  %v2065_v29 = vsel %vm137_vm2, %v4880_v5, 0.0 }
 0x63d   :  { %2066 = vadd.xlane.f32.xlu1 %v2065_v29 }
 0x64e   :  { %2075 = vrot.lane.b32.xlu1 %v5076_v16, %s5001_s16 }
 0x652   :  { %2151 = vrot.lane.b32.xlu0 %v5080_v17, %s5001_s16 }
 0x6c9   :  { %v2070_v21 = vpop.xlane.xlu0 %2069 }
 0x6ca   :  { %4881 = vrcp.f32 %v2070_v21  ;;  %v2067_v1 = vpop.xlane.xlu1 %2066 }
 0x6cb   :  { %4883 = vrcp.f32 %v2067_v1 }
 0x6cd   :  { %v2152_v7 = vpop.permute.xlu0 %2151 }
 0x6ce   :  { %v2076_v2 = vpop.permute.xlu1 %2075  ;;  %4670 = vmatpush3.msra.mxu0 %v2152_v7 }
 0x6cf   :  { %4665 = vmatpush3.msra.mxu1 %v2076_v2  ;;  %4679 = vmatprep.subr.mxu0 %v5700_v3 }
 0x6d0   :  { %4674 = vmatprep.subr.mxu1 %v5700_v3 }
 0x6d4   :  { %v4882_v11 = vpop.eup %4881 }
 0x6d5   :  { %v4884_v38 = vpop.eup %4883  ;;  %v2074_v12 = vmul.f32 %v4882_v11, %v4878_v4 }
 0x6d6   :  { %v2072_v10 = vmul.f32 %v4884_v38, %v4880_v5 }
 0x6d7   :  { %4672 = vmatmul.mubr.msk.f32.vlgmr.msra.gmra.mrb[24].mxu0 %vm137_vm2, %v2074_v12 }
 0x6d8   :  { %4667 = vmatmul.mubr.msk.f32.vlgmr.msra.gmra.mrb[24].mxu1 %vm137_vm2, %v2072_v10  ;;  %4680 = vmatpush3.xpose.msk.msra.mxu0 %vm137_vm2, %v5172_v31 }
 0x6d9   :  { %4675 = vmatpush3.xpose.msk.msra.mxu1 %vm137_vm2, %v5134_v25  ;;  %4676 = vmatprep.mubr.msk.f32.mxu1 %vm4992_vm1, %v5700_v3 }
 0x6da   :  { %4681 = vmatprep.mubr.msk.f32.mxu0 %vm4992_vm1, %v5700_v3  ;;  %4689 = vmatprep.subr.mxu0 %v5700_v3 }
 0x6db   :  { %4682 = vmatmul.mubr.msk.f32.vlgmr.msra.gmra.mrb[26].mxu0 %vm137_vm2, %v5246_v42  ;;  %4684 = vmatprep.subr.mxu1 %v5700_v3 }
 0x6dc   :  { %4677 = vmatmul.mubr.msk.f32.vlgmr.msra.gmra.mrb[26].mxu1 %vm137_vm2, %v5248_v43  ;;  %4691 = vmatprep.mubr.msk.f32.mxu0 %vm4992_vm1, %v5700_v3 }
 0x6dd   :  { %4686 = vmatprep.mubr.msk.f32.mxu1 %vm4992_vm1, %v5700_v3 }
 0x7aa   :  { %v5410_v25 = vpop.f32.mrb[24].mxu0 }
 0x7ab   :  { %v5412_v31 = vpop.f32.mrb[24].mxu1  ;;  %v4673_v58 = vpop.f32.mrb[25].mxu0 }
 0x7ac   :  { %v4668_v39 = vpop.f32.mrb[25].mxu1 }
 0x7ae   :  { %v2363_v56 = vpop.f32.mrb[26].mxu0 }
 0x7af   :  { %v2293_v15 = vpop.f32.mrb[26].mxu1  ;;  %v2368_v42 = vmul.f32 0.35355338, %v2363_v56  ;;  %v4683_v26 = vpop.f32.mrb[27].mxu0 }
 0x7b0   :  { %v2367_v49 = vmul.f32 0.35355338, %v2293_v15  ;;  %v4678_v51 = vpop.f32.mrb[27].mxu1 }
 0x7b1   :  { %v2370_v43 = vadd.f32 %v2368_v42, %v5326_v32 }
 0x7b2   :  { %v2369_v57 = vadd.f32 %v2367_v49, %v5326_v32 }
 0x7b3   :  { %v2374_v55 = vsel %vm137_vm2, %v2370_v43, -inf }
 0x7b4   :  { %2375 = vmax.xlane.f32.xlu0 %v2374_v55  ;;  %v2371_v50 = vsel %vm137_vm2, %v2369_v57, -inf }
 0x7b5   :  { %2372 = vmax.xlane.f32.xlu1 %v2371_v50 }
 0x841   :  { %v2376_v61 = vpop.xlane.xlu0 %2375 }
 0x842   :  { %v2378_v59 = vsub.f32 %v2370_v43, %v2376_v61  ;;  %v2373_v62 = vpop.xlane.xlu1 %2372 }
 0x843   :  { %v2377_v52 = vsub.f32 %v2369_v57, %v2373_v62 }
 0x844   :  { %v2381_v6 = vmul.f32 1.442695, %v2378_v59 }
 0x845   :  { %v2379_v4 = vmul.f32 1.442695, %v2377_v52 }
 0x846   :  { %4885 = vpow2.f32 %v2381_v6 }
 0x847   :  { %4887 = vpow2.f32 %v2379_v4 }
 0x850   :  { %v4886_v5 = vpop.eup %4885 }
 0x851   :  { %v4888_v63 = vpop.eup %4887  ;;  %v2386_v29 = vsel %vm137_vm2, %v4886_v5, 0.0 }
 0x852   :  { %2387 = vadd.xlane.f32.xlu0 %v2386_v29  ;;  %v2383_v32 = vsel %vm137_vm2, %v4888_v63, 0.0  ;;  %v1017_v29 = vmul.f32 0.35355338, %v5306_v8 }
 0x853   :  { %2384 = vadd.xlane.f32.xlu1 %v2383_v32  ;;  %v1563_v32 = vmul.f32 0.35355338, %v5318_v53 }
 0x864   :  { %2393 = vrot.lane.b32.xlu1 %v5076_v16, %s5002_s17 }
 0x868   :  { %2469 = vrot.lane.b32.xlu0 %v5080_v17, %s5002_s17 }
 0x8df   :  { %v2388_v21 = vpop.xlane.xlu0 %2387 }
 0x8e0   :  { %4889 = vrcp.f32 %v2388_v21  ;;  %v2385_v1 = vpop.xlane.xlu1 %2384 }
 0x8e1   :  { %4891 = vrcp.f32 %v2385_v1  ;;  %v1381_v1 = vmul.f32 0.35355338, %v5314_v23 }
 0x8e3   :  { %v2470_v7 = vpop.permute.xlu0 %2469 }
 0x8e4   :  { %v2394_v2 = vpop.permute.xlu1 %2393  ;;  %4690 = vmatpush3.msra.mxu0 %v2470_v7  ;;  %v1019_v7 = vsel %vm137_vm2, %v1017_v29, -inf }
 0x8e5   :  { %4685 = vmatpush3.msra.mxu1 %v2394_v2  ;;  %4699 = vmatprep.subr.mxu0 %v5700_v3  ;;  %v1565_v2 = vsel %vm137_vm2, %v1563_v32, -inf }
 0x8e6   :  { %4694 = vmatprep.subr.mxu1 %v5700_v3 }
 0x8ea   :  { %v4890_v11 = vpop.eup %4889 }
 0x8eb   :  { %v4892_v38 = vpop.eup %4891  ;;  %v2392_v12 = vmul.f32 %v4890_v11, %v4886_v5  ;;  %v1383_v11 = vsel %vm137_vm2, %v1381_v1, -inf }
 0x8ec   :  { %v2390_v10 = vmul.f32 %v4892_v38, %v4888_v63  ;;  %v1199_v63 = vmul.f32 0.35355338, %v5310_v13 }
 0x8ed   :  { %4692 = vmatmul.mubr.msk.f32.vlgmr.msra.gmra.mrb[28].mxu0 %vm137_vm2, %v2392_v12 }
 0x8ee   :  { %4687 = vmatmul.mubr.msk.f32.vlgmr.msra.gmra.mrb[28].mxu1 %vm137_vm2, %v2390_v10  ;;  %4700 = vmatpush3.xpose.msk.msra.mxu0 %vm137_vm2, %v5185_v33  ;;  %v1201_v21 = vsel %vm137_vm2, %v1199_v63, -inf }
 0x8ef   :  { %4695 = vmatpush3.xpose.msk.msra.mxu1 %vm137_vm2, %v5145_v27  ;;  %4696 = vmatprep.mubr.msk.f32.mxu1 %vm4992_vm1, %v5700_v3 }
 0x8f0   :  { %4701 = vmatprep.mubr.msk.f32.mxu0 %vm4992_vm1, %v5700_v3  ;;  %4709 = vmatprep.subr.mxu0 %v5700_v3 }
 0x8f1   :  { %4702 = vmatmul.mubr.msk.f32.vlgmr.msra.gmra.mrb[30].mxu0 %vm137_vm2, %v5268_v46  ;;  %4704 = vmatprep.subr.mxu1 %v5700_v3 }
 0x8f2   :  { %4697 = vmatmul.mubr.msk.f32.vlgmr.msra.gmra.mrb[30].mxu1 %vm137_vm2, %v5270_v47  ;;  %4711 = vmatprep.mubr.msk.f32.mxu0 %vm4992_vm1, %v5700_v3 }
 0x8f3   :  { %4706 = vmatprep.mubr.msk.f32.mxu1 %vm4992_vm1, %v5700_v3 }
 0x9c0   :  { %v5446_v27 = vpop.f32.mrb[28].mxu0 }
 0x9c1   :  { %v5448_v33 = vpop.f32.mrb[28].mxu1  ;;  %v4693_v58 = vpop.f32.mrb[29].mxu0 }
 0x9c2   :  { %v4688_v39 = vpop.f32.mrb[29].mxu1 }
 0x9c4   :  { %v2681_v56 = vpop.f32.mrb[30].mxu0 }
 0x9c5   :  { %v2611_v15 = vpop.f32.mrb[30].mxu1  ;;  %v2686_v46 = vmul.f32 0.35355338, %v2681_v56  ;;  %v4703_v42 = vpop.f32.mrb[31].mxu0 }
 0x9c6   :  { %v2685_v26 = vmul.f32 0.35355338, %v2611_v15  ;;  %v4698_v49 = vpop.f32.mrb[31].mxu1 }
 0x9c7   :  { %v2688_v47 = vadd.f32 %v2686_v46, %v5376_v60 }
 0x9c8   :  { %v2687_v51 = vadd.f32 %v2685_v26, %v5376_v60 }
 0x9c9   :  { %v2692_v43 = vsel %vm137_vm2, %v2688_v47, -inf }
 0x9ca   :  { %2693 = vmax.xlane.f32.xlu0 %v2692_v43  ;;  %v2689_v57 = vsel %vm137_vm2, %v2687_v51, -inf }
 0x9cb   :  { %2690 = vmax.xlane.f32.xlu1 %v2689_v57 }
 0xa57   :  { %v2694_v55 = vpop.xlane.xlu0 %2693 }
 0xa58   :  { %v2696_v50 = vsub.f32 %v2688_v47, %v2694_v55  ;;  %v2691_v61 = vpop.xlane.xlu1 %2690 }
 0xa59   :  { %v2695_v59 = vsub.f32 %v2687_v51, %v2691_v61 }
 0xa5a   :  { %v2699_v62 = vmul.f32 1.442695, %v2696_v50 }
 0xa5b   :  { %v2697_v52 = vmul.f32 1.442695, %v2695_v59 }
 0xa5c   :  { %4893 = vpow2.f32 %v2699_v62 }
 0xa5d   :  { %4895 = vpow2.f32 %v2697_v52 }
 0xa66   :  { %v4894_v6 = vpop.eup %4893 }
 0xa67   :  { %v4896_v4 = vpop.eup %4895  ;;  %v2704_v5 = vsel %vm137_vm2, %v4894_v6, 0.0 }
 0xa68   :  { %2705 = vadd.xlane.f32.xlu0 %v2704_v5  ;;  %v2701_v60 = vsel %vm137_vm2, %v4896_v4, 0.0 }
 0xa69   :  { %2702 = vadd.xlane.f32.xlu1 %v2701_v60 }
 0xa7a   :  { %2711 = vrot.lane.b32.xlu1 %v5076_v16, %s5003_s18 }
 0xa7e   :  { %2787 = vrot.lane.b32.xlu0 %v5080_v17, %s5003_s18 }
 0xa9d   :  { %1202 = vmax.xlane.f32.xlu0 %v1201_v21 }
 0xa9e   :  { %1020 = vmax.xlane.f32.xlu1 %v1019_v7 }
 0xaa1   :  { %1566 = vmax.xlane.f32.xlu0 %v1565_v2 }
 0xaa2   :  { %1384 = vmax.xlane.f32.xlu1 %v1383_v11 }
 0xaf5   :  { %v2706_v38 = vpop.xlane.xlu0 %2705 }
 0xaf6   :  { %4897 = vrcp.f32 %v2706_v38  ;;  %v2703_v13 = vpop.xlane.xlu1 %2702 }
 0xaf7   :  { %4899 = vrcp.f32 %v2703_v13 }
 0xaf9   :  { %v2788_v8 = vpop.permute.xlu0 %2787 }
 0xafa   :  { %v2712_v53 = vpop.permute.xlu1 %2711  ;;  %4710 = vmatpush3.msra.mxu0 %v2788_v8 }
 0xafb   :  { %4705 = vmatpush3.msra.mxu1 %v2712_v53  ;;  %4719 = vmatprep.subr.mxu0 %v5700_v3 }
 0xafc   :  { %4714 = vmatprep.subr.mxu1 %v5700_v3 }
 0xb00   :  { %v4898_v23 = vpop.eup %4897 }
 0xb01   :  { %v4900_v12 = vpop.eup %4899  ;;  %v2710_v10 = vmul.f32 %v4898_v23, %v4894_v6 }
 0xb02   :  { %v2708_v58 = vmul.f32 %v4900_v12, %v4896_v4 }
 0xb03   :  { %4712 = vmatmul.mubr.msk.f32.vlgmr.msra.gmra.mrb[32].mxu0 %vm137_vm2, %v2710_v10 }
 0xb04   :  { %4707 = vmatmul.mubr.msk.f32.vlgmr.msra.gmra.mrb[32].mxu1 %vm137_vm2, %v2708_v58  ;;  %4720 = vmatpush3.xpose.msk.msra.mxu0 %vm137_vm2, %v5192_v34 }
 0xb05   :  { %4715 = vmatpush3.xpose.msk.msra.mxu1 %vm137_vm2, %v5196_v35  ;;  %4716 = vmatprep.mubr.msk.f32.mxu1 %vm4992_vm1, %v5700_v3 }
 0xb06   :  { %4721 = vmatprep.mubr.msk.f32.mxu0 %vm4992_vm1, %v5700_v3  ;;  %4724 = vmatprep.subr.mxu1 %v5700_v3 }
 0xb07   :  { %4722 = vmatmul.mubr.msk.f32.vlgmr.msra.gmra.mrb[34].mxu0 %vm137_vm2, %v5080_v17  ;;  %4729 = vmatprep.subr.mxu0 %v5700_v3 }
 0xb08   :  { %4717 = vmatmul.mubr.msk.f32.vlgmr.msra.gmra.mrb[34].mxu1 %vm137_vm2, %v5076_v16  ;;  %4731 = vmatprep.mubr.msk.f32.mxu0 %vm4992_vm1, %v5700_v3 }
 0xb09   :  { %4726 = vmatprep.mubr.msk.f32.mxu1 %vm4992_vm1, %v5700_v3 }
 0xb2a   :  { %v1203_v34 = vpop.xlane.xlu0 %1202 }
 0xb2b   :  { %v1207_v35 = vsub.f32 %v1199_v63, %v1203_v34  ;;  %v1021_v39 = vpop.xlane.xlu1 %1020 }
 0xb2c   :  { %v1025_v56 = vsub.f32 %v1017_v29, %v1021_v39 }
 0xb2d   :  { %v1209_v15 = vmul.f32 1.442695, %v1207_v35 }
 0xb2e   :  { %v1027_v46 = vmul.f32 1.442695, %v1025_v56  ;;  %v1567_v42 = vpop.xlane.xlu0 %1566 }
 0xb2f   :  { %4901 = vpow2.f32 %v1209_v15  ;;  %v1571_v17 = vsub.f32 %v1563_v32, %v1567_v42  ;;  %v1385_v26 = vpop.xlane.xlu1 %1384 }
 0xb30   :  { %4903 = vpow2.f32 %v1027_v46  ;;  %v1389_v49 = vsub.f32 %v1381_v1, %v1385_v26 }
 0xb31   :  { %v1573_v47 = vmul.f32 1.442695, %v1571_v17 }
 0xb32   :  { %v1391_v16 = vmul.f32 1.442695, %v1389_v49 }
 0xb33   :  { %4905 = vpow2.f32 %v1573_v47 }
 0xb34   :  { %4907 = vpow2.f32 %v1391_v16 }
 0xb39   :  { %v4902_v51 = vpop.eup %4901 }
 0xb3a   :  { %v4904_v43 = vpop.eup %4903  ;;  %v1213_v57 = vsel %vm137_vm2, %v4902_v51, 0.0 }
 0xb3b   :  { %1214 = vadd.xlane.f32.xlu0 %v1213_v57  ;;  %v1031_v55 = vsel %vm137_vm2, %v4904_v43, 0.0 }
 0xb3c   :  { %1032 = vadd.xlane.f32.xlu1 %v1031_v55 }
 0xb3d   :  { %v4906_v50 = vpop.eup %4905 }
 0xb3e   :  { %v4908_v61 = vpop.eup %4907  ;;  %v1577_v59 = vsel %vm137_vm2, %v4906_v50, 0.0 }
 0xb3f   :  { %1578 = vadd.xlane.f32.xlu0 %v1577_v59  ;;  %v1395_v62 = vsel %vm137_vm2, %v4908_v61, 0.0 }
 0xb40   :  { %1396 = vadd.xlane.f32.xlu1 %v1395_v62  ;;  %v1200_v62 = vmul.f32 0.35355338, %v5312_v14 }
 0xbc8   :  { %v1215_v52 = vpop.xlane.xlu0 %1214 }
 0xbc9   :  { %4909 = vrcp.f32 %v1215_v52  ;;  %v1033_v6 = vpop.xlane.xlu1 %1032  ;;  %v1018_v52 = vmul.f32 0.35355338, %v5308_v9 }
 0xbca   :  { %4911 = vrcp.f32 %v1033_v6  ;;  %v1564_v6 = vmul.f32 0.35355338, %v5320_v54 }
 0xbcc   :  { %v1579_v4 = vpop.xlane.xlu0 %1578 }
 0xbcd   :  { %4913 = vrcp.f32 %v1579_v4  ;;  %v1397_v5 = vpop.xlane.xlu1 %1396  ;;  %v1204_v4 = vsel %vm137_vm2, %v1200_v62, -inf }
 0xbce   :  { %4915 = vrcp.f32 %v1397_v5  ;;  %v1382_v5 = vmul.f32 0.35355338, %v5316_v48 }
 0xbd3   :  { %v4910_v60 = vpop.eup %4909 }
 0xbd4   :  { %v4912_v63 = vpop.eup %4911  ;;  %v1220_v29 = vmul.f32 %v4910_v60, %v4902_v51  ;;  %v1022_v60 = vsel %vm137_vm2, %v1018_v52, -inf }
 0xbd5   :  { %v1038_v32 = vmul.f32 %v4912_v63, %v4904_v43  ;;  %v1568_v63 = vsel %vm137_vm2, %v1564_v6, -inf }
 0xbd6   :  { %v5494_v21 = vpop.f32.mrb[32].mxu0 }
 0xbd7   :  { %v4914_v1 = vpop.eup %4913  ;;  %v5496_v7 = vpop.f32.mrb[32].mxu1  ;;  %v1223_v13 = vadd.f32 %v1220_v29, %v1038_v32  ;;  %v1386_v29 = vsel %vm137_vm2, %v1382_v5, -inf }
 0xbd8   :  { %v4713_v2 = vpop.f32.mrb[33].mxu0  ;;  %v4916_v11 = vpop.eup %4915  ;;  %v1584_v23 = vmul.f32 %v4914_v1, %v4906_v50 }
 0xbd9   :  { %v4708_v38 = vpop.f32.mrb[33].mxu1  ;;  %v1402_v8 = vmul.f32 %v4916_v11, %v4908_v61 }
 0xbda   :  { %v3031_v53 = vpop.f32.mrb[34].mxu0 }
 0xbdb   :  { %v2961_v12 = vpop.f32.mrb[34].mxu1  ;;  %v4723_v10 = vpop.f32.mrb[35].mxu0  ;;  %v1405_v58 = vadd.f32 %v1402_v8, %v1223_v13  ;;  %v3036_v56 = vmul.f32 0.35355338, %v3031_v53 }
 0xbdc   :  { %v4718_v34 = vpop.f32.mrb[35].mxu1  ;;  %v3035_v39 = vmul.f32 0.35355338, %v2961_v12 }
 0xbdd   :  { %v1587_v35 = vadd.f32 %v1584_v23, %v1405_v58 }
 0xbdf   :  { %v5498_v15 = vmul.f32 0.25, %v1587_v35 }
 0xbe1   :  { %v3038_v46 = vadd.f32 %v3036_v56, %v5498_v15  ;;  %v3037_v42 = vadd.f32 %v3035_v39, %v5498_v15 }
 0xbe3   :  { %v3042_v17 = vsel %vm137_vm2, %v3038_v46, -inf  ;;  %v3039_v26 = vsel %vm137_vm2, %v3037_v42, -inf }
 0xbe4   :  { %3043 = vmax.xlane.f32.xlu0 %v3042_v17  ;;  %3040 = vmax.xlane.f32.xlu1 %v3039_v26 }
 0xc71   :  { %v3044_v49 = vpop.xlane.xlu0 %3043  ;;  %v3041_v47 = vpop.xlane.xlu1 %3040 }
 0xc72   :  { %v3046_v16 = vsub.f32 %v3038_v46, %v3044_v49  ;;  %v3045_v51 = vsub.f32 %v3037_v42, %v3041_v47 }
 0xc74   :  { %v3049_v43 = vmul.f32 1.442695, %v3046_v16  ;;  %v3047_v57 = vmul.f32 1.442695, %v3045_v51 }
 0xc76   :  { %4917 = vpow2.f32 %v3049_v43 }
 0xc77   :  { %4919 = vpow2.f32 %v3047_v57 }
 0xc80   :  { %v4918_v55 = vpop.eup %4917 }
 0xc81   :  { %v4920_v50 = vpop.eup %4919  ;;  %v3054_v61 = vsel %vm137_vm2, %v4918_v55, 0.0 }
 0xc82   :  { %3055 = vadd.xlane.f32.xlu0 %v3054_v61  ;;  %v3051_v59 = vsel %vm137_vm2, %v4920_v50, 0.0 }
 0xc83   :  { %3052 = vadd.xlane.f32.xlu1 %v3051_v59 }
 0xc94   :  { %3061 = vrot.lane.b32.xlu1 %v5096_v19, %s5000_s15 }
 0xc98   :  { %3137 = vrot.lane.b32.xlu0 %v5094_v18, %s5000_s15 }
 0xcb7   :  { %1205 = vmax.xlane.f32.xlu0 %v1204_v4 }
 0xcb8   :  { %1023 = vmax.xlane.f32.xlu1 %v1022_v60 }
 0xcbb   :  { %1569 = vmax.xlane.f32.xlu0 %v1568_v63 }
 0xcbc   :  { %1387 = vmax.xlane.f32.xlu1 %v1386_v29 }
 0xd0f   :  { %v3056_v32 = vpop.xlane.xlu0 %3055 }
 0xd10   :  { %4921 = vrcp.f32 %v3056_v32  ;;  %v3053_v14 = vpop.xlane.xlu1 %3052 }
 0xd11   :  { %4923 = vrcp.f32 %v3053_v14 }
 0xd13   :  { %v3138_v9 = vpop.permute.xlu0 %3137 }
 0xd14   :  { %v3062_v54 = vpop.permute.xlu1 %3061  ;;  %4730 = vmatpush3.msra.mxu0 %v3138_v9 }
 0xd15   :  { %4725 = vmatpush3.msra.mxu1 %v3062_v54  ;;  %4739 = vmatprep.subr.mxu0 %v5700_v3 }
 0xd16   :  { %4734 = vmatprep.subr.mxu1 %v5700_v3 }
 0xd1a   :  { %v4922_v48 = vpop.eup %4921 }
 0xd1b   :  { %v4924_v1 = vpop.eup %4923  ;;  %v3060_v2 = vmul.f32 %v4922_v48, %v4918_v55 }
 0xd1c   :  { %v3058_v11 = vmul.f32 %v4924_v1, %v4920_v50 }
 0xd1d   :  { %4732 = vmatmul.mubr.msk.f32.vlgmr.msra.gmra.mrb[36].mxu0 %vm137_vm2, %v3060_v2 }
 0xd1e   :  { %4727 = vmatmul.mubr.msk.f32.vlgmr.msra.gmra.mrb[36].mxu1 %vm137_vm2, %v3058_v11  ;;  %4740 = vmatpush3.xpose.msk.msra.mxu0 %vm137_vm2, %v5206_v36 }
 0xd1f   :  { %4735 = vmatpush3.xpose.msk.msra.mxu1 %vm137_vm2, %v5212_v37  ;;  %4736 = vmatprep.mubr.msk.f32.mxu1 %vm4992_vm1, %v5700_v3 }
 0xd20   :  { %4741 = vmatprep.mubr.msk.f32.mxu0 %vm4992_vm1, %v5700_v3  ;;  %4744 = vmatprep.subr.mxu1 %v5700_v3 }
 0xd21   :  { %4742 = vmatmul.mubr.msk.f32.vlgmr.msra.gmra.mrb[38].mxu0 %vm137_vm2, %v5152_v28  ;;  %4749 = vmatprep.subr.mxu0 %v5700_v3 }
 0xd22   :  { %4737 = vmatmul.mubr.msk.f32.vlgmr.msra.gmra.mrb[38].mxu1 %vm137_vm2, %v5119_v22  ;;  %4751 = vmatprep.mubr.msk.f32.mxu0 %vm4992_vm1, %v5700_v3 }
 0xd23   :  { %4746 = vmatprep.mubr.msk.f32.mxu1 %vm4992_vm1, %v5700_v3 }
 0xd44   :  { %v1206_v36 = vpop.xlane.xlu0 %1205 }
 0xd45   :  { %v1208_v37 = vsub.f32 %v1200_v62, %v1206_v36  ;;  %v1024_v38 = vpop.xlane.xlu1 %1023 }
 0xd46   :  { %v1026_v13 = vsub.f32 %v1018_v52, %v1024_v38 }
 0xd47   :  { %v1211_v8 = vmul.f32 1.442695, %v1208_v37 }
 0xd48   :  { %v1029_v53 = vmul.f32 1.442695, %v1026_v13  ;;  %v1570_v23 = vpop.xlane.xlu0 %1569 }
 0xd49   :  { %4925 = vpow2.f32 %v1211_v8  ;;  %v1572_v28 = vsub.f32 %v1564_v6, %v1570_v23  ;;  %v1388_v12 = vpop.xlane.xlu1 %1387 }
 0xd4a   :  { %4927 = vpow2.f32 %v1029_v53  ;;  %v1390_v10 = vsub.f32 %v1382_v5, %v1388_v12 }
 0xd4b   :  { %v1575_v58 = vmul.f32 1.442695, %v1572_v28 }
 0xd4c   :  { %v1393_v22 = vmul.f32 1.442695, %v1390_v10 }
 0xd4d   :  { %4929 = vpow2.f32 %v1575_v58 }
 0xd4e   :  { %4931 = vpow2.f32 %v1393_v22 }
 0xd53   :  { %v4926_v34 = vpop.eup %4925 }
 0xd54   :  { %v4928_v35 = vpop.eup %4927  ;;  %v1216_v39 = vsel %vm137_vm2, %v4926_v34, 0.0 }
 0xd55   :  { %1217 = vadd.xlane.f32.xlu0 %v1216_v39  ;;  %v1034_v56 = vsel %vm137_vm2, %v4928_v35, 0.0 }
 0xd56   :  { %1035 = vadd.xlane.f32.xlu1 %v1034_v56 }
 0xd57   :  { %v4930_v46 = vpop.eup %4929 }
 0xd58   :  { %v4932_v42 = vpop.eup %4931  ;;  %v1580_v17 = vsel %vm137_vm2, %v4930_v46, 0.0 }
 0xd59   :  { %1581 = vadd.xlane.f32.xlu0 %v1580_v17  ;;  %v1398_v26 = vsel %vm137_vm2, %v4932_v42, 0.0 }
 0xd5a   :  { %1399 = vadd.xlane.f32.xlu1 %v1398_v26 }
 0xde2   :  { %v1218_v49 = vpop.xlane.xlu0 %1217 }
 0xde3   :  { %4933 = vrcp.f32 %v1218_v49  ;;  %v1036_v47 = vpop.xlane.xlu1 %1035 }
 0xde4   :  { %4935 = vrcp.f32 %v1036_v47 }
 0xde6   :  { %v1582_v16 = vpop.xlane.xlu0 %1581 }
 0xde7   :  { %4937 = vrcp.f32 %v1582_v16  ;;  %v1400_v51 = vpop.xlane.xlu1 %1399 }
 0xde8   :  { %4939 = vrcp.f32 %v1400_v51 }
 0xded   :  { %v4934_v43 = vpop.eup %4933 }
 0xdee   :  { %v4936_v57 = vpop.eup %4935  ;;  %v1222_v55 = vmul.f32 %v4934_v43, %v4926_v34 }
 0xdef   :  { %v1040_v50 = vmul.f32 %v4936_v57, %v4928_v35 }
 0xdf0   :  { %v5544_v61 = vpop.f32.mrb[36].mxu0 }
 0xdf1   :  { %v4938_v59 = vpop.eup %4937  ;;  %v5546_v62 = vpop.f32.mrb[36].mxu1  ;;  %v1224_v5 = vadd.f32 %v1222_v55, %v1040_v50 }
 0xdf2   :  { %v4733_v52 = vpop.f32.mrb[37].mxu0  ;;  %v4940_v6 = vpop.eup %4939  ;;  %v1586_v29 = vmul.f32 %v4938_v59, %v4930_v46 }
 0xdf3   :  { %v4728_v4 = vpop.f32.mrb[37].mxu1  ;;  %v1404_v60 = vmul.f32 %v4940_v6, %v4932_v42 }
 0xdf4   :  { %v3349_v63 = vpop.f32.mrb[38].mxu0 }
 0xdf5   :  { %v3279_v32 = vpop.f32.mrb[38].mxu1  ;;  %v4743_v14 = vpop.f32.mrb[39].mxu0  ;;  %v1406_v9 = vadd.f32 %v1404_v60, %v1224_v5  ;;  %v3354_v2 = vmul.f32 0.35355338, %v3349_v63 }
 0xdf6   :  { %v4738_v54 = vpop.f32.mrb[39].mxu1  ;;  %v3353_v1 = vmul.f32 0.35355338, %v3279_v32 }
 0xdf7   :  { %v1588_v48 = vadd.f32 %v1586_v29, %v1406_v9 }
 0xdf9   :  { %v5548_v11 = vmul.f32 0.25, %v1588_v48 }
 0xdfb   :  { %v3356_v36 = vadd.f32 %v3354_v2, %v5548_v11  ;;  %v3355_v37 = vadd.f32 %v3353_v1, %v5548_v11 }
 0xdfd   :  { %v3360_v38 = vsel %vm137_vm2, %v3356_v36, -inf  ;;  %v3357_v13 = vsel %vm137_vm2, %v3355_v37, -inf }
 0xdfe   :  { %3361 = vmax.xlane.f32.xlu0 %v3360_v38  ;;  %3358 = vmax.xlane.f32.xlu1 %v3357_v13 }
 0xe8b   :  { %v3362_v8 = vpop.xlane.xlu0 %3361  ;;  %v3359_v53 = vpop.xlane.xlu1 %3358 }
 0xe8c   :  { %v3364_v23 = vsub.f32 %v3356_v36, %v3362_v8  ;;  %v3363_v28 = vsub.f32 %v3355_v37, %v3359_v53 }
 0xe8e   :  { %v3367_v12 = vmul.f32 1.442695, %v3364_v23  ;;  %v3365_v10 = vmul.f32 1.442695, %v3363_v28  ;;  %v5701_v23 = vld [vmem:[#allocation6_spill] sm:$0xff]  ;;  %v5702_v28 = vld [vmem:[#allocation5_spill] sm:$0xff] }
 0xe90   :  { %4941 = vpow2.f32 %v3367_v12 }
 0xe91   :  { %4943 = vpow2.f32 %v3365_v10 }
 0xe9a   :  { %v4942_v58 = vpop.eup %4941 }
 0xe9b   :  { %v4944_v22 = vpop.eup %4943  ;;  %v3372_v34 = vsel %vm137_vm2, %v4942_v58, 0.0 }
 0xe9c   :  { %3373 = vadd.xlane.f32.xlu0 %v3372_v34  ;;  %v3369_v35 = vsel %vm137_vm2, %v4944_v22, 0.0 }
 0xe9d   :  { %3370 = vadd.xlane.f32.xlu1 %v3369_v35 }
 0xeae   :  { %3379 = vrot.lane.b32.xlu1 %v5096_v19, %s5001_s16 }
 0xeb2   :  { %3455 = vrot.lane.b32.xlu0 %v5094_v18, %s5001_s16 }
 0xf29   :  { %v3374_v39 = vpop.xlane.xlu0 %3373 }
 0xf2a   :  { %4945 = vrcp.f32 %v3374_v39  ;;  %v3371_v56 = vpop.xlane.xlu1 %3370 }
 0xf2b   :  { %4947 = vrcp.f32 %v3371_v56 }
 0xf2d   :  { %v3456_v46 = vpop.permute.xlu0 %3455 }
 0xf2e   :  { %v3380_v42 = vpop.permute.xlu1 %3379  ;;  %4750 = vmatpush3.msra.mxu0 %v3456_v46 }
 0xf2f   :  { %4745 = vmatpush3.msra.mxu1 %v3380_v42  ;;  %4759 = vmatprep.subr.mxu0 %v5700_v3 }
 0xf30   :  { %4754 = vmatprep.subr.mxu1 %v5700_v3 }
 0xf34   :  { %v4946_v17 = vpop.eup %4945 }
 0xf35   :  { %v4948_v26 = vpop.eup %4947  ;;  %v3378_v49 = vmul.f32 %v4946_v17, %v4942_v58 }
 0xf36   :  { %v3376_v47 = vmul.f32 %v4948_v26, %v4944_v22 }
 0xf37   :  { %4752 = vmatmul.mubr.msk.f32.vlgmr.msra.gmra.mrb[40].mxu0 %vm137_vm2, %v3378_v49 }
 0xf38   :  { %4747 = vmatmul.mubr.msk.f32.vlgmr.msra.gmra.mrb[40].mxu1 %vm137_vm2, %v3376_v47  ;;  %4760 = vmatpush3.xpose.msk.msra.mxu0 %vm137_vm2, %v5236_v40 }
 0xf39   :  { %4755 = vmatpush3.xpose.msk.msra.mxu1 %vm137_vm2, %v5238_v41  ;;  %4756 = vmatprep.mubr.msk.f32.mxu1 %vm4992_vm1, %v5700_v3 }
 0xf3a   :  { %4761 = vmatprep.mubr.msk.f32.mxu0 %vm4992_vm1, %v5700_v3  ;;  %4769 = vmatprep.subr.mxu0 %v5700_v3 }
 0xf3b   :  { %4762 = vmatmul.mubr.msk.f32.vlgmr.msra.gmra.mrb[42].mxu0 %vm137_vm2, %v5166_v30  ;;  %4764 = vmatprep.subr.mxu1 %v5700_v3 }
 0xf3c   :  { %4757 = vmatmul.mubr.msk.f32.vlgmr.msra.gmra.mrb[42].mxu1 %vm137_vm2, %v5130_v24  ;;  %4771 = vmatprep.mubr.msk.f32.mxu0 %vm4992_vm1, %v5700_v3 }
 0xf3d   :  { %4766 = vmatprep.mubr.msk.f32.mxu1 %vm4992_vm1, %v5700_v3 }
0x100a   :  { %v5582_v40 = vpop.f32.mrb[40].mxu0 }
0x100b   :  { %v5584_v41 = vpop.f32.mrb[40].mxu1  ;;  %v4753_v16 = vpop.f32.mrb[41].mxu0 }
0x100c   :  { %v4748_v51 = vpop.f32.mrb[41].mxu1 }
0x100e   :  { %v3667_v43 = vpop.f32.mrb[42].mxu0 }
0x100f   :  { %v3597_v57 = vpop.f32.mrb[42].mxu1  ;;  %v3672_v30 = vmul.f32 0.35355338, %v3667_v43  ;;  %v4763_v55 = vpop.f32.mrb[43].mxu0 }
0x1010   :  { %v3671_v50 = vmul.f32 0.35355338, %v3597_v57  ;;  %v4758_v59 = vpop.f32.mrb[43].mxu1 }
0x1011   :  { %v3674_v24 = vadd.f32 %v3672_v30, %v5498_v15 }
0x1012   :  { %v3673_v52 = vadd.f32 %v3671_v50, %v5498_v15 }
0x1013   :  { %v3678_v6 = vsel %vm137_vm2, %v3674_v24, -inf }
0x1014   :  { %3679 = vmax.xlane.f32.xlu0 %v3678_v6  ;;  %v3675_v4 = vsel %vm137_vm2, %v3673_v52, -inf }
0x1015   :  { %3676 = vmax.xlane.f32.xlu1 %v3675_v4  ;;  %v4234_v4 = vld [vmem:[%s5691_s3] sm:$0xff] }
0x10a1   :  { %v3680_v5 = vpop.xlane.xlu0 %3679 }
0x10a2   :  { %v3682_v60 = vsub.f32 %v3674_v24, %v3680_v5  ;;  %v3677_v63 = vpop.xlane.xlu1 %3676  ;;  %v4235_v5 = vld [vmem:[%s5691_s3 + $0x8] sm:$0xff] }
0x10a3   :  { %v3681_v29 = vsub.f32 %v3673_v52, %v3677_v63  ;;  %v5007_v63 = vmov 0.0|0.0  }
0x10a4   :  { %v3685_v32 = vmul.f32 1.442695, %v3682_v60  ;;  %v4814_v60 = vpack.c.bf16 %v4235_v5, %v4234_v4 }
0x10a5   :  { %v3683_v14 = vmul.f32 1.442695, %v3681_v29  ;;  %v4237_v29 = vld [vmem:[%s5691_s3 + $0x18] sm:$0xff] }
0x10a6   :  { %4949 = vpow2.f32 %v3685_v32 }
0x10a7   :  { %4951 = vpow2.f32 %v3683_v14 }
0x10b0   :  { %v4950_v9 = vpop.eup %4949 }
0x10b1   :  { %v4952_v54 = vpop.eup %4951  ;;  %v3690_v48 = vsel %vm137_vm2, %v4950_v9, 0.0 }
0x10b2   :  { %3691 = vadd.xlane.f32.xlu0 %v3690_v48  ;;  %v3687_v15 = vsel %vm137_vm2, %v4952_v54, 0.0 }
0x10b3   :  { %3688 = vadd.xlane.f32.xlu1 %v3687_v15 }
0x10c4   :  { %3697 = vrot.lane.b32.xlu1 %v5096_v19, %s5002_s17 }
0x10c8   :  { %3773 = vrot.lane.b32.xlu0 %v5094_v18, %s5002_s17 }
0x113f   :  { %v3692_v1 = vpop.xlane.xlu0 %3691 }
0x1140   :  { %4953 = vrcp.f32 %v3692_v1  ;;  %v3689_v2 = vpop.xlane.xlu1 %3688 }
0x1141   :  { %4955 = vrcp.f32 %v3689_v2 }
0x1143   :  { %v3774_v36 = vpop.permute.xlu0 %3773 }
0x1144   :  { %v3698_v37 = vpop.permute.xlu1 %3697  ;;  %4770 = vmatpush3.msra.mxu0 %v3774_v36 }
0x1145   :  { %4765 = vmatpush3.msra.mxu1 %v3698_v37  ;;  %4779 = vmatprep.subr.mxu0 %v5700_v3 }
0x1146   :  { %4774 = vmatprep.subr.mxu1 %v5700_v3 }
0x114a   :  { %v4954_v38 = vpop.eup %4953 }
0x114b   :  { %v4956_v13 = vpop.eup %4955  ;;  %v3696_v8 = vmul.f32 %v4954_v38, %v4950_v9 }
0x114c   :  { %v3694_v53 = vmul.f32 %v4956_v13, %v4952_v54 }
0x114d   :  { %4772 = vmatmul.mubr.msk.f32.vlgmr.msra.gmra.mrb[44].mxu0 %vm137_vm2, %v3696_v8 }
0x114e   :  { %4767 = vmatmul.mubr.msk.f32.vlgmr.msra.gmra.mrb[44].mxu1 %vm137_vm2, %v3694_v53  ;;  %4780 = vmatpush3.xpose.msk.msra.mxu0 %vm137_vm2, %v5258_v44 }
0x114f   :  { %4775 = vmatpush3.xpose.msk.msra.mxu1 %vm137_vm2, %v5260_v45  ;;  %4776 = vmatprep.mubr.msk.f32.mxu1 %vm4992_vm1, %v5700_v3 }
0x1150   :  { %4781 = vmatprep.mubr.msk.f32.mxu0 %vm4992_vm1, %v5700_v3  ;;  %4789 = vmatprep.subr.mxu0 %v5700_v3 }
0x1151   :  { %4782 = vmatmul.mubr.msk.f32.vlgmr.msra.gmra.mrb[46].mxu0 %vm137_vm2, %v5701_v23  ;;  %4784 = vmatprep.subr.mxu1 %v5700_v3 }
0x1152   :  { %4777 = vmatmul.mubr.msk.f32.vlgmr.msra.gmra.mrb[46].mxu1 %vm137_vm2, %v5702_v28  ;;  %4791 = vmatprep.mubr.msk.f32.mxu0 %vm4992_vm1, %v5700_v3 }
0x1153   :  { %4786 = vmatprep.mubr.msk.f32.mxu1 %vm4992_vm1, %v5700_v3 }
0x1220   :  { %v3845_v44 = vpop.f32.mrb[44].mxu0 }
0x1221   :  { %v3769_v45 = vpop.f32.mrb[44].mxu1  ;;  %v4773_v12 = vpop.f32.mrb[45].mxu0 }
0x1222   :  { %v4768_v10 = vpop.f32.mrb[45].mxu1 }
0x1224   :  { %v3985_v58 = vpop.f32.mrb[46].mxu0 }
0x1225   :  { %v3915_v22 = vpop.f32.mrb[46].mxu1  ;;  %v3990_v34 = vmul.f32 0.35355338, %v3985_v58  ;;  %v4783_v35 = vpop.f32.mrb[47].mxu0 }
0x1226   :  { %v3989_v39 = vmul.f32 0.35355338, %v3915_v22  ;;  %v4778_v56 = vpop.f32.mrb[47].mxu1 }
0x1227   :  { %v3992_v46 = vadd.f32 %v3990_v34, %v5548_v11 }
0x1228   :  { %v3991_v42 = vadd.f32 %v3989_v39, %v5548_v11 }
0x1229   :  { %v3996_v17 = vsel %vm137_vm2, %v3992_v46, -inf }
0x122a   :  { %3997 = vmax.xlane.f32.xlu0 %v3996_v17  ;;  %v3993_v26 = vsel %vm137_vm2, %v3991_v42, -inf }
0x122b   :  { %3994 = vmax.xlane.f32.xlu1 %v3993_v26 }
0x12b7   :  { %v3998_v49 = vpop.xlane.xlu0 %3997 }
0x12b8   :  { %v4000_v47 = vsub.f32 %v3992_v46, %v3998_v49  ;;  %v3995_v16 = vpop.xlane.xlu1 %3994 }
0x12b9   :  { %v3999_v51 = vsub.f32 %v3991_v42, %v3995_v16 }
0x12ba   :  { %v4003_v43 = vmul.f32 1.442695, %v4000_v47 }
0x12bb   :  { %v4001_v57 = vmul.f32 1.442695, %v3999_v51 }
0x12bc   :  { %4957 = vpow2.f32 %v4003_v43 }
0x12bd   :  { %4959 = vpow2.f32 %v4001_v57 }
0x12c6   :  { %v4958_v30 = vpop.eup %4957 }
0x12c7   :  { %v4960_v55 = vpop.eup %4959  ;;  %v4008_v50 = vsel %vm137_vm2, %v4958_v30, 0.0 }
0x12c8   :  { %4009 = vadd.xlane.f32.xlu0 %v4008_v50  ;;  %v4005_v11 = vsel %vm137_vm2, %v4960_v55, 0.0 }
0x12c9   :  { %4006 = vadd.xlane.f32.xlu1 %v4005_v11 }
0x12da   :  { %4015 = vrot.lane.b32.xlu1 %v5096_v19, %s5003_s18 }
0x12de   :  { %4169 = vrot.lane.b32.xlu1 %v5584_v41, %s5004_s19  ;;  %4091 = vrot.lane.b32.xlu0 %v5094_v18, %s5003_s18 }
0x12e2   :  { %4171 = vrot.lane.b32.xlu1 %v5582_v40, %s5004_s19  ;;  %4177 = vrot.lane.b32.xlu0 %v3769_v45, %s5005_s20 }
0x12e6   :  { %4179 = vrot.lane.b32.xlu1 %v3845_v44, %s5005_s20  ;;  %2865 = vrot.lane.b32.xlu0 %v5412_v31, %s5004_s19 }
0x12ea   :  { %2867 = vrot.lane.b32.xlu1 %v5410_v25, %s5004_s19  ;;  %2873 = vrot.lane.b32.xlu0 %v5448_v33, %s5005_s20 }
0x12ee   :  { %2875 = vrot.lane.b32.xlu1 %v5446_v27, %s5005_s20 }
0x1355   :  { %v4010_v19 = vpop.xlane.xlu0 %4009 }
0x1356   :  { %4961 = vrcp.f32 %v4010_v19  ;;  %v4007_v59 = vpop.xlane.xlu1 %4006 }
0x1357   :  { %4963 = vrcp.f32 %v4007_v59 }
0x1359   :  { %v4092_v41 = vpop.permute.xlu0 %4091 }
0x135a   :  { %v4016_v24 = vpop.permute.xlu1 %4015  ;;  %4790 = vmatpush3.msra.mxu0 %v4092_v41 }
0x135b   :  { %4785 = vmatpush3.msra.mxu1 %v4016_v24 }
0x135c   :  { %4813 = vmatprep.subr.bf16.mxu1 %v5007_v63 }
0x135e   :  { %v4170_v14 = vpop.permute.xlu1 %4169 }
0x135f   :  { %v4191_v2 = vsel %vm137_vm2, %v5546_v62, %v4170_v14 }
0x1360   :  { %v4962_v18 = vpop.eup %4961 }
0x1361   :  { %v4964_v40 = vpop.eup %4963  ;;  %v4014_v52 = vmul.f32 %v4962_v18, %v4958_v30 }
0x1362   :  { %v4012_v6 = vmul.f32 %v4964_v40, %v4960_v55  ;;  %v4172_v9 = vpop.permute.xlu1 %4171 }
0x1363   :  { %4792 = vmatmul.mubr.msk.f32.vlgmr.msra.gmra.mrb[48].mxu0 %vm137_vm2, %v4014_v52  ;;  %v4192_v36 = vsel %vm137_vm2, %v5544_v61, %v4172_v9 }
0x1364   :  { %4787 = vmatmul.mubr.msk.f32.vlgmr.msra.gmra.mrb[48].mxu1 %vm137_vm2, %v4012_v6 }
0x1365   :  { %4802 = vmatprep.mubr.msk.f32.mxu1 %vm4992_vm1, %v5700_v3  ;;  %4815 = vmatpush3.bf16.msra.mxu1 %v4814_v60  ;;  %v4236_v3 = vld [vmem:[%s5691_s3 + $0x10] sm:$0xff] }
0x1366   :  { %4816 = vmatprep.subr.bf16.mxu1 %v5007_v63  ;;  %v4817_v32 = vpack.c.bf16 %v4237_v29, %v4236_v3  ;;  %v4180_v54 = vpop.permute.xlu1 %4179  ;;  %v4241_v3 = vlaneseq }
0x1367   :  { %v4194_v37 = vsel %vm2889_vm3, %v4192_v36, %v4180_v54 }
0x1368   :  { %v4242_v29 = vshrl.u32 %v4241_v3, 7 }
0x1369   :  { %4818 = vmatpush3.bf16.msra.mxu1 %v4817_v32  ;;  %v4238_v32 = vld [vmem:[%s5692_s4] sm:$0x1]  ;;  %s4967_s4 = scalar_lea.vmem %s4338_s1, 32 }
0x136a   :  { %v2868_v48 = vpop.permute.xlu1 %2867  ;;  %v4239_v14 = vmul.f32 1.5, %v4238_v32  ;;  %v4243_v9 = vsub.s32 0, %v4242_v29  ;;  %p4968_p0 = scmp.ne.s32.totalorder %s4338_s1, %s4967_s4  ;;  %p4973_p2 = scmp.lt.s32.totalorder %s4967_s4, %s4967_s4 }
0x136b   :  { %v2888_v62 = vsel %vm137_vm2, %v5372_v0, %v2868_v48 }
0x136c   :  { %v4244_v54 = vrot.slane %v4239_v14, %v4243_v9  ;;  %p4974_p3 = por %p4973_p2, %p4972_p1 }
0x136e   :  { %v2876_v1 = vpop.permute.xlu1 %2875  ;;  %p4975_p4 = pnand %p4974_p3, %p4968_p0 }
0x136f   :  { %v2891_v12 = vsel %vm2889_vm3, %v2888_v62, %v2876_v1 }
0x1436   :  { %v4163_v25 = vpop.f32.mrb[48].mxu0 }
0x1437   :  { %v4087_v31 = vpop.f32.mrb[48].mxu1  ;;  %v4793_v27 = vpop.f32.mrb[49].mxu0  ;;  %4187 = vrot.lane.b32.xlu1 %v4163_v25, %s5006_s21 }
0x1438   :  { %4185 = vrot.lane.b32.xlu0 %v4087_v31, %s5006_s21  ;;  %v4788_v33 = vpop.f32.mrb[49].mxu1 }
0x143b   :  { %2883 = vrot.lane.b32.xlu1 %v5494_v21, %s5006_s21  ;;  %v4178_v21 = vpop.permute.xlu0 %4177 }
0x143c   :  { %2881 = vrot.lane.b32.xlu0 %v5496_v7, %s5006_s21  ;;  %v4193_v8 = vsel %vm2889_vm3, %v4191_v2, %v4178_v21 }
0x143f   :  { %v2866_v15 = vpop.permute.xlu0 %2865 }
0x1440   :  { %v2887_v61 = vsel %vm137_vm2, %v5374_v20, %v2866_v15 }
0x1443   :  { %v2874_v7 = vpop.permute.xlu0 %2873 }
0x1444   :  { %v2890_v22 = vsel %vm2889_vm3, %v2887_v61, %v2874_v7 }
0x14a9   :  { %v4188_v38 = vpop.permute.xlu1 %4187 }
0x14aa   :  { %v4196_v13 = vsel %vm2892_vm4, %v4194_v37, %v4188_v38  ;;  %v4186_v53 = vpop.permute.xlu0 %4185 }
0x14ab   :  { %v4221_v23 = vsel %vm36_vm0, %v4196_v13, 0.0  ;;  %v4195_v28 = vsel %vm2892_vm4, %v4193_v8, %v4186_v53 }
0x14ac   :  { %v4222_v44 = vrot.slane %v4221_v23, 4  ;;  %v4214_v45 = vsel %vm36_vm0, %v4195_v28, 0.0 }
0x14ad   :  { %v4215_v10 = vrot.slane %v4214_v45, 4  ;;  %v2884_v58 = vpop.permute.xlu1 %2883 }
0x14ae   :  { %v4223_v34 = vadd.f32 %v4222_v44, %v4221_v23  ;;  %v2894_v35 = vsel %vm2892_vm4, %v2891_v12, %v2884_v58  ;;  %v2882_v39 = vpop.permute.xlu0 %2881 }
0x14af   :  { %v4216_v56 = vadd.f32 %v4215_v10, %v4214_v45  ;;  %v4204_v46 = vsel %vm36_vm0, %v2894_v35, 0.0  ;;  %v2893_v0 = vsel %vm2892_vm4, %v2890_v22, %v2882_v39 }
0x14b0   :  { %v4224_v42 = vrot.slane %v4223_v34, 2  ;;  %v4205_v17 = vrot.slane %v4204_v46, 4  ;;  %v4197_v26 = vsel %vm36_vm0, %v2893_v0, 0.0 }
0x14b1   :  { %v4217_v20 = vrot.slane %v4216_v56, 2  ;;  %v4198_v49 = vrot.slane %v4197_v26, 4 }
0x14b2   :  { %v4225_v47 = vadd.f32 %v4224_v42, %v4223_v34  ;;  %v4206_v16 = vadd.f32 %v4205_v17, %v4204_v46 }
0x14b3   :  { %v4218_v51 = vadd.f32 %v4217_v20, %v4216_v56  ;;  %v4199_v43 = vadd.f32 %v4198_v49, %v4197_v26 }
0x14b4   :  { %v4226_v57 = vrot.slane %v4225_v47, 1  ;;  %v4207_v30 = vrot.slane %v4206_v16, 2 }
0x14b5   :  { %v4219_v55 = vrot.slane %v4218_v51, 1  ;;  %v4200_v50 = vrot.slane %v4199_v43, 2 }
0x14b6   :  { %v4227_v11 = vadd.f32 %v4226_v57, %v4225_v47  ;;  %v4208_v19 = vadd.f32 %v4207_v30, %v4206_v16 }
0x14b7   :  { %v4220_v59 = vadd.f32 %v4219_v55, %v4218_v51  ;;  %v4201_v41 = vadd.f32 %v4200_v50, %v4199_v43 }
0x14b8   :  { %v4229_v24 = vmul.f32 0.125, %v4227_v11  ;;  %v4209_v18 = vrot.slane %v4208_v19, 1 }
0x14b9   :  { %v4228_v40 = vmul.f32 0.125, %v4220_v59  ;;  %v4202_v52 = vrot.slane %v4201_v41, 1 }
0x14ba   :  { %v4210_v6 = vadd.f32 %v4209_v18, %v4208_v19  ;;  %v4231_v31 = vmul.f32 0.5, %v4229_v24 }
0x14bb   :  { %v4203_v25 = vadd.f32 %v4202_v52, %v4201_v41  ;;  %v4230_v33 = vmul.f32 0.5, %v4228_v40 }
0x14bc   :  { %v4213_v27 = vmul.f32 0.125, %v4210_v6 }
0x14bd   :  { %v4212_v4 = vmul.f32 0.125, %v4203_v25 }
0x14be   :  { %v4233_v5 = vadd.f32 %v4231_v31, %v4213_v27 }
0x14bf   :  { %v4232_v60 = vadd.f32 %v4230_v33, %v4212_v4 }
0x14c1   :  { %v4249_v63 = vsel %vm4248_vm5, %v4233_v5, %v4232_v60 }
0x14c2   :  { %4803 = vmatmul.mubr.msk.f32.vlgmr.msra.gmra.mrb[50].mxu1 %vm36_vm0, %v4249_v63 }
0x1595   :  { %v4318_v21 = vpop.f32.mrb[50].mxu1 }
0x1596   :  { %v4319_v48 = vadd.f32 %v4318_v21, %v4244_v54  ;;  %v4804_v15 = vpop.f32.mrb[51].mxu1 }
0x1598   :  { %v4322_v1 = vmul.f32 %v4319_v48, %v4319_v48 }
0x159a   :  { %v4324_v7 = vsel %vm4323_vm6, %v4322_v1, 0.0 }
0x159b   :  { %4325 = vadd.xlane.f32.xlu0 %v4324_v7 }
0x1628   :  { %v4326_v2 = vpop.xlane.xlu0 %4325 }
0x1629   :  { %v4327_v36 = vmax.f32 %v4326_v2, 1e-24 }
0x162b   :  { %4965 = vrsqrt.f32 %v4327_v36 }
0x1635   :  { %v4966_v37 = vpop.eup %4965 }
0x1636   :  { %v4329_v38 = vmul.f32 %v4966_v37, %v4319_v48 }
0x1638   :  { %4330 = vst.msk [vmem:[#allocation2] sm:$0x3] %vm4323_vm6, %v4329_v38 }
0x1639   :  { %4978 = shalt.err (!%p4975_p4)
}
0x163a   :  { %s4979_s9 = scalar_lea.hbm %s5693_s5, 32 }
0x163b   :  { %p4980_p5 = scmp.ne.s32.totalorder %s5693_s5, %s4979_s9  ;;  %p4983_p6 = scmp.lt.u32.totalorder %s4979_s9, %s5693_s5 }
0x163d   :  { %p4985_p7 = pnand %p4983_p6, %p4980_p5 }
0x163f   :  { %4988 = shalt.err (!%p4985_p7)
}
0x1640   :  { %4340 = dma.vmem_to_hbm [thread:$0]  %s4338_s1, 32, %s5693_s5, [#allocation3]  }
0x1641   :  { %4989 = dma.done.wait [#allocation3], 32  }
0x1642   :  { %4990 = vsyncadd [#allocation3], 4294967264 }
0x1643   :  { %4344 = vsyncpa [#allocation3], 1 }

</bundles_post_ra>
